<compile_context>
chip_gen: v5e
topology: v5e:2x2
jax: 0.10.0
libtpu: 0.0.40
codegen_flags: <defaults>
</compile_context>

<pallas_src>
import math
import numpy as np
import jax
import jax.numpy as jnp
from jax.scipy.special import logsumexp
from jax.experimental import pallas as pl
from jax.experimental.pallas import tpu as pltpu

LANE = 128
MAX_LANE_BLOCK = 2048          # lanes per grid step; large blocks amortize pipeline overhead
EXPM_SQUARINGS = 8
EXPM_TAYLOR_ORDER = 7          # Taylor terms up to M^7 / 7!
LOG_EPS = 1e-30


# ============================================================================
# Pallas kernel: fused expm + log + Felsenstein pruning + per-site tree log-lik
# ============================================================================

def _round_up(x, m):
    return ((x + m - 1) // m) * m


def _choose_lane_block(L):
    """Largest block <= MAX_LANE_BLOCK, keeping >= 2 grid blocks when the workload
    allows it (so both TensorCores can be used on v7x via dimension_semantics)."""
    Lp = _round_up(max(L, 1), LANE)
    if Lp <= LANE:
        return LANE
    n_blocks = max(2, -(-Lp // MAX_LANE_BLOCK))
    return _round_up(-(-Lp // n_blocks), LANE)


def _matmul_lanes(x, y):
    # x, y: (A, A, L) per-lane matrices; out[a, c, l] = sum_b x[a, b, l] * y[b, c, l].
    # Unrolled over the tiny alphabet A -> pure VPU elementwise mul/add (no MXU).
    A = x.shape[0]
    acc = x[:, 0:1, :] * y[0:1, :, :]
    for b in range(1, A):
        acc = acc + x[:, b:b + 1, :] * y[b:b + 1, :, :]
    return acc


def _expm_lanes(scaled_m, eye):
    """expm of per-lane (A, A) matrices via order-7 Taylor + 2^EXPM_SQUARINGS squarings.
    scaled_m: (A, A, L) already divided by 2**EXPM_SQUARINGS; eye: (A, A, 1)."""
    p = eye + scaled_m
    term = scaled_m
    for k in range(2, EXPM_TAYLOR_ORDER + 1):
        term = _matmul_lanes(term, scaled_m) * (1.0 / k)
        p = p + term
    for _ in range(EXPM_SQUARINGS):
        p = _matmul_lanes(p, p)
    return p


def _fused_felsenstein_kernel(eye_ref, q_ref, b1_ref, b2_ref, lf1_ref, lf2_ref, lstat_ref,
                              fels_ref, sitell_ref):
    # Blocks: eye (A,A,1); q (A,A,LB); b1/b2 (1,LB); lf1/lf2/lstat/fels (A,LB); sitell (1,LB).
    #   fels[a,l]  = lse_b(log P1[a,b,l] + lf1[b,l]) + lse_b(log P2[a,b,l] + lf2[b,l]),
    #                with Pi = expm(Q[:,:,l] * bi[l])
    #   sitell[l]  = lse_a(fels[a,l] + lstat[a,l])
    eye = eye_ref[...]
    q = q_ref[...]
    scale = 1.0 / (2.0 ** EXPM_SQUARINGS)

    def branch_term(b_row, lf):
        scaled = q * (b_row[None, :, :] * scale)            # (A, A, LB)
        p = _expm_lanes(scaled, eye)
        logp = jnp.log(jnp.maximum(p, LOG_EPS))
        x = logp + lf[None, :, :]                           # (A, A, LB)
        m = jnp.max(x, axis=1, keepdims=True)
        return m[:, 0, :] + jnp.log(jnp.sum(jnp.exp(x - m), axis=1))

    fels = branch_term(b1_ref[...], lf1_ref[...]) + branch_term(b2_ref[...], lf2_ref[...])
    fels_ref[...] = fels

    y = fels + lstat_ref[...]
    my = jnp.max(y, axis=0, keepdims=True)
    sitell_ref[...] = my + jnp.log(jnp.sum(jnp.exp(y - my), axis=0, keepdims=True))


def fused_felsenstein_site_ll(Q_AxAxL, logf1_VxSxA, logf2_VxSxA, log_stat_VxSxA,
                              branch1_V, branch2_V):
    """Fused expm + log + Felsenstein + per-site tree log-likelihood.

    Q_AxAxL is already lane-major with lane l = v*S + s. Returns
    (log_fels_VxSxA, site_ll_VxS)."""
    V, S, A = logf1_VxSxA.shape
    L = V * S

    def to_lanes(x_VxSxA):
        return jnp.transpose(x_VxSxA, (2, 0, 1)).reshape(A, L)

    lf1 = to_lanes(logf1_VxSxA)
    lf2 = to_lanes(logf2_VxSxA)
    lstat = to_lanes(log_stat_VxSxA)
    b1 = jnp.broadcast_to(branch1_V[:, None], (V, S)).reshape(1, L)
    b2 = jnp.broadcast_to(branch2_V[:, None], (V, S)).reshape(1, L)

    blk = _choose_lane_block(L)
    Lp = _round_up(L, blk)

    def pad(x):
        p = Lp - x.shape[-1]
        if p:
            x = jnp.pad(x, [(0, 0)] * (x.ndim - 1) + [(0, p)])
        return x

    q_p, b1_p, b2_p, lf1_p, lf2_p, lstat_p = map(pad, (Q_AxAxL, b1, b2, lf1, lf2, lstat))
    eye_AxAx1 = jnp.eye(A, dtype=jnp.float32)[:, :, None]

    n_matmuls = 2 * (EXPM_TAYLOR_ORDER - 1 + EXPM_SQUARINGS)
    flops_per_lane = n_matmuls * 2 * A ** 3 + 20 * A * A
    transc_per_lane = 4 * A * A + 3 * A + 3
    bytes_per_lane = 4 * (A * A + 2 + 4 * A + 1)
    cost = pl.CostEstimate(flops=flops_per_lane * Lp,
                           transcendentals=transc_per_lane * Lp,
                           bytes_accessed=bytes_per_lane * Lp)

    fels, sitell = pl.pallas_call(
        _fused_felsenstein_kernel,
        out_shape=(jax.ShapeDtypeStruct((A, Lp), jnp.float32),
                   jax.ShapeDtypeStruct((1, Lp), jnp.float32)),
        grid=(Lp // blk,),
        in_specs=[
            pl.BlockSpec((A, A, 1), lambda i: (0, 0, 0)),      # eye
            pl.BlockSpec((A, A, blk), lambda i: (0, 0, i)),    # Q
            pl.BlockSpec((1, blk), lambda i: (0, i)),          # b1
            pl.BlockSpec((1, blk), lambda i: (0, i)),          # b2
            pl.BlockSpec((A, blk), lambda i: (0, i)),          # logf1
            pl.BlockSpec((A, blk), lambda i: (0, i)),          # logf2
            pl.BlockSpec((A, blk), lambda i: (0, i)),          # log stat probs
        ],
        out_specs=(pl.BlockSpec((A, blk), lambda i: (0, i)),
                   pl.BlockSpec((1, blk), lambda i: (0, i))),
        compiler_params=pltpu.CompilerParams(
            dimension_semantics=("parallel",),
            vmem_limit_bytes=32 * 1024 * 1024),
        cost_estimate=cost,
    )(eye_AxAx1, q_p, b1_p, b2_p, lf1_p, lf2_p, lstat_p)

    # Padded lanes are sliced off BEFORE any reduction over S.
    log_fels_VxSxA = jnp.transpose(fels[:, :L].reshape(A, V, S), (1, 2, 0))
    site_ll_VxS = sitell[0, :L].reshape(V, S)
    return log_fels_VxSxA, site_ll_VxS


# ============================================================================
# Pure-JAX references (used for the kernel correctness check only)
# ============================================================================

def _expm_taylor(M):
    """Reference: fixed scaling-and-squaring Taylor expm for small (..., A, A) matrices."""
    s = EXPM_SQUARINGS
    Ms = M / (2.0 ** s)
    eye = jnp.eye(M.shape[-1], dtype=M.dtype)
    P = eye + Ms
    term = Ms
    hi = jax.lax.Precision.HIGHEST
    for k in range(2, EXPM_TAYLOR_ORDER + 1):
        term = jnp.matmul(term, Ms, precision=hi) / k
        P = P + term
    for _ in range(s):
        P = jnp.matmul(P, P, precision=hi)
    return P


def _fused_ref(Q_VxSxAxA, logf1, logf2, log_stat, b1_V, b2_V):
    P1 = _expm_taylor(Q_VxSxAxA * b1_V[:, None, None, None])
    P2 = _expm_taylor(Q_VxSxAxA * b2_V[:, None, None, None])
    logP1 = jnp.log(jnp.maximum(P1, LOG_EPS))
    logP2 = jnp.log(jnp.maximum(P2, LOG_EPS))
    fels = (logsumexp(logP1 + logf1[:, :, None, :], axis=-1) +
            logsumexp(logP2 + logf2[:, :, None, :], axis=-1))
    site_ll = logsumexp(fels + log_stat, axis=-1)
    return fels, site_ll


# ============================================================================
# vcsmc_utils-style helpers (plain JAX glue)
# ============================================================================

def gather_K(arr, idx_K):
    return arr[jnp.arange(arr.shape[0]), idx_K]


def concat_K(arr_Kxr, val_K):
    return jnp.concatenate([arr_Kxr, val_K[:, None]], axis=1)


def replace_with_merged_K(arr, idx1_K, idx2_K, new_val):
    """Writes new_val at idx1 and removes the entry at idx2 (t -> t-1), per row."""
    Kd, t = arr.shape[0], arr.shape[1]
    arr = arr.at[jnp.arange(Kd), idx1_K].set(new_val)
    cols = jnp.arange(t - 1)[None, :]
    src = cols + (cols >= idx2_K[:, None]).astype(cols.dtype)            # (Kd, t-1)
    src = src.reshape((Kd, t - 1) + (1,) * (arr.ndim - 2))
    src = jnp.broadcast_to(src, (Kd, t - 1) + arr.shape[2:])
    return jnp.take_along_axis(arr, src, axis=1)


def hash_K(x):
    x = x.astype(jnp.int32)
    return (x * jnp.int32(0x27D4EB2D) + jnp.int32(0x165667B1)) & jnp.int32(0x7FFFFFFF)


def hash_tree_K(h1, h2):
    return ((h1 * jnp.int32(31) + h2 * jnp.int32(17)) ^ (h1 ^ h2)) & jnp.int32(0x7FFFFFFF)


def compute_log_double_factorials_2N(N):
    vals = np.zeros(2 * N, dtype=np.float64)
    for i in range(2, 2 * N):
        vals[i] = vals[i - 2] + math.log(i)
    return jnp.asarray(vals, dtype=jnp.float32)


def compute_log_v_minus_K(N, leaf_counts_Kxt):
    nontrivial = jnp.sum((leaf_counts_Kxt > 1).astype(jnp.float32), axis=1)
    return jnp.log(jnp.maximum(nontrivial, 1.0))


def compute_log_likelihood_and_pi_K(branch1_lengths_Vxr, branch2_lengths_Vxr,
                                    leaf_counts_Vxt, tree_ll_Vxt,
                                    prior_dist, prior_branch_len, log_double_factorials_2N):
    """log-likelihood + log prior from the incrementally-maintained per-subtree cache."""
    log_likelihood_V = jnp.sum(tree_ll_Vxt, axis=1)
    # topology prior: uniform over rooted binary topologies -> -log((2c-3)!!) per subtree
    ldf_idx = jnp.clip(2 * leaf_counts_Vxt - 3, 0, log_double_factorials_2N.shape[0] - 1)
    log_topo_V = -jnp.sum(log_double_factorials_2N[ldf_idx], axis=1)
    if prior_dist != 'exp':
        raise NotImplementedError("only 'exp' branch-length prior is implemented")
    lam = prior_branch_len
    all_b = jnp.concatenate([branch1_lengths_Vxr, branch2_lengths_Vxr], axis=1)
    log_branch_V = jnp.sum(-math.log(lam) - all_b / lam, axis=1)
    log_pi_V = log_likelihood_V + log_topo_V + log_branch_V
    return log_likelihood_V, log_pi_V


def build_newick_tree(taxa_N, merge1_r, merge2_r, branch1_r, branch2_r):
    labels = list(taxa_N)
    for i1, i2, b1, b2 in zip(np.asarray(merge1_r).tolist(), np.asarray(merge2_r).tolist(),
                              np.asarray(branch1_r).tolist(), np.asarray(branch2_r).tolist()):
        node = f"({labels[i1]}:{b1:.4f},{labels[i2]}:{b2:.4f})"
        labels[i1] = node
        del labels[i2]
    return labels[0] + ";"


# ============================================================================
# Model components (deterministically initialized in-script)
# ============================================================================

class SeqEncoder:
    def __init__(self, key, S, A, D):
        self.D = D
        self.W = jax.random.normal(key, (S * A, D), jnp.float32) / math.sqrt(S * A)

    def __call__(self, data_NxSxA):
        flat = data_NxSxA.reshape(data_NxSxA.shape[0], -1)
        return jnp.tanh(flat @ self.W)


class Proposal:
    """Uniform-pair merge proposal (J=1) with deterministic embedding-derived branches."""
    max_sub_particles = 1

    def __init__(self, key, S, A, D, prior_branch_len):
        k1, k2, k3, k4 = jax.random.split(key, 4)
        self.seq_encoder = SeqEncoder(k1, S, A, D)
        self.W_merge = jax.random.normal(k2, (D, D), jnp.float32) * 0.1
        self.w_b1 = jax.random.normal(k3, (D,), jnp.float32) * 0.1
        self.w_b2 = jax.random.normal(k4, (D,), jnp.float32) * 0.1
        self.prior_branch_len = prior_branch_len

    def uses_deterministic_branches(self):
        return True

    def __call__(self, N, embeddings_KxtxD, hashes_Kxt, key):
        K, t, D = embeddings_KxtxD.shape
        k1, k2 = jax.random.split(key)
        i = jax.random.randint(k1, (K,), 0, t)
        j = jax.random.randint(k2, (K,), 0, t - 1)
        j = j + (j >= i).astype(j.dtype)
        idx1 = jnp.minimum(i, j).astype(jnp.int32)
        idx2 = jnp.maximum(i, j).astype(jnp.int32)
        emb1 = gather_K(embeddings_KxtxD, idx1)
        emb2 = gather_K(embeddings_KxtxD, idx2)
        merged = jnp.tanh(0.5 * (emb1 + emb2) @ self.W_merge)
        b1 = self.prior_branch_len * jax.nn.softplus(emb1 @ self.w_b1 + 1.0)
        b2 = self.prior_branch_len * jax.nn.softplus(emb2 @ self.w_b2 + 1.0)
        log_v_plus = jnp.full((K,), -math.log(t * (t - 1) / 2.0), jnp.float32)
        return (idx1[:, None], idx2[:, None], b1[:, None], b2[:, None],
                merged[:, None, :], log_v_plus[:, None])


class QMatrixDecoder:
    def __init__(self, key, D, A, Sfull, C):
        k1, k2, k3, k4 = jax.random.split(key, 4)
        self.A = A
        self.W_site = jax.random.normal(k1, (Sfull, C), jnp.float32) * 0.3
        self.W_stat_e = jax.random.normal(k2, (D, A), jnp.float32) * 0.3
        self.W_stat_s = jax.random.normal(k3, (C, A), jnp.float32) * 0.3
        self.W_exch = jax.random.normal(k4, (D, A * A), jnp.float32) * 0.3

    def site_positions_encoder(self, site_positions_SxSfull):
        return site_positions_SxSfull @ self.W_site

    def stat_probs_VxSxA(self, embeddings_VxD, site_positions_SxC):
        logits = embeddings_VxD @ self.W_stat_e
        logits = logits[:, None, :] + (site_positions_SxC @ self.W_stat_s)[None, :, :]
        return jax.nn.softmax(logits, axis=-1)           # (V, S, A)

    def _exchange_VxAxA(self, embeddings_VxD):
        A = self.A
        ex = jax.nn.softplus(embeddings_VxD @ self.W_exch).reshape(-1, A, A)
        return 0.5 * (ex + jnp.swapaxes(ex, -1, -2))     # symmetric

    def Q_matrix_VxSxAxA(self, embeddings_VxD, site_positions_SxC):
        A = self.A
        pi = self.stat_probs_VxSxA(embeddings_VxD, site_positions_SxC)       # (V,S,A)
        ex = self._exchange_VxAxA(embeddings_VxD)                             # (V,A,A)
        eye = jnp.eye(A, dtype=pi.dtype)
        off = ex[:, None, :, :] * pi[:, :, None, :] * (1.0 - eye)             # (V,S,A,A)
        rowsum = jnp.sum(off, axis=-1)                                         # (V,S,A)
        Q = off - eye * rowsum[..., :, None]
        rate = jnp.sum(pi * rowsum, axis=-1)                                   # (V,S)
        return Q / jnp.maximum(rate, 1e-8)[..., None, None]

    def Q_matrix_lanes_AxAxVS(self, embeddings_VxD, site_positions_SxC):
        """Same Q as Q_matrix_VxSxAxA but built directly in the Pallas kernel's lane-major
        (A, A, V*S) layout, so no full-size (V,S,A,A) transpose is needed per merge step."""
        A = self.A
        V = embeddings_VxD.shape[0]
        S = site_positions_SxC.shape[0]
        pi_AxVxS = jnp.transpose(
            self.stat_probs_VxSxA(embeddings_VxD, site_positions_SxC), (2, 0, 1))
        ex_AxAxV = jnp.transpose(self._exchange_VxAxA(embeddings_VxD), (1, 2, 0))
        eye = jnp.eye(A, dtype=pi_AxVxS.dtype)[:, :, None, None]
        off = ex_AxAxV[:, :, :, None] * pi_AxVxS[None, :, :, :] * (1.0 - eye)  # (A,A,V,S)
        rowsum_AxVxS = jnp.sum(off, axis=1)
        Q = off - eye * rowsum_AxVxS[:, None, :, :]
        rate_VxS = jnp.sum(pi_AxVxS * rowsum_AxVxS, axis=0)
        Q = Q / jnp.maximum(rate_VxS, 1e-8)[None, None, :, :]
        return Q.reshape(A, A, V * S)


# ============================================================================
# VCSMC
# ============================================================================

class VCSMC:
    """JAX/Pallas port of the PyTorch VCSMC module (forward pass)."""

    def __init__(self, q_matrix_decoder, proposal, *, N, K, hash_trick=False,
                 checkpoint_grads=False, prior_dist='exp', prior_branch_len=0.1,
                 rng_key=None):
        # TODO(synk): the hash_trick path (torch.unique_consecutive de-duplication) has
        # no static-shape JAX/Pallas equivalent; only hash_trick=False is implemented.
        assert not hash_trick
        self.q_matrix_decoder = q_matrix_decoder
        self.proposal = proposal
        self.N = N
        self.K = K
        self.hash_trick = hash_trick
        self.checkpoint_grads = checkpoint_grads   # forward-only; ignored
        self.prior_dist = prior_dist
        self.prior_branch_len = prior_branch_len
        self.log_double_factorials_2N = compute_log_double_factorials_2N(N)
        self.rng_key = rng_key if rng_key is not None else jax.random.PRNGKey(1234)
        # jit the merge step; one specialization per tree size t (N-1 traces total).
        self._merge_step_jit = jax.jit(self._merge_step_impl)

    # ---- one merge step (jitted) -------------------------------------------------------
    def _merge_step_impl(self, ms, site_positions_SxC, key):
        N, K = self.N, self.K
        key_resample, key_prop = jax.random.split(key)

        # ---- resample particles ----
        indexes_K = jax.random.categorical(key_resample, ms['log_weight_K'], shape=(K,))
        merge1_indexes_Kxr = ms['merge1_indexes_Kxr'][indexes_K]
        merge2_indexes_Kxr = ms['merge2_indexes_Kxr'][indexes_K]
        branch1_lengths_Kxr = ms['branch1_lengths_Kxr'][indexes_K]
        branch2_lengths_Kxr = ms['branch2_lengths_Kxr'][indexes_K]
        embeddings_KxrxD = ms['embeddings_KxrxD'][indexes_K]
        leaf_counts_Kxt = ms['leaf_counts_Kxt'][indexes_K]
        hashes_Kxt = ms['hashes_Kxt'][indexes_K]
        embeddings_KxtxD = ms['embeddings_KxtxD'][indexes_K]
        log_felsensteins_KxtxSxA = ms['log_felsensteins_KxtxSxA'][indexes_K]
        tree_ll_Kxt = ms['tree_ll_Kxt'][indexes_K]
        log_pi_K = ms['log_pi_K'][indexes_K]

        # ---- proposal (J candidate merges per particle; here J = 1) ----
        (idx1_KxJ, idx2_KxJ, branch1_KxJ, branch2_KxJ,
         embedding_KxJxD, log_v_plus_KxJ) = self.proposal(N, embeddings_KxtxD, hashes_Kxt,
                                                          key_prop)
        J = idx1_KxJ.shape[1]
        Z = K * J   # hash_trick=False: squeeze_Z / unsqueeze_KJ are identities
        D = embedding_KxJxD.shape[-1]

        idx1_Z = idx1_KxJ.reshape(Z)
        idx2_Z = idx2_KxJ.reshape(Z)
        branch1_Z = branch1_KxJ.reshape(Z)
        branch2_Z = branch2_KxJ.reshape(Z)
        embedding_ZxD = embedding_KxJxD.reshape(Z, D)
        log_v_plus_Z = log_v_plus_KxJ.reshape(Z)

        K_to_Z_idx_Z = jnp.repeat(jnp.arange(K), J)

        def K_to_Z(arr_K):
            return arr_K[K_to_Z_idx_Z]

        merge1_indexes_Zxr = K_to_Z(merge1_indexes_Kxr)
        merge2_indexes_Zxr = K_to_Z(merge2_indexes_Kxr)
        branch1_lengths_Zxr = K_to_Z(branch1_lengths_Kxr)
        branch2_lengths_Zxr = K_to_Z(branch2_lengths_Kxr)
        embeddings_ZxrxD = K_to_Z(embeddings_KxrxD)
        leaf_counts_Zxt = K_to_Z(leaf_counts_Kxt)
        hashes_Zxt = K_to_Z(hashes_Kxt)
        embeddings_ZxtxD = K_to_Z(embeddings_KxtxD)
        log_felsensteins_ZxtxSxA = K_to_Z(log_felsensteins_KxtxSxA)
        tree_ll_Zxt = K_to_Z(tree_ll_Kxt)
        log_pi_Z = K_to_Z(log_pi_K)

        def merge_Z(arr_Z, new_val_Z):
            return replace_with_merged_K(arr_Z, idx1_Z, idx2_Z, new_val_Z)

        branch1_lengths_Zxr = concat_K(branch1_lengths_Zxr, branch1_Z)
        branch2_lengths_Zxr = concat_K(branch2_lengths_Zxr, branch2_Z)
        leaf_counts_Zxt = merge_Z(
            leaf_counts_Zxt,
            gather_K(leaf_counts_Zxt, idx1_Z) + gather_K(leaf_counts_Zxt, idx2_Z))
        hashes_Zxt = merge_Z(
            hashes_Zxt,
            hash_tree_K(gather_K(hashes_Zxt, idx1_Z), gather_K(hashes_Zxt, idx2_Z)))
        embeddings_ZxtxD = merge_Z(embeddings_ZxtxD, embedding_ZxD)

        # ---- fused Pallas hot path: lane-major Q + expm + Felsenstein + site log-lik ----
        Q_AxAxL = self.q_matrix_decoder.Q_matrix_lanes_AxAxVS(embedding_ZxD,
                                                              site_positions_SxC)
        stat_ZxSxA = self.q_matrix_decoder.stat_probs_VxSxA(embedding_ZxD, site_positions_SxC)
        log_stat_ZxSxA = jnp.log(jnp.maximum(stat_ZxSxA, LOG_EPS))   # clamp before log
        logf1_ZxSxA = gather_K(log_felsensteins_ZxtxSxA, idx1_Z)
        logf2_ZxSxA = gather_K(log_felsensteins_ZxtxSxA, idx2_Z)
        log_fels_new_ZxSxA, site_ll_ZxS = fused_felsenstein_site_ll(
            Q_AxAxL, logf1_ZxSxA, logf2_ZxSxA, log_stat_ZxSxA, branch1_Z, branch2_Z)

        log_felsensteins_ZxtxSxA = merge_Z(log_felsensteins_ZxtxSxA, log_fels_new_ZxSxA)
        # Incremental per-subtree site log-likelihood cache: only the merged column changes
        # (unchanged subtrees keep their embeddings and Felsenstein tables, so their cached
        # values are exact).
        tree_ll_Zxt = merge_Z(tree_ll_Zxt, jnp.sum(site_ll_ZxS, axis=1))

        prev_log_pi_Z = log_pi_Z
        log_likelihood_Z, log_pi_Z = compute_log_likelihood_and_pi_K(
            branch1_lengths_Zxr, branch2_lengths_Zxr, leaf_counts_Zxt, tree_ll_Zxt,
            self.prior_dist, self.prior_branch_len, self.log_double_factorials_2N)
        log_v_minus_Z = compute_log_v_minus_K(N, leaf_counts_Zxt)
        log_weight_Z = log_pi_Z - prev_log_pi_Z + log_v_minus_Z - log_v_plus_Z

        log_weight_KxJ = log_weight_Z.reshape(K, J)
        log_weight_K = logsumexp(log_weight_KxJ, axis=1) - math.log(J)

        # J == 1 -> chosen sub-particle index is always 0 and Z == K (mirrors the reference's
        # general J > 1 path).
        sub_indexes_K = jnp.zeros((K,), jnp.int32)
        gather_sub_K_idx_K = jnp.arange(K) * J + sub_indexes_K

        def gather_sub_K(arr_Z):
            return arr_Z[gather_sub_K_idx_K]

        def concat_sub_K(arr_Zxr, val_K):
            return concat_K(gather_sub_K(arr_Zxr), val_K)

        idx1_K = gather_sub_K(idx1_Z)
        idx2_K = gather_sub_K(idx2_Z)
        embedding_KxD = gather_sub_K(embedding_ZxD)

        return {
            'merge1_indexes_Kxr': concat_sub_K(merge1_indexes_Zxr, idx1_K),
            'merge2_indexes_Kxr': concat_sub_K(merge2_indexes_Zxr, idx2_K),
            # NOTE: the new branch lengths were already appended above (they are needed by
            # the branch prior); keep a single copy so the r axis stays aligned with the
            # merge indexes (N-1 columns after the full forward pass).
            'branch1_lengths_Kxr': gather_sub_K(branch1_lengths_Zxr),
            'branch2_lengths_Kxr': gather_sub_K(branch2_lengths_Zxr),
            'embeddings_KxrxD': concat_sub_K(embeddings_ZxrxD, embedding_KxD),
            'leaf_counts_Kxt': gather_sub_K(leaf_counts_Zxt),
            'hashes_Kxt': gather_sub_K(hashes_Zxt),
            'embeddings_KxtxD': gather_sub_K(embeddings_ZxtxD),
            'log_felsensteins_KxtxSxA': gather_sub_K(log_felsensteins_ZxtxSxA),
            'tree_ll_Kxt': gather_sub_K(tree_ll_Zxt),
            'log_pi_K': gather_sub_K(log_pi_Z),
            'log_weight_K': log_weight_K,
            'log_likelihood_K': gather_sub_K(log_likelihood_Z),
        }

    # ---- full forward pass --------------------------------------------------------------
    def forward(self, taxa_N, data_NxSxA, data_batched_NxSxA, site_positions_batched_SxSfull):
        N = data_batched_NxSxA.shape[0]
        K = self.K
        site_positions_SxC = self.q_matrix_decoder.site_positions_encoder(
            site_positions_batched_SxSfull)

        embeddings_NxD = self.proposal.seq_encoder(data_NxSxA)
        log_fels_leaves_NxSxA = jnp.log(data_batched_NxSxA)
        # one-time leaf-column site log-likelihoods for the incremental cache (tiny, O(N*S*A))
        stat_leaves_NxSxA = self.q_matrix_decoder.stat_probs_VxSxA(embeddings_NxD,
                                                                   site_positions_SxC)
        log_stat_leaves = jnp.log(jnp.maximum(stat_leaves_NxSxA, LOG_EPS))
        tree_ll_N = jnp.sum(logsumexp(log_fels_leaves_NxSxA + log_stat_leaves, axis=-1),
                            axis=-1)

        D = self.proposal.seq_encoder.D
        ms = {
            'merge1_indexes_Kxr': jnp.zeros((K, 0), jnp.int32),
            'merge2_indexes_Kxr': jnp.zeros((K, 0), jnp.int32),
            'branch1_lengths_Kxr': jnp.zeros((K, 0), jnp.float32),
            'branch2_lengths_Kxr': jnp.zeros((K, 0), jnp.float32),
            'embeddings_KxrxD': jnp.zeros((K, 0, D), jnp.float32),
            'leaf_counts_Kxt': jnp.ones((K, N), jnp.int32),
            'hashes_Kxt': jnp.tile(hash_K(jnp.arange(N))[None, :], (K, 1)),
            'embeddings_KxtxD': jnp.tile(embeddings_NxD[None, :, :], (K, 1, 1)),
            'log_felsensteins_KxtxSxA': jnp.tile(log_fels_leaves_NxSxA[None], (K, 1, 1, 1)),
            'tree_ll_Kxt': jnp.tile(tree_ll_N[None, :], (K, 1)),
            'log_pi_K': jnp.zeros((K,), jnp.float32),
            'log_weight_K': jnp.zeros((K,), jnp.float32),
            'log_likelihood_K': jnp.zeros((K,), jnp.float32),
        }

        log_weights_list = []
        key = self.rng_key
        for _ in range(N - 1):
            key, subkey = jax.random.split(key)
            ms = self._merge_step_jit(ms, site_positions_SxC, subkey)
            log_weights_list.append(ms['log_weight_K'])

        log_weights_rxK = jnp.stack(log_weights_list)
        log_scaled_weights_rxK = log_weights_rxK - math.log(K)
        log_sum_weights_r = logsumexp(log_scaled_weights_rxK, axis=1)
        log_ZCSMC = jnp.sum(log_sum_weights_r)
        log_ESS_numer = 2 * logsumexp(ms['log_weight_K'], axis=0)
        log_ESS_denom = logsumexp(2 * ms['log_weight_K'], axis=0)
        ESS = jnp.exp(log_ESS_numer - log_ESS_denom)
        best_tree_idx = int(jnp.argmax(ms['log_likelihood_K']))
        best_newick_tree = build_newick_tree(
            taxa_N,
            ms['merge1_indexes_Kxr'][best_tree_idx],
            ms['merge2_indexes_Kxr'][best_tree_idx],
            ms['branch1_lengths_Kxr'][best_tree_idx],
            ms['branch2_lengths_Kxr'][best_tree_idx])
        merge_indexes_KxN1x2 = jnp.stack(
            [ms['merge1_indexes_Kxr'], ms['merge2_indexes_Kxr']], 2)
        branch_lengths_KxN1x2 = jnp.stack(
            [ms['branch1_lengths_Kxr'], ms['branch2_lengths_Kxr']], 2)
        return {
            'log_ZCSMC': log_ZCSMC,
            'log_likelihood_K': ms['log_likelihood_K'],
            'merge_indexes_KxN1x2': merge_indexes_KxN1x2,
            'branch_lengths_KxN1x2': branch_lengths_KxN1x2,
            'best_newick_tree': best_newick_tree,
            'best_merge_indexes_N1x2': merge_indexes_KxN1x2[best_tree_idx],
            'best_embeddings_N1xD': ms['embeddings_KxrxD'][best_tree_idx],
            'ESS': float(ESS),
        }

    __call__ = forward


# ============================================================================
# main
# ============================================================================

if __name__ == "__main__":
    N, S, A, K, D, C = 6, 8, 4, 8, 16, 4
    root = jax.random.PRNGKey(0)
    k_data, k_prop, k_q, k_model, k_chk = jax.random.split(root, 5)

    # smoothed one-hot sequence data (rows sum to 1 along A)
    states_NxS = jax.random.randint(k_data, (N, S), 0, A)
    onehot = jax.nn.one_hot(states_NxS, A, dtype=jnp.float32)
    data_NxSxA = onehot * 0.97 + (1.0 - onehot) * 0.01
    data_batched_NxSxA = data_NxSxA
    site_positions_batched_SxSfull = jnp.eye(S, dtype=jnp.float32)
    taxa_N = [f"taxon{i}" for i in range(N)]

    # ---- correctness check: fused Pallas kernel vs pure-JAX reference --------------------
    # Use proper rate matrices (positive off-diagonal rates bounded away from 0) so the
    # expm+log comparison is numerically well-conditioned.
    Vc, Sc = 16, 16                               # L = 256 lanes -> multi-block grid
    kc = jax.random.split(k_chk, 6)
    eyeA = jnp.eye(A, dtype=jnp.float32)
    base = jax.random.uniform(kc[0], (Vc, Sc, A, A), jnp.float32, minval=0.2, maxval=1.0)
    off_rates = base * (1.0 - eyeA)
    Qc = off_rates - eyeA * jnp.sum(off_rates, axis=-1, keepdims=True)
    b1c = 0.05 + 0.3 * jax.random.uniform(kc[1], (Vc,), jnp.float32)
    b2c = 0.05 + 0.3 * jax.random.uniform(kc[2], (Vc,), jnp.float32)
    lf1c = jax.random.normal(kc[3], (Vc, Sc, A), jnp.float32)
    lf2c = jax.random.normal(kc[4], (Vc, Sc, A), jnp.float32)
    lstatc = jax.nn.log_softmax(jax.random.normal(kc[5], (Vc, Sc, A), jnp.float32), axis=-1)
    Qc_lanes = jnp.transpose(Qc, (2, 3, 0, 1)).reshape(A, A, Vc * Sc)
    got_fels, got_sll = fused_felsenstein_site_ll(Qc_lanes, lf1c, lf2c, lstatc, b1c, b2c)
    want_fels, want_sll = _fused_ref(Qc, lf1c, lf2c, lstatc, b1c, b2c)
    assert np.allclose(np.asarray(got_fels), np.asarray(want_fels), rtol=2e-3, atol=2e-3)
    assert np.allclose(np.asarray(got_sll), np.asarray(want_sll), rtol=2e-3, atol=2e-3)

    proposal = Proposal(k_prop, S, A, D, prior_branch_len=0.1)
    q_decoder = QMatrixDecoder(k_q, D=D, A=A, Sfull=S, C=C)

    # lane-major Q construction must match the (V,S,A,A) reference construction
    spc = q_decoder.site_positions_encoder(site_positions_batched_SxSfull)
    emb_c = jax.random.normal(kc[0], (Vc, D), jnp.float32)
    q_ref_layout = jnp.transpose(q_decoder.Q_matrix_VxSxAxA(emb_c, spc),
                                 (2, 3, 0, 1)).reshape(A, A, -1)
    q_lane_layout = q_decoder.Q_matrix_lanes_AxAxVS(emb_c, spc)
    assert np.allclose(np.asarray(q_lane_layout), np.asarray(q_ref_layout),
                       rtol=1e-5, atol=1e-5)

    model = VCSMC(q_decoder, proposal, N=N, K=K, prior_branch_len=0.1, rng_key=k_model)
    result = model.forward(taxa_N, data_NxSxA, data_batched_NxSxA,
                           site_positions_batched_SxSfull)
    jax.block_until_ready(result['log_ZCSMC'])
    jax.block_until_ready(result['log_likelihood_K'])

    # r-axis alignment sanity (see NOTE in _merge_step_impl)
    assert result['merge_indexes_KxN1x2'].shape == (K, N - 1, 2)
    assert result['branch_lengths_KxN1x2'].shape == (K, N - 1, 2)
    assert np.isfinite(float(result['log_ZCSMC']))
    print("KERNEL_OK")
</pallas_src>

<mosaic_0001>
module attributes {stable_mosaic.version = 11 : i64} {
  func.func @_fused_felsenstein_kernel(%arg0: i32, %arg1: memref<4x4x1xf32, #tpu.memory_space<vmem>>, %arg2: memref<4x4x128xf32, #tpu.memory_space<vmem>>, %arg3: memref<1x128xf32, #tpu.memory_space<vmem>>, %arg4: memref<1x128xf32, #tpu.memory_space<vmem>>, %arg5: memref<4x128xf32, #tpu.memory_space<vmem>>, %arg6: memref<4x128xf32, #tpu.memory_space<vmem>>, %arg7: memref<4x128xf32, #tpu.memory_space<vmem>>, %arg8: memref<4x128xf32, #tpu.memory_space<vmem>>, %arg9: memref<1x128xf32, #tpu.memory_space<vmem>>) attributes {dimension_semantics = [#tpu.dimension_semantics<parallel>], iteration_bounds = array<i64: 2>, scalar_prefetch = 0 : i64, scratch_operands = 0 : i64, tpu.core_type = #tpu.core_type<tc>, window_params = [{pipeline_mode = #tpu.pipeline_mode<synchronous>, transform_indices = @transform_0, window_bounds = array<i64: 4, 4, 1>}, {transform_indices = @transform_1, window_bounds = array<i64: 4, 4, 128>}, {transform_indices = @transform_2, window_bounds = array<i64: 1, 128>}, {transform_indices = @transform_3, window_bounds = array<i64: 1, 128>}, {transform_indices = @transform_4, window_bounds = array<i64: 4, 128>}, {transform_indices = @transform_5, window_bounds = array<i64: 4, 128>}, {transform_indices = @transform_6, window_bounds = array<i64: 4, 128>}, {transform_indices = @transform_7, window_bounds = array<i64: 4, 128>}, {transform_indices = @transform_8, window_bounds = array<i64: 1, 128>}]} {
    %c0 = arith.constant 0 : index
    %c0_0 = arith.constant 0 : index
    %c0_1 = arith.constant 0 : index
    %0 = vector.load %arg1[%c0, %c0_0, %c0_1] : memref<4x4x1xf32, #tpu.memory_space<vmem>>, vector<4x4x1xf32>
    %c0_2 = arith.constant 0 : index
    %c0_3 = arith.constant 0 : index
    %c0_4 = arith.constant 0 : index
    %1 = vector.load %arg2[%c0_2, %c0_3, %c0_4] : memref<4x4x128xf32, #tpu.memory_space<vmem>>, vector<4x4x128xf32>
    %c0_5 = arith.constant 0 : index
    %c0_6 = arith.constant 0 : index
    %2 = vector.load %arg3[%c0_5, %c0_6] : memref<1x128xf32, #tpu.memory_space<vmem>>, vector<1x128xf32>
    %c0_7 = arith.constant 0 : index
    %c0_8 = arith.constant 0 : index
    %3 = vector.load %arg5[%c0_7, %c0_8] : memref<4x128xf32, #tpu.memory_space<vmem>>, vector<4x128xf32>
    %4 = vector.shape_cast %2 : vector<1x128xf32> to vector<1x1x128xf32>
    %cst = arith.constant 3.906250e-03 : f32
    %5 = vector.broadcast %cst : f32 to vector<1x1x128xf32>
    %6 = arith.mulf %4, %5 : vector<1x1x128xf32>
    %7 = vector.broadcast %6 : vector<1x1x128xf32> to vector<4x4x128xf32>
    %8 = arith.mulf %1, %7 : vector<4x4x128xf32>
    %9 = vector.broadcast %0 : vector<4x4x1xf32> to vector<4x4x128xf32>
    %10 = arith.addf %9, %8 : vector<4x4x128xf32>
    %11 = vector.extract_strided_slice %8 {offsets = [0, 0, 0], sizes = [4, 1, 128], strides = [1, 1, 1]} : vector<4x4x128xf32> to vector<4x1x128xf32>
    %12 = vector.extract_strided_slice %8 {offsets = [0, 0, 0], sizes = [1, 4, 128], strides = [1, 1, 1]} : vector<4x4x128xf32> to vector<1x4x128xf32>
    %13 = vector.broadcast %11 : vector<4x1x128xf32> to vector<4x4x128xf32>
    %14 = vector.broadcast %12 : vector<1x4x128xf32> to vector<4x4x128xf32>
    %15 = arith.mulf %13, %14 : vector<4x4x128xf32>
    %16 = vector.extract_strided_slice %8 {offsets = [0, 1, 0], sizes = [4, 1, 128], strides = [1, 1, 1]} : vector<4x4x128xf32> to vector<4x1x128xf32>
    %17 = vector.extract_strided_slice %8 {offsets = [1, 0, 0], sizes = [1, 4, 128], strides = [1, 1, 1]} : vector<4x4x128xf32> to vector<1x4x128xf32>
    %18 = vector.broadcast %16 : vector<4x1x128xf32> to vector<4x4x128xf32>
    %19 = vector.broadcast %17 : vector<1x4x128xf32> to vector<4x4x128xf32>
    %20 = arith.mulf %18, %19 : vector<4x4x128xf32>
    %21 = arith.addf %15, %20 : vector<4x4x128xf32>
    %22 = vector.extract_strided_slice %8 {offsets = [0, 2, 0], sizes = [4, 1, 128], strides = [1, 1, 1]} : vector<4x4x128xf32> to vector<4x1x128xf32>
    %23 = vector.extract_strided_slice %8 {offsets = [2, 0, 0], sizes = [1, 4, 128], strides = [1, 1, 1]} : vector<4x4x128xf32> to vector<1x4x128xf32>
    %24 = vector.broadcast %22 : vector<4x1x128xf32> to vector<4x4x128xf32>
    %25 = vector.broadcast %23 : vector<1x4x128xf32> to vector<4x4x128xf32>
    %26 = arith.mulf %24, %25 : vector<4x4x128xf32>
    %27 = arith.addf %21, %26 : vector<4x4x128xf32>
    %28 = vector.extract_strided_slice %8 {offsets = [0, 3, 0], sizes = [4, 1, 128], strides = [1, 1, 1]} : vector<4x4x128xf32> to vector<4x1x128xf32>
    %29 = vector.extract_strided_slice %8 {offsets = [3, 0, 0], sizes = [1, 4, 128], strides = [1, 1, 1]} : vector<4x4x128xf32> to vector<1x4x128xf32>
    %30 = vector.broadcast %28 : vector<4x1x128xf32> to vector<4x4x128xf32>
    %31 = vector.broadcast %29 : vector<1x4x128xf32> to vector<4x4x128xf32>
    %32 = arith.mulf %30, %31 : vector<4x4x128xf32>
    %33 = arith.addf %27, %32 : vector<4x4x128xf32>
    %cst_9 = arith.constant 5.000000e-01 : f32
    %34 = vector.broadcast %cst_9 : f32 to vector<4x4x128xf32>
    %35 = arith.mulf %33, %34 : vector<4x4x128xf32>
    %36 = arith.addf %10, %35 : vector<4x4x128xf32>
    %37 = vector.extract_strided_slice %35 {offsets = [0, 0, 0], sizes = [4, 1, 128], strides = [1, 1, 1]} : vector<4x4x128xf32> to vector<4x1x128xf32>
    %38 = vector.extract_strided_slice %8 {offsets = [0, 0, 0], sizes = [1, 4, 128], strides = [1, 1, 1]} : vector<4x4x128xf32> to vector<1x4x128xf32>
    %39 = vector.broadcast %37 : vector<4x1x128xf32> to vector<4x4x128xf32>
    %40 = vector.broadcast %38 : vector<1x4x128xf32> to vector<4x4x128xf32>
    %41 = arith.mulf %39, %40 : vector<4x4x128xf32>
    %42 = vector.extract_strided_slice %35 {offsets = [0, 1, 0], sizes = [4, 1, 128], strides = [1, 1, 1]} : vector<4x4x128xf32> to vector<4x1x128xf32>
    %43 = vector.extract_strided_slice %8 {offsets = [1, 0, 0], sizes = [1, 4, 128], strides = [1, 1, 1]} : vector<4x4x128xf32> to vector<1x4x128xf32>
    %44 = vector.broadcast %42 : vector<4x1x128xf32> to vector<4x4x128xf32>
    %45 = vector.broadcast %43 : vector<1x4x128xf32> to vector<4x4x128xf32>
    %46 = arith.mulf %44, %45 : vector<4x4x128xf32>
    %47 = arith.addf %41, %46 : vector<4x4x128xf32>
    %48 = vector.extract_strided_slice %35 {offsets = [0, 2, 0], sizes = [4, 1, 128], strides = [1, 1, 1]} : vector<4x4x128xf32> to vector<4x1x128xf32>
    %49 = vector.extract_strided_slice %8 {offsets = [2, 0, 0], sizes = [1, 4, 128], strides = [1, 1, 1]} : vector<4x4x128xf32> to vector<1x4x128xf32>
    %50 = vector.broadcast %48 : vector<4x1x128xf32> to vector<4x4x128xf32>
    %51 = vector.broadcast %49 : vector<1x4x128xf32> to vector<4x4x128xf32>
    %52 = arith.mulf %50, %51 : vector<4x4x128xf32>
    %53 = arith.addf %47, %52 : vector<4x4x128xf32>
    %54 = vector.extract_strided_slice %35 {offsets = [0, 3, 0], sizes = [4, 1, 128], strides = [1, 1, 1]} : vector<4x4x128xf32> to vector<4x1x128xf32>
    %55 = vector.extract_strided_slice %8 {offsets = [3, 0, 0], sizes = [1, 4, 128], strides = [1, 1, 1]} : vector<4x4x128xf32> to vector<1x4x128xf32>
    %56 = vector.broadcast %54 : vector<4x1x128xf32> to vector<4x4x128xf32>
    %57 = vector.broadcast %55 : vector<1x4x128xf32> to vector<4x4x128xf32>
    %58 = arith.mulf %56, %57 : vector<4x4x128xf32>
    %59 = arith.addf %53, %58 : vector<4x4x128xf32>
    %cst_10 = arith.constant 0.333333343 : f32
    %60 = vector.broadcast %cst_10 : f32 to vector<4x4x128xf32>
    %61 = arith.mulf %59, %60 : vector<4x4x128xf32>
    %62 = arith.addf %36, %61 : vector<4x4x128xf32>
    %63 = vector.extract_strided_slice %61 {offsets = [0, 0, 0], sizes = [4, 1, 128], strides = [1, 1, 1]} : vector<4x4x128xf32> to vector<4x1x128xf32>
    %64 = vector.extract_strided_slice %8 {offsets = [0, 0, 0], sizes = [1, 4, 128], strides = [1, 1, 1]} : vector<4x4x128xf32> to vector<1x4x128xf32>
    %65 = vector.broadcast %63 : vector<4x1x128xf32> to vector<4x4x128xf32>
    %66 = vector.broadcast %64 : vector<1x4x128xf32> to vector<4x4x128xf32>
    %67 = arith.mulf %65, %66 : vector<4x4x128xf32>
    %68 = vector.extract_strided_slice %61 {offsets = [0, 1, 0], sizes = [4, 1, 128], strides = [1, 1, 1]} : vector<4x4x128xf32> to vector<4x1x128xf32>
    %69 = vector.extract_strided_slice %8 {offsets = [1, 0, 0], sizes = [1, 4, 128], strides = [1, 1, 1]} : vector<4x4x128xf32> to vector<1x4x128xf32>
    %70 = vector.broadcast %68 : vector<4x1x128xf32> to vector<4x4x128xf32>
    %71 = vector.broadcast %69 : vector<1x4x128xf32> to vector<4x4x128xf32>
    %72 = arith.mulf %70, %71 : vector<4x4x128xf32>
    %73 = arith.addf %67, %72 : vector<4x4x128xf32>
    %74 = vector.extract_strided_slice %61 {offsets = [0, 2, 0], sizes = [4, 1, 128], strides = [1, 1, 1]} : vector<4x4x128xf32> to vector<4x1x128xf32>
    %75 = vector.extract_strided_slice %8 {offsets = [2, 0, 0], sizes = [1, 4, 128], strides = [1, 1, 1]} : vector<4x4x128xf32> to vector<1x4x128xf32>
    %76 = vector.broadcast %74 : vector<4x1x128xf32> to vector<4x4x128xf32>
    %77 = vector.broadcast %75 : vector<1x4x128xf32> to vector<4x4x128xf32>
    %78 = arith.mulf %76, %77 : vector<4x4x128xf32>
    %79 = arith.addf %73, %78 : vector<4x4x128xf32>
    %80 = vector.extract_strided_slice %61 {offsets = [0, 3, 0], sizes = [4, 1, 128], strides = [1, 1, 1]} : vector<4x4x128xf32> to vector<4x1x128xf32>
    %81 = vector.extract_strided_slice %8 {offsets = [3, 0, 0], sizes = [1, 4, 128], strides = [1, 1, 1]} : vector<4x4x128xf32> to vector<1x4x128xf32>
    %82 = vector.broadcast %80 : vector<4x1x128xf32> to vector<4x4x128xf32>
    %83 = vector.broadcast %81 : vector<1x4x128xf32> to vector<4x4x128xf32>
    %84 = arith.mulf %82, %83 : vector<4x4x128xf32>
    %85 = arith.addf %79, %84 : vector<4x4x128xf32>
    %cst_11 = arith.constant 2.500000e-01 : f32
    %86 = vector.broadcast %cst_11 : f32 to vector<4x4x128xf32>
    %87 = arith.mulf %85, %86 : vector<4x4x128xf32>
    %88 = arith.addf %62, %87 : vector<4x4x128xf32>
    %89 = vector.extract_strided_slice %87 {offsets = [0, 0, 0], sizes = [4, 1, 128], strides = [1, 1, 1]} : vector<4x4x128xf32> to vector<4x1x128xf32>
    %90 = vector.extract_strided_slice %8 {offsets = [0, 0, 0], sizes = [1, 4, 128], strides = [1, 1, 1]} : vector<4x4x128xf32> to vector<1x4x128xf32>
    %91 = vector.broadcast %89 : vector<4x1x128xf32> to vector<4x4x128xf32>
    %92 = vector.broadcast %90 : vector<1x4x128xf32> to vector<4x4x128xf32>
    %93 = arith.mulf %91, %92 : vector<4x4x128xf32>
    %94 = vector.extract_strided_slice %87 {offsets = [0, 1, 0], sizes = [4, 1, 128], strides = [1, 1, 1]} : vector<4x4x128xf32> to vector<4x1x128xf32>
    %95 = vector.extract_strided_slice %8 {offsets = [1, 0, 0], sizes = [1, 4, 128], strides = [1, 1, 1]} : vector<4x4x128xf32> to vector<1x4x128xf32>
    %96 = vector.broadcast %94 : vector<4x1x128xf32> to vector<4x4x128xf32>
    %97 = vector.broadcast %95 : vector<1x4x128xf32> to vector<4x4x128xf32>
    %98 = arith.mulf %96, %97 : vector<4x4x128xf32>
    %99 = arith.addf %93, %98 : vector<4x4x128xf32>
    %100 = vector.extract_strided_slice %87 {offsets = [0, 2, 0], sizes = [4, 1, 128], strides = [1, 1, 1]} : vector<4x4x128xf32> to vector<4x1x128xf32>
    %101 = vector.extract_strided_slice %8 {offsets = [2, 0, 0], sizes = [1, 4, 128], strides = [1, 1, 1]} : vector<4x4x128xf32> to vector<1x4x128xf32>
    %102 = vector.broadcast %100 : vector<4x1x128xf32> to vector<4x4x128xf32>
    %103 = vector.broadcast %101 : vector<1x4x128xf32> to vector<4x4x128xf32>
    %104 = arith.mulf %102, %103 : vector<4x4x128xf32>
    %105 = arith.addf %99, %104 : vector<4x4x128xf32>
    %106 = vector.extract_strided_slice %87 {offsets = [0, 3, 0], sizes = [4, 1, 128], strides = [1, 1, 1]} : vector<4x4x128xf32> to vector<4x1x128xf32>
    %107 = vector.extract_strided_slice %8 {offsets = [3, 0, 0], sizes = [1, 4, 128], strides = [1, 1, 1]} : vector<4x4x128xf32> to vector<1x4x128xf32>
    %108 = vector.broadcast %106 : vector<4x1x128xf32> to vector<4x4x128xf32>
    %109 = vector.broadcast %107 : vector<1x4x128xf32> to vector<4x4x128xf32>
    %110 = arith.mulf %108, %109 : vector<4x4x128xf32>
    %111 = arith.addf %105, %110 : vector<4x4x128xf32>
    %cst_12 = arith.constant 2.000000e-01 : f32
    %112 = vector.broadcast %cst_12 : f32 to vector<4x4x128xf32>
    %113 = arith.mulf %111, %112 : vector<4x4x128xf32>
    %114 = arith.addf %88, %113 : vector<4x4x128xf32>
    %115 = vector.extract_strided_slice %113 {offsets = [0, 0, 0], sizes = [4, 1, 128], strides = [1, 1, 1]} : vector<4x4x128xf32> to vector<4x1x128xf32>
    %116 = vector.extract_strided_slice %8 {offsets = [0, 0, 0], sizes = [1, 4, 128], strides = [1, 1, 1]} : vector<4x4x128xf32> to vector<1x4x128xf32>
    %117 = vector.broadcast %115 : vector<4x1x128xf32> to vector<4x4x128xf32>
    %118 = vector.broadcast %116 : vector<1x4x128xf32> to vector<4x4x128xf32>
    %119 = arith.mulf %117, %118 : vector<4x4x128xf32>
    %120 = vector.extract_strided_slice %113 {offsets = [0, 1, 0], sizes = [4, 1, 128], strides = [1, 1, 1]} : vector<4x4x128xf32> to vector<4x1x128xf32>
    %121 = vector.extract_strided_slice %8 {offsets = [1, 0, 0], sizes = [1, 4, 128], strides = [1, 1, 1]} : vector<4x4x128xf32> to vector<1x4x128xf32>
    %122 = vector.broadcast %120 : vector<4x1x128xf32> to vector<4x4x128xf32>
    %123 = vector.broadcast %121 : vector<1x4x128xf32> to vector<4x4x128xf32>
    %124 = arith.mulf %122, %123 : vector<4x4x128xf32>
    %125 = arith.addf %119, %124 : vector<4x4x128xf32>
    %126 = vector.extract_strided_slice %113 {offsets = [0, 2, 0], sizes = [4, 1, 128], strides = [1, 1, 1]} : vector<4x4x128xf32> to vector<4x1x128xf32>
    %127 = vector.extract_strided_slice %8 {offsets = [2, 0, 0], sizes = [1, 4, 128], strides = [1, 1, 1]} : vector<4x4x128xf32> to vector<1x4x128xf32>
    %128 = vector.broadcast %126 : vector<4x1x128xf32> to vector<4x4x128xf32>
    %129 = vector.broadcast %127 : vector<1x4x128xf32> to vector<4x4x128xf32>
    %130 = arith.mulf %128, %129 : vector<4x4x128xf32>
    %131 = arith.addf %125, %130 : vector<4x4x128xf32>
    %132 = vector.extract_strided_slice %113 {offsets = [0, 3, 0], sizes = [4, 1, 128], strides = [1, 1, 1]} : vector<4x4x128xf32> to vector<4x1x128xf32>
    %133 = vector.extract_strided_slice %8 {offsets = [3, 0, 0], sizes = [1, 4, 128], strides = [1, 1, 1]} : vector<4x4x128xf32> to vector<1x4x128xf32>
    %134 = vector.broadcast %132 : vector<4x1x128xf32> to vector<4x4x128xf32>
    %135 = vector.broadcast %133 : vector<1x4x128xf32> to vector<4x4x128xf32>
    %136 = arith.mulf %134, %135 : vector<4x4x128xf32>
    %137 = arith.addf %131, %136 : vector<4x4x128xf32>
    %cst_13 = arith.constant 0.166666672 : f32
    %138 = vector.broadcast %cst_13 : f32 to vector<4x4x128xf32>
    %139 = arith.mulf %137, %138 : vector<4x4x128xf32>
    %140 = arith.addf %114, %139 : vector<4x4x128xf32>
    %141 = vector.extract_strided_slice %139 {offsets = [0, 0, 0], sizes = [4, 1, 128], strides = [1, 1, 1]} : vector<4x4x128xf32> to vector<4x1x128xf32>
    %142 = vector.extract_strided_slice %8 {offsets = [0, 0, 0], sizes = [1, 4, 128], strides = [1, 1, 1]} : vector<4x4x128xf32> to vector<1x4x128xf32>
    %143 = vector.broadcast %141 : vector<4x1x128xf32> to vector<4x4x128xf32>
    %144 = vector.broadcast %142 : vector<1x4x128xf32> to vector<4x4x128xf32>
    %145 = arith.mulf %143, %144 : vector<4x4x128xf32>
    %146 = vector.extract_strided_slice %139 {offsets = [0, 1, 0], sizes = [4, 1, 128], strides = [1, 1, 1]} : vector<4x4x128xf32> to vector<4x1x128xf32>
    %147 = vector.extract_strided_slice %8 {offsets = [1, 0, 0], sizes = [1, 4, 128], strides = [1, 1, 1]} : vector<4x4x128xf32> to vector<1x4x128xf32>
    %148 = vector.broadcast %146 : vector<4x1x128xf32> to vector<4x4x128xf32>
    %149 = vector.broadcast %147 : vector<1x4x128xf32> to vector<4x4x128xf32>
    %150 = arith.mulf %148, %149 : vector<4x4x128xf32>
    %151 = arith.addf %145, %150 : vector<4x4x128xf32>
    %152 = vector.extract_strided_slice %139 {offsets = [0, 2, 0], sizes = [4, 1, 128], strides = [1, 1, 1]} : vector<4x4x128xf32> to vector<4x1x128xf32>
    %153 = vector.extract_strided_slice %8 {offsets = [2, 0, 0], sizes = [1, 4, 128], strides = [1, 1, 1]} : vector<4x4x128xf32> to vector<1x4x128xf32>
    %154 = vector.broadcast %152 : vector<4x1x128xf32> to vector<4x4x128xf32>
    %155 = vector.broadcast %153 : vector<1x4x128xf32> to vector<4x4x128xf32>
    %156 = arith.mulf %154, %155 : vector<4x4x128xf32>
    %157 = arith.addf %151, %156 : vector<4x4x128xf32>
    %158 = vector.extract_strided_slice %139 {offsets = [0, 3, 0], sizes = [4, 1, 128], strides = [1, 1, 1]} : vector<4x4x128xf32> to vector<4x1x128xf32>
    %159 = vector.extract_strided_slice %8 {offsets = [3, 0, 0], sizes = [1, 4, 128], strides = [1, 1, 1]} : vector<4x4x128xf32> to vector<1x4x128xf32>
    %160 = vector.broadcast %158 : vector<4x1x128xf32> to vector<4x4x128xf32>
    %161 = vector.broadcast %159 : vector<1x4x128xf32> to vector<4x4x128xf32>
    %162 = arith.mulf %160, %161 : vector<4x4x128xf32>
    %163 = arith.addf %157, %162 : vector<4x4x128xf32>
    %cst_14 = arith.constant 0.142857149 : f32
    %164 = vector.broadcast %cst_14 : f32 to vector<4x4x128xf32>
    %165 = arith.mulf %163, %164 : vector<4x4x128xf32>
    %166 = arith.addf %140, %165 : vector<4x4x128xf32>
    %167 = vector.extract_strided_slice %166 {offsets = [0, 0, 0], sizes = [4, 1, 128], strides = [1, 1, 1]} : vector<4x4x128xf32> to vector<4x1x128xf32>
    %168 = vector.extract_strided_slice %166 {offsets = [0, 0, 0], sizes = [1, 4, 128], strides = [1, 1, 1]} : vector<4x4x128xf32> to vector<1x4x128xf32>
    %169 = vector.broadcast %167 : vector<4x1x128xf32> to vector<4x4x128xf32>
    %170 = vector.broadcast %168 : vector<1x4x128xf32> to vector<4x4x128xf32>
    %171 = arith.mulf %169, %170 : vector<4x4x128xf32>
    %172 = vector.extract_strided_slice %166 {offsets = [0, 1, 0], sizes = [4, 1, 128], strides = [1, 1, 1]} : vector<4x4x128xf32> to vector<4x1x128xf32>
    %173 = vector.extract_strided_slice %166 {offsets = [1, 0, 0], sizes = [1, 4, 128], strides = [1, 1, 1]} : vector<4x4x128xf32> to vector<1x4x128xf32>
    %174 = vector.broadcast %172 : vector<4x1x128xf32> to vector<4x4x128xf32>
    %175 = vector.broadcast %173 : vector<1x4x128xf32> to vector<4x4x128xf32>
    %176 = arith.mulf %174, %175 : vector<4x4x128xf32>
    %177 = arith.addf %171, %176 : vector<4x4x128xf32>
    %178 = vector.extract_strided_slice %166 {offsets = [0, 2, 0], sizes = [4, 1, 128], strides = [1, 1, 1]} : vector<4x4x128xf32> to vector<4x1x128xf32>
    %179 = vector.extract_strided_slice %166 {offsets = [2, 0, 0], sizes = [1, 4, 128], strides = [1, 1, 1]} : vector<4x4x128xf32> to vector<1x4x128xf32>
    %180 = vector.broadcast %178 : vector<4x1x128xf32> to vector<4x4x128xf32>
    %181 = vector.broadcast %179 : vector<1x4x128xf32> to vector<4x4x128xf32>
    %182 = arith.mulf %180, %181 : vector<4x4x128xf32>
    %183 = arith.addf %177, %182 : vector<4x4x128xf32>
    %184 = vector.extract_strided_slice %166 {offsets = [0, 3, 0], sizes = [4, 1, 128], strides = [1, 1, 1]} : vector<4x4x128xf32> to vector<4x1x128xf32>
    %185 = vector.extract_strided_slice %166 {offsets = [3, 0, 0], sizes = [1, 4, 128], strides = [1, 1, 1]} : vector<4x4x128xf32> to vector<1x4x128xf32>
    %186 = vector.broadcast %184 : vector<4x1x128xf32> to vector<4x4x128xf32>
    %187 = vector.broadcast %185 : vector<1x4x128xf32> to vector<4x4x128xf32>
    %188 = arith.mulf %186, %187 : vector<4x4x128xf32>
    %189 = arith.addf %183, %188 : vector<4x4x128xf32>
    %190 = vector.extract_strided_slice %189 {offsets = [0, 0, 0], sizes = [4, 1, 128], strides = [1, 1, 1]} : vector<4x4x128xf32> to vector<4x1x128xf32>
    %191 = vector.extract_strided_slice %189 {offsets = [0, 0, 0], sizes = [1, 4, 128], strides = [1, 1, 1]} : vector<4x4x128xf32> to vector<1x4x128xf32>
    %192 = vector.broadcast %190 : vector<4x1x128xf32> to vector<4x4x128xf32>
    %193 = vector.broadcast %191 : vector<1x4x128xf32> to vector<4x4x128xf32>
    %194 = arith.mulf %192, %193 : vector<4x4x128xf32>
    %195 = vector.extract_strided_slice %189 {offsets = [0, 1, 0], sizes = [4, 1, 128], strides = [1, 1, 1]} : vector<4x4x128xf32> to vector<4x1x128xf32>
    %196 = vector.extract_strided_slice %189 {offsets = [1, 0, 0], sizes = [1, 4, 128], strides = [1, 1, 1]} : vector<4x4x128xf32> to vector<1x4x128xf32>
    %197 = vector.broadcast %195 : vector<4x1x128xf32> to vector<4x4x128xf32>
    %198 = vector.broadcast %196 : vector<1x4x128xf32> to vector<4x4x128xf32>
    %199 = arith.mulf %197, %198 : vector<4x4x128xf32>
    %200 = arith.addf %194, %199 : vector<4x4x128xf32>
    %201 = vector.extract_strided_slice %189 {offsets = [0, 2, 0], sizes = [4, 1, 128], strides = [1, 1, 1]} : vector<4x4x128xf32> to vector<4x1x128xf32>
    %202 = vector.extract_strided_slice %189 {offsets = [2, 0, 0], sizes = [1, 4, 128], strides = [1, 1, 1]} : vector<4x4x128xf32> to vector<1x4x128xf32>
    %203 = vector.broadcast %201 : vector<4x1x128xf32> to vector<4x4x128xf32>
    %204 = vector.broadcast %202 : vector<1x4x128xf32> to vector<4x4x128xf32>
    %205 = arith.mulf %203, %204 : vector<4x4x128xf32>
    %206 = arith.addf %200, %205 : vector<4x4x128xf32>
    %207 = vector.extract_strided_slice %189 {offsets = [0, 3, 0], sizes = [4, 1, 128], strides = [1, 1, 1]} : vector<4x4x128xf32> to vector<4x1x128xf32>
    %208 = vector.extract_strided_slice %189 {offsets = [3, 0, 0], sizes = [1, 4, 128], strides = [1, 1, 1]} : vector<4x4x128xf32> to vector<1x4x128xf32>
    %209 = vector.broadcast %207 : vector<4x1x128xf32> to vector<4x4x128xf32>
    %210 = vector.broadcast %208 : vector<1x4x128xf32> to vector<4x4x128xf32>
    %211 = arith.mulf %209, %210 : vector<4x4x128xf32>
    %212 = arith.addf %206, %211 : vector<4x4x128xf32>
    %213 = vector.extract_strided_slice %212 {offsets = [0, 0, 0], sizes = [4, 1, 128], strides = [1, 1, 1]} : vector<4x4x128xf32> to vector<4x1x128xf32>
    %214 = vector.extract_strided_slice %212 {offsets = [0, 0, 0], sizes = [1, 4, 128], strides = [1, 1, 1]} : vector<4x4x128xf32> to vector<1x4x128xf32>
    %215 = vector.broadcast %213 : vector<4x1x128xf32> to vector<4x4x128xf32>
    %216 = vector.broadcast %214 : vector<1x4x128xf32> to vector<4x4x128xf32>
    %217 = arith.mulf %215, %216 : vector<4x4x128xf32>
    %218 = vector.extract_strided_slice %212 {offsets = [0, 1, 0], sizes = [4, 1, 128], strides = [1, 1, 1]} : vector<4x4x128xf32> to vector<4x1x128xf32>
    %219 = vector.extract_strided_slice %212 {offsets = [1, 0, 0], sizes = [1, 4, 128], strides = [1, 1, 1]} : vector<4x4x128xf32> to vector<1x4x128xf32>
    %220 = vector.broadcast %218 : vector<4x1x128xf32> to vector<4x4x128xf32>
    %221 = vector.broadcast %219 : vector<1x4x128xf32> to vector<4x4x128xf32>
    %222 = arith.mulf %220, %221 : vector<4x4x128xf32>
    %223 = arith.addf %217, %222 : vector<4x4x128xf32>
    %224 = vector.extract_strided_slice %212 {offsets = [0, 2, 0], sizes = [4, 1, 128], strides = [1, 1, 1]} : vector<4x4x128xf32> to vector<4x1x128xf32>
    %225 = vector.extract_strided_slice %212 {offsets = [2, 0, 0], sizes = [1, 4, 128], strides = [1, 1, 1]} : vector<4x4x128xf32> to vector<1x4x128xf32>
    %226 = vector.broadcast %224 : vector<4x1x128xf32> to vector<4x4x128xf32>
    %227 = vector.broadcast %225 : vector<1x4x128xf32> to vector<4x4x128xf32>
    %228 = arith.mulf %226, %227 : vector<4x4x128xf32>
    %229 = arith.addf %223, %228 : vector<4x4x128xf32>
    %230 = vector.extract_strided_slice %212 {offsets = [0, 3, 0], sizes = [4, 1, 128], strides = [1, 1, 1]} : vector<4x4x128xf32> to vector<4x1x128xf32>
    %231 = vector.extract_strided_slice %212 {offsets = [3, 0, 0], sizes = [1, 4, 128], strides = [1, 1, 1]} : vector<4x4x128xf32> to vector<1x4x128xf32>
    %232 = vector.broadcast %230 : vector<4x1x128xf32> to vector<4x4x128xf32>
    %233 = vector.broadcast %231 : vector<1x4x128xf32> to vector<4x4x128xf32>
    %234 = arith.mulf %232, %233 : vector<4x4x128xf32>
    %235 = arith.addf %229, %234 : vector<4x4x128xf32>
    %236 = vector.extract_strided_slice %235 {offsets = [0, 0, 0], sizes = [4, 1, 128], strides = [1, 1, 1]} : vector<4x4x128xf32> to vector<4x1x128xf32>
    %237 = vector.extract_strided_slice %235 {offsets = [0, 0, 0], sizes = [1, 4, 128], strides = [1, 1, 1]} : vector<4x4x128xf32> to vector<1x4x128xf32>
    %238 = vector.broadcast %236 : vector<4x1x128xf32> to vector<4x4x128xf32>
    %239 = vector.broadcast %237 : vector<1x4x128xf32> to vector<4x4x128xf32>
    %240 = arith.mulf %238, %239 : vector<4x4x128xf32>
    %241 = vector.extract_strided_slice %235 {offsets = [0, 1, 0], sizes = [4, 1, 128], strides = [1, 1, 1]} : vector<4x4x128xf32> to vector<4x1x128xf32>
    %242 = vector.extract_strided_slice %235 {offsets = [1, 0, 0], sizes = [1, 4, 128], strides = [1, 1, 1]} : vector<4x4x128xf32> to vector<1x4x128xf32>
    %243 = vector.broadcast %241 : vector<4x1x128xf32> to vector<4x4x128xf32>
    %244 = vector.broadcast %242 : vector<1x4x128xf32> to vector<4x4x128xf32>
    %245 = arith.mulf %243, %244 : vector<4x4x128xf32>
    %246 = arith.addf %240, %245 : vector<4x4x128xf32>
    %247 = vector.extract_strided_slice %235 {offsets = [0, 2, 0], sizes = [4, 1, 128], strides = [1, 1, 1]} : vector<4x4x128xf32> to vector<4x1x128xf32>
    %248 = vector.extract_strided_slice %235 {offsets = [2, 0, 0], sizes = [1, 4, 128], strides = [1, 1, 1]} : vector<4x4x128xf32> to vector<1x4x128xf32>
    %249 = vector.broadcast %247 : vector<4x1x128xf32> to vector<4x4x128xf32>
    %250 = vector.broadcast %248 : vector<1x4x128xf32> to vector<4x4x128xf32>
    %251 = arith.mulf %249, %250 : vector<4x4x128xf32>
    %252 = arith.addf %246, %251 : vector<4x4x128xf32>
    %253 = vector.extract_strided_slice %235 {offsets = [0, 3, 0], sizes = [4, 1, 128], strides = [1, 1, 1]} : vector<4x4x128xf32> to vector<4x1x128xf32>
    %254 = vector.extract_strided_slice %235 {offsets = [3, 0, 0], sizes = [1, 4, 128], strides = [1, 1, 1]} : vector<4x4x128xf32> to vector<1x4x128xf32>
    %255 = vector.broadcast %253 : vector<4x1x128xf32> to vector<4x4x128xf32>
    %256 = vector.broadcast %254 : vector<1x4x128xf32> to vector<4x4x128xf32>
    %257 = arith.mulf %255, %256 : vector<4x4x128xf32>
    %258 = arith.addf %252, %257 : vector<4x4x128xf32>
    %259 = vector.extract_strided_slice %258 {offsets = [0, 0, 0], sizes = [4, 1, 128], strides = [1, 1, 1]} : vector<4x4x128xf32> to vector<4x1x128xf32>
    %260 = vector.extract_strided_slice %258 {offsets = [0, 0, 0], sizes = [1, 4, 128], strides = [1, 1, 1]} : vector<4x4x128xf32> to vector<1x4x128xf32>
    %261 = vector.broadcast %259 : vector<4x1x128xf32> to vector<4x4x128xf32>
    %262 = vector.broadcast %260 : vector<1x4x128xf32> to vector<4x4x128xf32>
    %263 = arith.mulf %261, %262 : vector<4x4x128xf32>
    %264 = vector.extract_strided_slice %258 {offsets = [0, 1, 0], sizes = [4, 1, 128], strides = [1, 1, 1]} : vector<4x4x128xf32> to vector<4x1x128xf32>
    %265 = vector.extract_strided_slice %258 {offsets = [1, 0, 0], sizes = [1, 4, 128], strides = [1, 1, 1]} : vector<4x4x128xf32> to vector<1x4x128xf32>
    %266 = vector.broadcast %264 : vector<4x1x128xf32> to vector<4x4x128xf32>
    %267 = vector.broadcast %265 : vector<1x4x128xf32> to vector<4x4x128xf32>
    %268 = arith.mulf %266, %267 : vector<4x4x128xf32>
    %269 = arith.addf %263, %268 : vector<4x4x128xf32>
    %270 = vector.extract_strided_slice %258 {offsets = [0, 2, 0], sizes = [4, 1, 128], strides = [1, 1, 1]} : vector<4x4x128xf32> to vector<4x1x128xf32>
    %271 = vector.extract_strided_slice %258 {offsets = [2, 0, 0], sizes = [1, 4, 128], strides = [1, 1, 1]} : vector<4x4x128xf32> to vector<1x4x128xf32>
    %272 = vector.broadcast %270 : vector<4x1x128xf32> to vector<4x4x128xf32>
    %273 = vector.broadcast %271 : vector<1x4x128xf32> to vector<4x4x128xf32>
    %274 = arith.mulf %272, %273 : vector<4x4x128xf32>
    %275 = arith.addf %269, %274 : vector<4x4x128xf32>
    %276 = vector.extract_strided_slice %258 {offsets = [0, 3, 0], sizes = [4, 1, 128], strides = [1, 1, 1]} : vector<4x4x128xf32> to vector<4x1x128xf32>
    %277 = vector.extract_strided_slice %258 {offsets = [3, 0, 0], sizes = [1, 4, 128], strides = [1, 1, 1]} : vector<4x4x128xf32> to vector<1x4x128xf32>
    %278 = vector.broadcast %276 : vector<4x1x128xf32> to vector<4x4x128xf32>
    %279 = vector.broadcast %277 : vector<1x4x128xf32> to vector<4x4x128xf32>
    %280 = arith.mulf %278, %279 : vector<4x4x128xf32>
    %281 = arith.addf %275, %280 : vector<4x4x128xf32>
    %282 = vector.extract_strided_slice %281 {offsets = [0, 0, 0], sizes = [4, 1, 128], strides = [1, 1, 1]} : vector<4x4x128xf32> to vector<4x1x128xf32>
    %283 = vector.extract_strided_slice %281 {offsets = [0, 0, 0], sizes = [1, 4, 128], strides = [1, 1, 1]} : vector<4x4x128xf32> to vector<1x4x128xf32>
    %284 = vector.broadcast %282 : vector<4x1x128xf32> to vector<4x4x128xf32>
    %285 = vector.broadcast %283 : vector<1x4x128xf32> to vector<4x4x128xf32>
    %286 = arith.mulf %284, %285 : vector<4x4x128xf32>
    %287 = vector.extract_strided_slice %281 {offsets = [0, 1, 0], sizes = [4, 1, 128], strides = [1, 1, 1]} : vector<4x4x128xf32> to vector<4x1x128xf32>
    %288 = vector.extract_strided_slice %281 {offsets = [1, 0, 0], sizes = [1, 4, 128], strides = [1, 1, 1]} : vector<4x4x128xf32> to vector<1x4x128xf32>
    %289 = vector.broadcast %287 : vector<4x1x128xf32> to vector<4x4x128xf32>
    %290 = vector.broadcast %288 : vector<1x4x128xf32> to vector<4x4x128xf32>
    %291 = arith.mulf %289, %290 : vector<4x4x128xf32>
    %292 = arith.addf %286, %291 : vector<4x4x128xf32>
    %293 = vector.extract_strided_slice %281 {offsets = [0, 2, 0], sizes = [4, 1, 128], strides = [1, 1, 1]} : vector<4x4x128xf32> to vector<4x1x128xf32>
    %294 = vector.extract_strided_slice %281 {offsets = [2, 0, 0], sizes = [1, 4, 128], strides = [1, 1, 1]} : vector<4x4x128xf32> to vector<1x4x128xf32>
    %295 = vector.broadcast %293 : vector<4x1x128xf32> to vector<4x4x128xf32>
    %296 = vector.broadcast %294 : vector<1x4x128xf32> to vector<4x4x128xf32>
    %297 = arith.mulf %295, %296 : vector<4x4x128xf32>
    %298 = arith.addf %292, %297 : vector<4x4x128xf32>
    %299 = vector.extract_strided_slice %281 {offsets = [0, 3, 0], sizes = [4, 1, 128], strides = [1, 1, 1]} : vector<4x4x128xf32> to vector<4x1x128xf32>
    %300 = vector.extract_strided_slice %281 {offsets = [3, 0, 0], sizes = [1, 4, 128], strides = [1, 1, 1]} : vector<4x4x128xf32> to vector<1x4x128xf32>
    %301 = vector.broadcast %299 : vector<4x1x128xf32> to vector<4x4x128xf32>
    %302 = vector.broadcast %300 : vector<1x4x128xf32> to vector<4x4x128xf32>
    %303 = arith.mulf %301, %302 : vector<4x4x128xf32>
    %304 = arith.addf %298, %303 : vector<4x4x128xf32>
    %305 = vector.extract_strided_slice %304 {offsets = [0, 0, 0], sizes = [4, 1, 128], strides = [1, 1, 1]} : vector<4x4x128xf32> to vector<4x1x128xf32>
    %306 = vector.extract_strided_slice %304 {offsets = [0, 0, 0], sizes = [1, 4, 128], strides = [1, 1, 1]} : vector<4x4x128xf32> to vector<1x4x128xf32>
    %307 = vector.broadcast %305 : vector<4x1x128xf32> to vector<4x4x128xf32>
    %308 = vector.broadcast %306 : vector<1x4x128xf32> to vector<4x4x128xf32>
    %309 = arith.mulf %307, %308 : vector<4x4x128xf32>
    %310 = vector.extract_strided_slice %304 {offsets = [0, 1, 0], sizes = [4, 1, 128], strides = [1, 1, 1]} : vector<4x4x128xf32> to vector<4x1x128xf32>
    %311 = vector.extract_strided_slice %304 {offsets = [1, 0, 0], sizes = [1, 4, 128], strides = [1, 1, 1]} : vector<4x4x128xf32> to vector<1x4x128xf32>
    %312 = vector.broadcast %310 : vector<4x1x128xf32> to vector<4x4x128xf32>
    %313 = vector.broadcast %311 : vector<1x4x128xf32> to vector<4x4x128xf32>
    %314 = arith.mulf %312, %313 : vector<4x4x128xf32>
    %315 = arith.addf %309, %314 : vector<4x4x128xf32>
    %316 = vector.extract_strided_slice %304 {offsets = [0, 2, 0], sizes = [4, 1, 128], strides = [1, 1, 1]} : vector<4x4x128xf32> to vector<4x1x128xf32>
    %317 = vector.extract_strided_slice %304 {offsets = [2, 0, 0], sizes = [1, 4, 128], strides = [1, 1, 1]} : vector<4x4x128xf32> to vector<1x4x128xf32>
    %318 = vector.broadcast %316 : vector<4x1x128xf32> to vector<4x4x128xf32>
    %319 = vector.broadcast %317 : vector<1x4x128xf32> to vector<4x4x128xf32>
    %320 = arith.mulf %318, %319 : vector<4x4x128xf32>
    %321 = arith.addf %315, %320 : vector<4x4x128xf32>
    %322 = vector.extract_strided_slice %304 {offsets = [0, 3, 0], sizes = [4, 1, 128], strides = [1, 1, 1]} : vector<4x4x128xf32> to vector<4x1x128xf32>
    %323 = vector.extract_strided_slice %304 {offsets = [3, 0, 0], sizes = [1, 4, 128], strides = [1, 1, 1]} : vector<4x4x128xf32> to vector<1x4x128xf32>
    %324 = vector.broadcast %322 : vector<4x1x128xf32> to vector<4x4x128xf32>
    %325 = vector.broadcast %323 : vector<1x4x128xf32> to vector<4x4x128xf32>
    %326 = arith.mulf %324, %325 : vector<4x4x128xf32>
    %327 = arith.addf %321, %326 : vector<4x4x128xf32>
    %328 = vector.extract_strided_slice %327 {offsets = [0, 0, 0], sizes = [4, 1, 128], strides = [1, 1, 1]} : vector<4x4x128xf32> to vector<4x1x128xf32>
    %329 = vector.extract_strided_slice %327 {offsets = [0, 0, 0], sizes = [1, 4, 128], strides = [1, 1, 1]} : vector<4x4x128xf32> to vector<1x4x128xf32>
    %330 = vector.broadcast %328 : vector<4x1x128xf32> to vector<4x4x128xf32>
    %331 = vector.broadcast %329 : vector<1x4x128xf32> to vector<4x4x128xf32>
    %332 = arith.mulf %330, %331 : vector<4x4x128xf32>
    %333 = vector.extract_strided_slice %327 {offsets = [0, 1, 0], sizes = [4, 1, 128], strides = [1, 1, 1]} : vector<4x4x128xf32> to vector<4x1x128xf32>
    %334 = vector.extract_strided_slice %327 {offsets = [1, 0, 0], sizes = [1, 4, 128], strides = [1, 1, 1]} : vector<4x4x128xf32> to vector<1x4x128xf32>
    %335 = vector.broadcast %333 : vector<4x1x128xf32> to vector<4x4x128xf32>
    %336 = vector.broadcast %334 : vector<1x4x128xf32> to vector<4x4x128xf32>
    %337 = arith.mulf %335, %336 : vector<4x4x128xf32>
    %338 = arith.addf %332, %337 : vector<4x4x128xf32>
    %339 = vector.extract_strided_slice %327 {offsets = [0, 2, 0], sizes = [4, 1, 128], strides = [1, 1, 1]} : vector<4x4x128xf32> to vector<4x1x128xf32>
    %340 = vector.extract_strided_slice %327 {offsets = [2, 0, 0], sizes = [1, 4, 128], strides = [1, 1, 1]} : vector<4x4x128xf32> to vector<1x4x128xf32>
    %341 = vector.broadcast %339 : vector<4x1x128xf32> to vector<4x4x128xf32>
    %342 = vector.broadcast %340 : vector<1x4x128xf32> to vector<4x4x128xf32>
    %343 = arith.mulf %341, %342 : vector<4x4x128xf32>
    %344 = arith.addf %338, %343 : vector<4x4x128xf32>
    %345 = vector.extract_strided_slice %327 {offsets = [0, 3, 0], sizes = [4, 1, 128], strides = [1, 1, 1]} : vector<4x4x128xf32> to vector<4x1x128xf32>
    %346 = vector.extract_strided_slice %327 {offsets = [3, 0, 0], sizes = [1, 4, 128], strides = [1, 1, 1]} : vector<4x4x128xf32> to vector<1x4x128xf32>
    %347 = vector.broadcast %345 : vector<4x1x128xf32> to vector<4x4x128xf32>
    %348 = vector.broadcast %346 : vector<1x4x128xf32> to vector<4x4x128xf32>
    %349 = arith.mulf %347, %348 : vector<4x4x128xf32>
    %350 = arith.addf %344, %349 : vector<4x4x128xf32>
    %cst_15 = arith.constant 1.000000e-30 : f32
    %351 = vector.broadcast %cst_15 : f32 to vector<4x4x128xf32>
    %352 = arith.maximumf %350, %351 : vector<4x4x128xf32>
    %353 = math.log %352 : vector<4x4x128xf32>
    %354 = vector.shape_cast %3 : vector<4x128xf32> to vector<1x4x128xf32>
    %355 = vector.broadcast %354 : vector<1x4x128xf32> to vector<4x4x128xf32>
    %356 = arith.addf %353, %355 : vector<4x4x128xf32>
    %cst_16 = arith.constant dense<0xFF800000> : vector<4x128xf32>
    %357 = vector.multi_reduction <maximumf>, %356, %cst_16 [1] : vector<4x4x128xf32> to vector<4x128xf32>
    %358 = vector.shape_cast %357 : vector<4x128xf32> to vector<4x1x128xf32>
    %359 = vector.shape_cast %358 : vector<4x1x128xf32> to vector<4x128xf32>
    %360 = vector.broadcast %358 : vector<4x1x128xf32> to vector<4x4x128xf32>
    %361 = arith.subf %356, %360 : vector<4x4x128xf32>
    %362 = math.exp %361 : vector<4x4x128xf32>
    %cst_17 = arith.constant dense<0.000000e+00> : vector<4x128xf32>
    %363 = vector.multi_reduction <add>, %362, %cst_17 [1] : vector<4x4x128xf32> to vector<4x128xf32>
    %364 = math.log %363 : vector<4x128xf32>
    %365 = arith.addf %359, %364 : vector<4x128xf32>
    %c0_18 = arith.constant 0 : index
    %c0_19 = arith.constant 0 : index
    %366 = vector.load %arg4[%c0_18, %c0_19] : memref<1x128xf32, #tpu.memory_space<vmem>>, vector<1x128xf32>
    %c0_20 = arith.constant 0 : index
    %c0_21 = arith.constant 0 : index
    %367 = vector.load %arg6[%c0_20, %c0_21] : memref<4x128xf32, #tpu.memory_space<vmem>>, vector<4x128xf32>
    %368 = vector.shape_cast %366 : vector<1x128xf32> to vector<1x1x128xf32>
    %cst_22 = arith.constant 3.906250e-03 : f32
    %369 = vector.broadcast %cst_22 : f32 to vector<1x1x128xf32>
    %370 = arith.mulf %368, %369 : vector<1x1x128xf32>
    %371 = vector.broadcast %370 : vector<1x1x128xf32> to vector<4x4x128xf32>
    %372 = arith.mulf %1, %371 : vector<4x4x128xf32>
    %373 = vector.broadcast %0 : vector<4x4x1xf32> to vector<4x4x128xf32>
    %374 = arith.addf %373, %372 : vector<4x4x128xf32>
    %375 = vector.extract_strided_slice %372 {offsets = [0, 0, 0], sizes = [4, 1, 128], strides = [1, 1, 1]} : vector<4x4x128xf32> to vector<4x1x128xf32>
    %376 = vector.extract_strided_slice %372 {offsets = [0, 0, 0], sizes = [1, 4, 128], strides = [1, 1, 1]} : vector<4x4x128xf32> to vector<1x4x128xf32>
    %377 = vector.broadcast %375 : vector<4x1x128xf32> to vector<4x4x128xf32>
    %378 = vector.broadcast %376 : vector<1x4x128xf32> to vector<4x4x128xf32>
    %379 = arith.mulf %377, %378 : vector<4x4x128xf32>
    %380 = vector.extract_strided_slice %372 {offsets = [0, 1, 0], sizes = [4, 1, 128], strides = [1, 1, 1]} : vector<4x4x128xf32> to vector<4x1x128xf32>
    %381 = vector.extract_strided_slice %372 {offsets = [1, 0, 0], sizes = [1, 4, 128], strides = [1, 1, 1]} : vector<4x4x128xf32> to vector<1x4x128xf32>
    %382 = vector.broadcast %380 : vector<4x1x128xf32> to vector<4x4x128xf32>
    %383 = vector.broadcast %381 : vector<1x4x128xf32> to vector<4x4x128xf32>
    %384 = arith.mulf %382, %383 : vector<4x4x128xf32>
    %385 = arith.addf %379, %384 : vector<4x4x128xf32>
    %386 = vector.extract_strided_slice %372 {offsets = [0, 2, 0], sizes = [4, 1, 128], strides = [1, 1, 1]} : vector<4x4x128xf32> to vector<4x1x128xf32>
    %387 = vector.extract_strided_slice %372 {offsets = [2, 0, 0], sizes = [1, 4, 128], strides = [1, 1, 1]} : vector<4x4x128xf32> to vector<1x4x128xf32>
    %388 = vector.broadcast %386 : vector<4x1x128xf32> to vector<4x4x128xf32>
    %389 = vector.broadcast %387 : vector<1x4x128xf32> to vector<4x4x128xf32>
    %390 = arith.mulf %388, %389 : vector<4x4x128xf32>
    %391 = arith.addf %385, %390 : vector<4x4x128xf32>
    %392 = vector.extract_strided_slice %372 {offsets = [0, 3, 0], sizes = [4, 1, 128], strides = [1, 1, 1]} : vector<4x4x128xf32> to vector<4x1x128xf32>
    %393 = vector.extract_strided_slice %372 {offsets = [3, 0, 0], sizes = [1, 4, 128], strides = [1, 1, 1]} : vector<4x4x128xf32> to vector<1x4x128xf32>
    %394 = vector.broadcast %392 : vector<4x1x128xf32> to vector<4x4x128xf32>
    %395 = vector.broadcast %393 : vector<1x4x128xf32> to vector<4x4x128xf32>
    %396 = arith.mulf %394, %395 : vector<4x4x128xf32>
    %397 = arith.addf %391, %396 : vector<4x4x128xf32>
    %cst_23 = arith.constant 5.000000e-01 : f32
    %398 = vector.broadcast %cst_23 : f32 to vector<4x4x128xf32>
    %399 = arith.mulf %397, %398 : vector<4x4x128xf32>
    %400 = arith.addf %374, %399 : vector<4x4x128xf32>
    %401 = vector.extract_strided_slice %399 {offsets = [0, 0, 0], sizes = [4, 1, 128], strides = [1, 1, 1]} : vector<4x4x128xf32> to vector<4x1x128xf32>
    %402 = vector.extract_strided_slice %372 {offsets = [0, 0, 0], sizes = [1, 4, 128], strides = [1, 1, 1]} : vector<4x4x128xf32> to vector<1x4x128xf32>
    %403 = vector.broadcast %401 : vector<4x1x128xf32> to vector<4x4x128xf32>
    %404 = vector.broadcast %402 : vector<1x4x128xf32> to vector<4x4x128xf32>
    %405 = arith.mulf %403, %404 : vector<4x4x128xf32>
    %406 = vector.extract_strided_slice %399 {offsets = [0, 1, 0], sizes = [4, 1, 128], strides = [1, 1, 1]} : vector<4x4x128xf32> to vector<4x1x128xf32>
    %407 = vector.extract_strided_slice %372 {offsets = [1, 0, 0], sizes = [1, 4, 128], strides = [1, 1, 1]} : vector<4x4x128xf32> to vector<1x4x128xf32>
    %408 = vector.broadcast %406 : vector<4x1x128xf32> to vector<4x4x128xf32>
    %409 = vector.broadcast %407 : vector<1x4x128xf32> to vector<4x4x128xf32>
    %410 = arith.mulf %408, %409 : vector<4x4x128xf32>
    %411 = arith.addf %405, %410 : vector<4x4x128xf32>
    %412 = vector.extract_strided_slice %399 {offsets = [0, 2, 0], sizes = [4, 1, 128], strides = [1, 1, 1]} : vector<4x4x128xf32> to vector<4x1x128xf32>
    %413 = vector.extract_strided_slice %372 {offsets = [2, 0, 0], sizes = [1, 4, 128], strides = [1, 1, 1]} : vector<4x4x128xf32> to vector<1x4x128xf32>
    %414 = vector.broadcast %412 : vector<4x1x128xf32> to vector<4x4x128xf32>
    %415 = vector.broadcast %413 : vector<1x4x128xf32> to vector<4x4x128xf32>
    %416 = arith.mulf %414, %415 : vector<4x4x128xf32>
    %417 = arith.addf %411, %416 : vector<4x4x128xf32>
    %418 = vector.extract_strided_slice %399 {offsets = [0, 3, 0], sizes = [4, 1, 128], strides = [1, 1, 1]} : vector<4x4x128xf32> to vector<4x1x128xf32>
    %419 = vector.extract_strided_slice %372 {offsets = [3, 0, 0], sizes = [1, 4, 128], strides = [1, 1, 1]} : vector<4x4x128xf32> to vector<1x4x128xf32>
    %420 = vector.broadcast %418 : vector<4x1x128xf32> to vector<4x4x128xf32>
    %421 = vector.broadcast %419 : vector<1x4x128xf32> to vector<4x4x128xf32>
    %422 = arith.mulf %420, %421 : vector<4x4x128xf32>
    %423 = arith.addf %417, %422 : vector<4x4x128xf32>
    %cst_24 = arith.constant 0.333333343 : f32
    %424 = vector.broadcast %cst_24 : f32 to vector<4x4x128xf32>
    %425 = arith.mulf %423, %424 : vector<4x4x128xf32>
    %426 = arith.addf %400, %425 : vector<4x4x128xf32>
    %427 = vector.extract_strided_slice %425 {offsets = [0, 0, 0], sizes = [4, 1, 128], strides = [1, 1, 1]} : vector<4x4x128xf32> to vector<4x1x128xf32>
    %428 = vector.extract_strided_slice %372 {offsets = [0, 0, 0], sizes = [1, 4, 128], strides = [1, 1, 1]} : vector<4x4x128xf32> to vector<1x4x128xf32>
    %429 = vector.broadcast %427 : vector<4x1x128xf32> to vector<4x4x128xf32>
    %430 = vector.broadcast %428 : vector<1x4x128xf32> to vector<4x4x128xf32>
    %431 = arith.mulf %429, %430 : vector<4x4x128xf32>
    %432 = vector.extract_strided_slice %425 {offsets = [0, 1, 0], sizes = [4, 1, 128], strides = [1, 1, 1]} : vector<4x4x128xf32> to vector<4x1x128xf32>
    %433 = vector.extract_strided_slice %372 {offsets = [1, 0, 0], sizes = [1, 4, 128], strides = [1, 1, 1]} : vector<4x4x128xf32> to vector<1x4x128xf32>
    %434 = vector.broadcast %432 : vector<4x1x128xf32> to vector<4x4x128xf32>
    %435 = vector.broadcast %433 : vector<1x4x128xf32> to vector<4x4x128xf32>
    %436 = arith.mulf %434, %435 : vector<4x4x128xf32>
    %437 = arith.addf %431, %436 : vector<4x4x128xf32>
    %438 = vector.extract_strided_slice %425 {offsets = [0, 2, 0], sizes = [4, 1, 128], strides = [1, 1, 1]} : vector<4x4x128xf32> to vector<4x1x128xf32>
    %439 = vector.extract_strided_slice %372 {offsets = [2, 0, 0], sizes = [1, 4, 128], strides = [1, 1, 1]} : vector<4x4x128xf32> to vector<1x4x128xf32>
    %440 = vector.broadcast %438 : vector<4x1x128xf32> to vector<4x4x128xf32>
    %441 = vector.broadcast %439 : vector<1x4x128xf32> to vector<4x4x128xf32>
    %442 = arith.mulf %440, %441 : vector<4x4x128xf32>
    %443 = arith.addf %437, %442 : vector<4x4x128xf32>
    %444 = vector.extract_strided_slice %425 {offsets = [0, 3, 0], sizes = [4, 1, 128], strides = [1, 1, 1]} : vector<4x4x128xf32> to vector<4x1x128xf32>
    %445 = vector.extract_strided_slice %372 {offsets = [3, 0, 0], sizes = [1, 4, 128], strides = [1, 1, 1]} : vector<4x4x128xf32> to vector<1x4x128xf32>
    %446 = vector.broadcast %444 : vector<4x1x128xf32> to vector<4x4x128xf32>
    %447 = vector.broadcast %445 : vector<1x4x128xf32> to vector<4x4x128xf32>
    %448 = arith.mulf %446, %447 : vector<4x4x128xf32>
    %449 = arith.addf %443, %448 : vector<4x4x128xf32>
    %cst_25 = arith.constant 2.500000e-01 : f32
    %450 = vector.broadcast %cst_25 : f32 to vector<4x4x128xf32>
    %451 = arith.mulf %449, %450 : vector<4x4x128xf32>
    %452 = arith.addf %426, %451 : vector<4x4x128xf32>
    %453 = vector.extract_strided_slice %451 {offsets = [0, 0, 0], sizes = [4, 1, 128], strides = [1, 1, 1]} : vector<4x4x128xf32> to vector<4x1x128xf32>
    %454 = vector.extract_strided_slice %372 {offsets = [0, 0, 0], sizes = [1, 4, 128], strides = [1, 1, 1]} : vector<4x4x128xf32> to vector<1x4x128xf32>
    %455 = vector.broadcast %453 : vector<4x1x128xf32> to vector<4x4x128xf32>
    %456 = vector.broadcast %454 : vector<1x4x128xf32> to vector<4x4x128xf32>
    %457 = arith.mulf %455, %456 : vector<4x4x128xf32>
    %458 = vector.extract_strided_slice %451 {offsets = [0, 1, 0], sizes = [4, 1, 128], strides = [1, 1, 1]} : vector<4x4x128xf32> to vector<4x1x128xf32>
    %459 = vector.extract_strided_slice %372 {offsets = [1, 0, 0], sizes = [1, 4, 128], strides = [1, 1, 1]} : vector<4x4x128xf32> to vector<1x4x128xf32>
    %460 = vector.broadcast %458 : vector<4x1x128xf32> to vector<4x4x128xf32>
    %461 = vector.broadcast %459 : vector<1x4x128xf32> to vector<4x4x128xf32>
    %462 = arith.mulf %460, %461 : vector<4x4x128xf32>
    %463 = arith.addf %457, %462 : vector<4x4x128xf32>
    %464 = vector.extract_strided_slice %451 {offsets = [0, 2, 0], sizes = [4, 1, 128], strides = [1, 1, 1]} : vector<4x4x128xf32> to vector<4x1x128xf32>
    %465 = vector.extract_strided_slice %372 {offsets = [2, 0, 0], sizes = [1, 4, 128], strides = [1, 1, 1]} : vector<4x4x128xf32> to vector<1x4x128xf32>
    %466 = vector.broadcast %464 : vector<4x1x128xf32> to vector<4x4x128xf32>
    %467 = vector.broadcast %465 : vector<1x4x128xf32> to vector<4x4x128xf32>
    %468 = arith.mulf %466, %467 : vector<4x4x128xf32>
    %469 = arith.addf %463, %468 : vector<4x4x128xf32>
    %470 = vector.extract_strided_slice %451 {offsets = [0, 3, 0], sizes = [4, 1, 128], strides = [1, 1, 1]} : vector<4x4x128xf32> to vector<4x1x128xf32>
    %471 = vector.extract_strided_slice %372 {offsets = [3, 0, 0], sizes = [1, 4, 128], strides = [1, 1, 1]} : vector<4x4x128xf32> to vector<1x4x128xf32>
    %472 = vector.broadcast %470 : vector<4x1x128xf32> to vector<4x4x128xf32>
    %473 = vector.broadcast %471 : vector<1x4x128xf32> to vector<4x4x128xf32>
    %474 = arith.mulf %472, %473 : vector<4x4x128xf32>
    %475 = arith.addf %469, %474 : vector<4x4x128xf32>
    %cst_26 = arith.constant 2.000000e-01 : f32
    %476 = vector.broadcast %cst_26 : f32 to vector<4x4x128xf32>
    %477 = arith.mulf %475, %476 : vector<4x4x128xf32>
    %478 = arith.addf %452, %477 : vector<4x4x128xf32>
    %479 = vector.extract_strided_slice %477 {offsets = [0, 0, 0], sizes = [4, 1, 128], strides = [1, 1, 1]} : vector<4x4x128xf32> to vector<4x1x128xf32>
    %480 = vector.extract_strided_slice %372 {offsets = [0, 0, 0], sizes = [1, 4, 128], strides = [1, 1, 1]} : vector<4x4x128xf32> to vector<1x4x128xf32>
    %481 = vector.broadcast %479 : vector<4x1x128xf32> to vector<4x4x128xf32>
    %482 = vector.broadcast %480 : vector<1x4x128xf32> to vector<4x4x128xf32>
    %483 = arith.mulf %481, %482 : vector<4x4x128xf32>
    %484 = vector.extract_strided_slice %477 {offsets = [0, 1, 0], sizes = [4, 1, 128], strides = [1, 1, 1]} : vector<4x4x128xf32> to vector<4x1x128xf32>
    %485 = vector.extract_strided_slice %372 {offsets = [1, 0, 0], sizes = [1, 4, 128], strides = [1, 1, 1]} : vector<4x4x128xf32> to vector<1x4x128xf32>
    %486 = vector.broadcast %484 : vector<4x1x128xf32> to vector<4x4x128xf32>
    %487 = vector.broadcast %485 : vector<1x4x128xf32> to vector<4x4x128xf32>
    %488 = arith.mulf %486, %487 : vector<4x4x128xf32>
    %489 = arith.addf %483, %488 : vector<4x4x128xf32>
    %490 = vector.extract_strided_slice %477 {offsets = [0, 2, 0], sizes = [4, 1, 128], strides = [1, 1, 1]} : vector<4x4x128xf32> to vector<4x1x128xf32>
    %491 = vector.extract_strided_slice %372 {offsets = [2, 0, 0], sizes = [1, 4, 128], strides = [1, 1, 1]} : vector<4x4x128xf32> to vector<1x4x128xf32>
    %492 = vector.broadcast %490 : vector<4x1x128xf32> to vector<4x4x128xf32>
    %493 = vector.broadcast %491 : vector<1x4x128xf32> to vector<4x4x128xf32>
    %494 = arith.mulf %492, %493 : vector<4x4x128xf32>
    %495 = arith.addf %489, %494 : vector<4x4x128xf32>
    %496 = vector.extract_strided_slice %477 {offsets = [0, 3, 0], sizes = [4, 1, 128], strides = [1, 1, 1]} : vector<4x4x128xf32> to vector<4x1x128xf32>
    %497 = vector.extract_strided_slice %372 {offsets = [3, 0, 0], sizes = [1, 4, 128], strides = [1, 1, 1]} : vector<4x4x128xf32> to vector<1x4x128xf32>
    %498 = vector.broadcast %496 : vector<4x1x128xf32> to vector<4x4x128xf32>
    %499 = vector.broadcast %497 : vector<1x4x128xf32> to vector<4x4x128xf32>
    %500 = arith.mulf %498, %499 : vector<4x4x128xf32>
    %501 = arith.addf %495, %500 : vector<4x4x128xf32>
    %cst_27 = arith.constant 0.166666672 : f32
    %502 = vector.broadcast %cst_27 : f32 to vector<4x4x128xf32>
    %503 = arith.mulf %501, %502 : vector<4x4x128xf32>
    %504 = arith.addf %478, %503 : vector<4x4x128xf32>
    %505 = vector.extract_strided_slice %503 {offsets = [0, 0, 0], sizes = [4, 1, 128], strides = [1, 1, 1]} : vector<4x4x128xf32> to vector<4x1x128xf32>
    %506 = vector.extract_strided_slice %372 {offsets = [0, 0, 0], sizes = [1, 4, 128], strides = [1, 1, 1]} : vector<4x4x128xf32> to vector<1x4x128xf32>
    %507 = vector.broadcast %505 : vector<4x1x128xf32> to vector<4x4x128xf32>
    %508 = vector.broadcast %506 : vector<1x4x128xf32> to vector<4x4x128xf32>
    %509 = arith.mulf %507, %508 : vector<4x4x128xf32>
    %510 = vector.extract_strided_slice %503 {offsets = [0, 1, 0], sizes = [4, 1, 128], strides = [1, 1, 1]} : vector<4x4x128xf32> to vector<4x1x128xf32>
    %511 = vector.extract_strided_slice %372 {offsets = [1, 0, 0], sizes = [1, 4, 128], strides = [1, 1, 1]} : vector<4x4x128xf32> to vector<1x4x128xf32>
    %512 = vector.broadcast %510 : vector<4x1x128xf32> to vector<4x4x128xf32>
    %513 = vector.broadcast %511 : vector<1x4x128xf32> to vector<4x4x128xf32>
    %514 = arith.mulf %512, %513 : vector<4x4x128xf32>
    %515 = arith.addf %509, %514 : vector<4x4x128xf32>
    %516 = vector.extract_strided_slice %503 {offsets = [0, 2, 0], sizes = [4, 1, 128], strides = [1, 1, 1]} : vector<4x4x128xf32> to vector<4x1x128xf32>
    %517 = vector.extract_strided_slice %372 {offsets = [2, 0, 0], sizes = [1, 4, 128], strides = [1, 1, 1]} : vector<4x4x128xf32> to vector<1x4x128xf32>
    %518 = vector.broadcast %516 : vector<4x1x128xf32> to vector<4x4x128xf32>
    %519 = vector.broadcast %517 : vector<1x4x128xf32> to vector<4x4x128xf32>
    %520 = arith.mulf %518, %519 : vector<4x4x128xf32>
    %521 = arith.addf %515, %520 : vector<4x4x128xf32>
    %522 = vector.extract_strided_slice %503 {offsets = [0, 3, 0], sizes = [4, 1, 128], strides = [1, 1, 1]} : vector<4x4x128xf32> to vector<4x1x128xf32>
    %523 = vector.extract_strided_slice %372 {offsets = [3, 0, 0], sizes = [1, 4, 128], strides = [1, 1, 1]} : vector<4x4x128xf32> to vector<1x4x128xf32>
    %524 = vector.broadcast %522 : vector<4x1x128xf32> to vector<4x4x128xf32>
    %525 = vector.broadcast %523 : vector<1x4x128xf32> to vector<4x4x128xf32>
    %526 = arith.mulf %524, %525 : vector<4x4x128xf32>
    %527 = arith.addf %521, %526 : vector<4x4x128xf32>
    %cst_28 = arith.constant 0.142857149 : f32
    %528 = vector.broadcast %cst_28 : f32 to vector<4x4x128xf32>
    %529 = arith.mulf %527, %528 : vector<4x4x128xf32>
    %530 = arith.addf %504, %529 : vector<4x4x128xf32>
    %531 = vector.extract_strided_slice %530 {offsets = [0, 0, 0], sizes = [4, 1, 128], strides = [1, 1, 1]} : vector<4x4x128xf32> to vector<4x1x128xf32>
    %532 = vector.extract_strided_slice %530 {offsets = [0, 0, 0], sizes = [1, 4, 128], strides = [1, 1, 1]} : vector<4x4x128xf32> to vector<1x4x128xf32>
    %533 = vector.broadcast %531 : vector<4x1x128xf32> to vector<4x4x128xf32>
    %534 = vector.broadcast %532 : vector<1x4x128xf32> to vector<4x4x128xf32>
    %535 = arith.mulf %533, %534 : vector<4x4x128xf32>
    %536 = vector.extract_strided_slice %530 {offsets = [0, 1, 0], sizes = [4, 1, 128], strides = [1, 1, 1]} : vector<4x4x128xf32> to vector<4x1x128xf32>
    %537 = vector.extract_strided_slice %530 {offsets = [1, 0, 0], sizes = [1, 4, 128], strides = [1, 1, 1]} : vector<4x4x128xf32> to vector<1x4x128xf32>
    %538 = vector.broadcast %536 : vector<4x1x128xf32> to vector<4x4x128xf32>
    %539 = vector.broadcast %537 : vector<1x4x128xf32> to vector<4x4x128xf32>
    %540 = arith.mulf %538, %539 : vector<4x4x128xf32>
    %541 = arith.addf %535, %540 : vector<4x4x128xf32>
    %542 = vector.extract_strided_slice %530 {offsets = [0, 2, 0], sizes = [4, 1, 128], strides = [1, 1, 1]} : vector<4x4x128xf32> to vector<4x1x128xf32>
    %543 = vector.extract_strided_slice %530 {offsets = [2, 0, 0], sizes = [1, 4, 128], strides = [1, 1, 1]} : vector<4x4x128xf32> to vector<1x4x128xf32>
    %544 = vector.broadcast %542 : vector<4x1x128xf32> to vector<4x4x128xf32>
    %545 = vector.broadcast %543 : vector<1x4x128xf32> to vector<4x4x128xf32>
    %546 = arith.mulf %544, %545 : vector<4x4x128xf32>
    %547 = arith.addf %541, %546 : vector<4x4x128xf32>
    %548 = vector.extract_strided_slice %530 {offsets = [0, 3, 0], sizes = [4, 1, 128], strides = [1, 1, 1]} : vector<4x4x128xf32> to vector<4x1x128xf32>
    %549 = vector.extract_strided_slice %530 {offsets = [3, 0, 0], sizes = [1, 4, 128], strides = [1, 1, 1]} : vector<4x4x128xf32> to vector<1x4x128xf32>
    %550 = vector.broadcast %548 : vector<4x1x128xf32> to vector<4x4x128xf32>
    %551 = vector.broadcast %549 : vector<1x4x128xf32> to vector<4x4x128xf32>
    %552 = arith.mulf %550, %551 : vector<4x4x128xf32>
    %553 = arith.addf %547, %552 : vector<4x4x128xf32>
    %554 = vector.extract_strided_slice %553 {offsets = [0, 0, 0], sizes = [4, 1, 128], strides = [1, 1, 1]} : vector<4x4x128xf32> to vector<4x1x128xf32>
    %555 = vector.extract_strided_slice %553 {offsets = [0, 0, 0], sizes = [1, 4, 128], strides = [1, 1, 1]} : vector<4x4x128xf32> to vector<1x4x128xf32>
    %556 = vector.broadcast %554 : vector<4x1x128xf32> to vector<4x4x128xf32>
    %557 = vector.broadcast %555 : vector<1x4x128xf32> to vector<4x4x128xf32>
    %558 = arith.mulf %556, %557 : vector<4x4x128xf32>
    %559 = vector.extract_strided_slice %553 {offsets = [0, 1, 0], sizes = [4, 1, 128], strides = [1, 1, 1]} : vector<4x4x128xf32> to vector<4x1x128xf32>
    %560 = vector.extract_strided_slice %553 {offsets = [1, 0, 0], sizes = [1, 4, 128], strides = [1, 1, 1]} : vector<4x4x128xf32> to vector<1x4x128xf32>
    %561 = vector.broadcast %559 : vector<4x1x128xf32> to vector<4x4x128xf32>
    %562 = vector.broadcast %560 : vector<1x4x128xf32> to vector<4x4x128xf32>
    %563 = arith.mulf %561, %562 : vector<4x4x128xf32>
    %564 = arith.addf %558, %563 : vector<4x4x128xf32>
    %565 = vector.extract_strided_slice %553 {offsets = [0, 2, 0], sizes = [4, 1, 128], strides = [1, 1, 1]} : vector<4x4x128xf32> to vector<4x1x128xf32>
    %566 = vector.extract_strided_slice %553 {offsets = [2, 0, 0], sizes = [1, 4, 128], strides = [1, 1, 1]} : vector<4x4x128xf32> to vector<1x4x128xf32>
    %567 = vector.broadcast %565 : vector<4x1x128xf32> to vector<4x4x128xf32>
    %568 = vector.broadcast %566 : vector<1x4x128xf32> to vector<4x4x128xf32>
    %569 = arith.mulf %567, %568 : vector<4x4x128xf32>
    %570 = arith.addf %564, %569 : vector<4x4x128xf32>
    %571 = vector.extract_strided_slice %553 {offsets = [0, 3, 0], sizes = [4, 1, 128], strides = [1, 1, 1]} : vector<4x4x128xf32> to vector<4x1x128xf32>
    %572 = vector.extract_strided_slice %553 {offsets = [3, 0, 0], sizes = [1, 4, 128], strides = [1, 1, 1]} : vector<4x4x128xf32> to vector<1x4x128xf32>
    %573 = vector.broadcast %571 : vector<4x1x128xf32> to vector<4x4x128xf32>
    %574 = vector.broadcast %572 : vector<1x4x128xf32> to vector<4x4x128xf32>
    %575 = arith.mulf %573, %574 : vector<4x4x128xf32>
    %576 = arith.addf %570, %575 : vector<4x4x128xf32>
    %577 = vector.extract_strided_slice %576 {offsets = [0, 0, 0], sizes = [4, 1, 128], strides = [1, 1, 1]} : vector<4x4x128xf32> to vector<4x1x128xf32>
    %578 = vector.extract_strided_slice %576 {offsets = [0, 0, 0], sizes = [1, 4, 128], strides = [1, 1, 1]} : vector<4x4x128xf32> to vector<1x4x128xf32>
    %579 = vector.broadcast %577 : vector<4x1x128xf32> to vector<4x4x128xf32>
    %580 = vector.broadcast %578 : vector<1x4x128xf32> to vector<4x4x128xf32>
    %581 = arith.mulf %579, %580 : vector<4x4x128xf32>
    %582 = vector.extract_strided_slice %576 {offsets = [0, 1, 0], sizes = [4, 1, 128], strides = [1, 1, 1]} : vector<4x4x128xf32> to vector<4x1x128xf32>
    %583 = vector.extract_strided_slice %576 {offsets = [1, 0, 0], sizes = [1, 4, 128], strides = [1, 1, 1]} : vector<4x4x128xf32> to vector<1x4x128xf32>
    %584 = vector.broadcast %582 : vector<4x1x128xf32> to vector<4x4x128xf32>
    %585 = vector.broadcast %583 : vector<1x4x128xf32> to vector<4x4x128xf32>
    %586 = arith.mulf %584, %585 : vector<4x4x128xf32>
    %587 = arith.addf %581, %586 : vector<4x4x128xf32>
    %588 = vector.extract_strided_slice %576 {offsets = [0, 2, 0], sizes = [4, 1, 128], strides = [1, 1, 1]} : vector<4x4x128xf32> to vector<4x1x128xf32>
    %589 = vector.extract_strided_slice %576 {offsets = [2, 0, 0], sizes = [1, 4, 128], strides = [1, 1, 1]} : vector<4x4x128xf32> to vector<1x4x128xf32>
    %590 = vector.broadcast %588 : vector<4x1x128xf32> to vector<4x4x128xf32>
    %591 = vector.broadcast %589 : vector<1x4x128xf32> to vector<4x4x128xf32>
    %592 = arith.mulf %590, %591 : vector<4x4x128xf32>
    %593 = arith.addf %587, %592 : vector<4x4x128xf32>
    %594 = vector.extract_strided_slice %576 {offsets = [0, 3, 0], sizes = [4, 1, 128], strides = [1, 1, 1]} : vector<4x4x128xf32> to vector<4x1x128xf32>
    %595 = vector.extract_strided_slice %576 {offsets = [3, 0, 0], sizes = [1, 4, 128], strides = [1, 1, 1]} : vector<4x4x128xf32> to vector<1x4x128xf32>
    %596 = vector.broadcast %594 : vector<4x1x128xf32> to vector<4x4x128xf32>
    %597 = vector.broadcast %595 : vector<1x4x128xf32> to vector<4x4x128xf32>
    %598 = arith.mulf %596, %597 : vector<4x4x128xf32>
    %599 = arith.addf %593, %598 : vector<4x4x128xf32>
    %600 = vector.extract_strided_slice %599 {offsets = [0, 0, 0], sizes = [4, 1, 128], strides = [1, 1, 1]} : vector<4x4x128xf32> to vector<4x1x128xf32>
    %601 = vector.extract_strided_slice %599 {offsets = [0, 0, 0], sizes = [1, 4, 128], strides = [1, 1, 1]} : vector<4x4x128xf32> to vector<1x4x128xf32>
    %602 = vector.broadcast %600 : vector<4x1x128xf32> to vector<4x4x128xf32>
    %603 = vector.broadcast %601 : vector<1x4x128xf32> to vector<4x4x128xf32>
    %604 = arith.mulf %602, %603 : vector<4x4x128xf32>
    %605 = vector.extract_strided_slice %599 {offsets = [0, 1, 0], sizes = [4, 1, 128], strides = [1, 1, 1]} : vector<4x4x128xf32> to vector<4x1x128xf32>
    %606 = vector.extract_strided_slice %599 {offsets = [1, 0, 0], sizes = [1, 4, 128], strides = [1, 1, 1]} : vector<4x4x128xf32> to vector<1x4x128xf32>
    %607 = vector.broadcast %605 : vector<4x1x128xf32> to vector<4x4x128xf32>
    %608 = vector.broadcast %606 : vector<1x4x128xf32> to vector<4x4x128xf32>
    %609 = arith.mulf %607, %608 : vector<4x4x128xf32>
    %610 = arith.addf %604, %609 : vector<4x4x128xf32>
    %611 = vector.extract_strided_slice %599 {offsets = [0, 2, 0], sizes = [4, 1, 128], strides = [1, 1, 1]} : vector<4x4x128xf32> to vector<4x1x128xf32>
    %612 = vector.extract_strided_slice %599 {offsets = [2, 0, 0], sizes = [1, 4, 128], strides = [1, 1, 1]} : vector<4x4x128xf32> to vector<1x4x128xf32>
    %613 = vector.broadcast %611 : vector<4x1x128xf32> to vector<4x4x128xf32>
    %614 = vector.broadcast %612 : vector<1x4x128xf32> to vector<4x4x128xf32>
    %615 = arith.mulf %613, %614 : vector<4x4x128xf32>
    %616 = arith.addf %610, %615 : vector<4x4x128xf32>
    %617 = vector.extract_strided_slice %599 {offsets = [0, 3, 0], sizes = [4, 1, 128], strides = [1, 1, 1]} : vector<4x4x128xf32> to vector<4x1x128xf32>
    %618 = vector.extract_strided_slice %599 {offsets = [3, 0, 0], sizes = [1, 4, 128], strides = [1, 1, 1]} : vector<4x4x128xf32> to vector<1x4x128xf32>
    %619 = vector.broadcast %617 : vector<4x1x128xf32> to vector<4x4x128xf32>
    %620 = vector.broadcast %618 : vector<1x4x128xf32> to vector<4x4x128xf32>
    %621 = arith.mulf %619, %620 : vector<4x4x128xf32>
    %622 = arith.addf %616, %621 : vector<4x4x128xf32>
    %623 = vector.extract_strided_slice %622 {offsets = [0, 0, 0], sizes = [4, 1, 128], strides = [1, 1, 1]} : vector<4x4x128xf32> to vector<4x1x128xf32>
    %624 = vector.extract_strided_slice %622 {offsets = [0, 0, 0], sizes = [1, 4, 128], strides = [1, 1, 1]} : vector<4x4x128xf32> to vector<1x4x128xf32>
    %625 = vector.broadcast %623 : vector<4x1x128xf32> to vector<4x4x128xf32>
    %626 = vector.broadcast %624 : vector<1x4x128xf32> to vector<4x4x128xf32>
    %627 = arith.mulf %625, %626 : vector<4x4x128xf32>
    %628 = vector.extract_strided_slice %622 {offsets = [0, 1, 0], sizes = [4, 1, 128], strides = [1, 1, 1]} : vector<4x4x128xf32> to vector<4x1x128xf32>
    %629 = vector.extract_strided_slice %622 {offsets = [1, 0, 0], sizes = [1, 4, 128], strides = [1, 1, 1]} : vector<4x4x128xf32> to vector<1x4x128xf32>
    %630 = vector.broadcast %628 : vector<4x1x128xf32> to vector<4x4x128xf32>
    %631 = vector.broadcast %629 : vector<1x4x128xf32> to vector<4x4x128xf32>
    %632 = arith.mulf %630, %631 : vector<4x4x128xf32>
    %633 = arith.addf %627, %632 : vector<4x4x128xf32>
    %634 = vector.extract_strided_slice %622 {offsets = [0, 2, 0], sizes = [4, 1, 128], strides = [1, 1, 1]} : vector<4x4x128xf32> to vector<4x1x128xf32>
    %635 = vector.extract_strided_slice %622 {offsets = [2, 0, 0], sizes = [1, 4, 128], strides = [1, 1, 1]} : vector<4x4x128xf32> to vector<1x4x128xf32>
    %636 = vector.broadcast %634 : vector<4x1x128xf32> to vector<4x4x128xf32>
    %637 = vector.broadcast %635 : vector<1x4x128xf32> to vector<4x4x128xf32>
    %638 = arith.mulf %636, %637 : vector<4x4x128xf32>
    %639 = arith.addf %633, %638 : vector<4x4x128xf32>
    %640 = vector.extract_strided_slice %622 {offsets = [0, 3, 0], sizes = [4, 1, 128], strides = [1, 1, 1]} : vector<4x4x128xf32> to vector<4x1x128xf32>
    %641 = vector.extract_strided_slice %622 {offsets = [3, 0, 0], sizes = [1, 4, 128], strides = [1, 1, 1]} : vector<4x4x128xf32> to vector<1x4x128xf32>
    %642 = vector.broadcast %640 : vector<4x1x128xf32> to vector<4x4x128xf32>
    %643 = vector.broadcast %641 : vector<1x4x128xf32> to vector<4x4x128xf32>
    %644 = arith.mulf %642, %643 : vector<4x4x128xf32>
    %645 = arith.addf %639, %644 : vector<4x4x128xf32>
    %646 = vector.extract_strided_slice %645 {offsets = [0, 0, 0], sizes = [4, 1, 128], strides = [1, 1, 1]} : vector<4x4x128xf32> to vector<4x1x128xf32>
    %647 = vector.extract_strided_slice %645 {offsets = [0, 0, 0], sizes = [1, 4, 128], strides = [1, 1, 1]} : vector<4x4x128xf32> to vector<1x4x128xf32>
    %648 = vector.broadcast %646 : vector<4x1x128xf32> to vector<4x4x128xf32>
    %649 = vector.broadcast %647 : vector<1x4x128xf32> to vector<4x4x128xf32>
    %650 = arith.mulf %648, %649 : vector<4x4x128xf32>
    %651 = vector.extract_strided_slice %645 {offsets = [0, 1, 0], sizes = [4, 1, 128], strides = [1, 1, 1]} : vector<4x4x128xf32> to vector<4x1x128xf32>
    %652 = vector.extract_strided_slice %645 {offsets = [1, 0, 0], sizes = [1, 4, 128], strides = [1, 1, 1]} : vector<4x4x128xf32> to vector<1x4x128xf32>
    %653 = vector.broadcast %651 : vector<4x1x128xf32> to vector<4x4x128xf32>
    %654 = vector.broadcast %652 : vector<1x4x128xf32> to vector<4x4x128xf32>
    %655 = arith.mulf %653, %654 : vector<4x4x128xf32>
    %656 = arith.addf %650, %655 : vector<4x4x128xf32>
    %657 = vector.extract_strided_slice %645 {offsets = [0, 2, 0], sizes = [4, 1, 128], strides = [1, 1, 1]} : vector<4x4x128xf32> to vector<4x1x128xf32>
    %658 = vector.extract_strided_slice %645 {offsets = [2, 0, 0], sizes = [1, 4, 128], strides = [1, 1, 1]} : vector<4x4x128xf32> to vector<1x4x128xf32>
    %659 = vector.broadcast %657 : vector<4x1x128xf32> to vector<4x4x128xf32>
    %660 = vector.broadcast %658 : vector<1x4x128xf32> to vector<4x4x128xf32>
    %661 = arith.mulf %659, %660 : vector<4x4x128xf32>
    %662 = arith.addf %656, %661 : vector<4x4x128xf32>
    %663 = vector.extract_strided_slice %645 {offsets = [0, 3, 0], sizes = [4, 1, 128], strides = [1, 1, 1]} : vector<4x4x128xf32> to vector<4x1x128xf32>
    %664 = vector.extract_strided_slice %645 {offsets = [3, 0, 0], sizes = [1, 4, 128], strides = [1, 1, 1]} : vector<4x4x128xf32> to vector<1x4x128xf32>
    %665 = vector.broadcast %663 : vector<4x1x128xf32> to vector<4x4x128xf32>
    %666 = vector.broadcast %664 : vector<1x4x128xf32> to vector<4x4x128xf32>
    %667 = arith.mulf %665, %666 : vector<4x4x128xf32>
    %668 = arith.addf %662, %667 : vector<4x4x128xf32>
    %669 = vector.extract_strided_slice %668 {offsets = [0, 0, 0], sizes = [4, 1, 128], strides = [1, 1, 1]} : vector<4x4x128xf32> to vector<4x1x128xf32>
    %670 = vector.extract_strided_slice %668 {offsets = [0, 0, 0], sizes = [1, 4, 128], strides = [1, 1, 1]} : vector<4x4x128xf32> to vector<1x4x128xf32>
    %671 = vector.broadcast %669 : vector<4x1x128xf32> to vector<4x4x128xf32>
    %672 = vector.broadcast %670 : vector<1x4x128xf32> to vector<4x4x128xf32>
    %673 = arith.mulf %671, %672 : vector<4x4x128xf32>
    %674 = vector.extract_strided_slice %668 {offsets = [0, 1, 0], sizes = [4, 1, 128], strides = [1, 1, 1]} : vector<4x4x128xf32> to vector<4x1x128xf32>
    %675 = vector.extract_strided_slice %668 {offsets = [1, 0, 0], sizes = [1, 4, 128], strides = [1, 1, 1]} : vector<4x4x128xf32> to vector<1x4x128xf32>
    %676 = vector.broadcast %674 : vector<4x1x128xf32> to vector<4x4x128xf32>
    %677 = vector.broadcast %675 : vector<1x4x128xf32> to vector<4x4x128xf32>
    %678 = arith.mulf %676, %677 : vector<4x4x128xf32>
    %679 = arith.addf %673, %678 : vector<4x4x128xf32>
    %680 = vector.extract_strided_slice %668 {offsets = [0, 2, 0], sizes = [4, 1, 128], strides = [1, 1, 1]} : vector<4x4x128xf32> to vector<4x1x128xf32>
    %681 = vector.extract_strided_slice %668 {offsets = [2, 0, 0], sizes = [1, 4, 128], strides = [1, 1, 1]} : vector<4x4x128xf32> to vector<1x4x128xf32>
    %682 = vector.broadcast %680 : vector<4x1x128xf32> to vector<4x4x128xf32>
    %683 = vector.broadcast %681 : vector<1x4x128xf32> to vector<4x4x128xf32>
    %684 = arith.mulf %682, %683 : vector<4x4x128xf32>
    %685 = arith.addf %679, %684 : vector<4x4x128xf32>
    %686 = vector.extract_strided_slice %668 {offsets = [0, 3, 0], sizes = [4, 1, 128], strides = [1, 1, 1]} : vector<4x4x128xf32> to vector<4x1x128xf32>
    %687 = vector.extract_strided_slice %668 {offsets = [3, 0, 0], sizes = [1, 4, 128], strides = [1, 1, 1]} : vector<4x4x128xf32> to vector<1x4x128xf32>
    %688 = vector.broadcast %686 : vector<4x1x128xf32> to vector<4x4x128xf32>
    %689 = vector.broadcast %687 : vector<1x4x128xf32> to vector<4x4x128xf32>
    %690 = arith.mulf %688, %689 : vector<4x4x128xf32>
    %691 = arith.addf %685, %690 : vector<4x4x128xf32>
    %692 = vector.extract_strided_slice %691 {offsets = [0, 0, 0], sizes = [4, 1, 128], strides = [1, 1, 1]} : vector<4x4x128xf32> to vector<4x1x128xf32>
    %693 = vector.extract_strided_slice %691 {offsets = [0, 0, 0], sizes = [1, 4, 128], strides = [1, 1, 1]} : vector<4x4x128xf32> to vector<1x4x128xf32>
    %694 = vector.broadcast %692 : vector<4x1x128xf32> to vector<4x4x128xf32>
    %695 = vector.broadcast %693 : vector<1x4x128xf32> to vector<4x4x128xf32>
    %696 = arith.mulf %694, %695 : vector<4x4x128xf32>
    %697 = vector.extract_strided_slice %691 {offsets = [0, 1, 0], sizes = [4, 1, 128], strides = [1, 1, 1]} : vector<4x4x128xf32> to vector<4x1x128xf32>
    %698 = vector.extract_strided_slice %691 {offsets = [1, 0, 0], sizes = [1, 4, 128], strides = [1, 1, 1]} : vector<4x4x128xf32> to vector<1x4x128xf32>
    %699 = vector.broadcast %697 : vector<4x1x128xf32> to vector<4x4x128xf32>
    %700 = vector.broadcast %698 : vector<1x4x128xf32> to vector<4x4x128xf32>
    %701 = arith.mulf %699, %700 : vector<4x4x128xf32>
    %702 = arith.addf %696, %701 : vector<4x4x128xf32>
    %703 = vector.extract_strided_slice %691 {offsets = [0, 2, 0], sizes = [4, 1, 128], strides = [1, 1, 1]} : vector<4x4x128xf32> to vector<4x1x128xf32>
    %704 = vector.extract_strided_slice %691 {offsets = [2, 0, 0], sizes = [1, 4, 128], strides = [1, 1, 1]} : vector<4x4x128xf32> to vector<1x4x128xf32>
    %705 = vector.broadcast %703 : vector<4x1x128xf32> to vector<4x4x128xf32>
    %706 = vector.broadcast %704 : vector<1x4x128xf32> to vector<4x4x128xf32>
    %707 = arith.mulf %705, %706 : vector<4x4x128xf32>
    %708 = arith.addf %702, %707 : vector<4x4x128xf32>
    %709 = vector.extract_strided_slice %691 {offsets = [0, 3, 0], sizes = [4, 1, 128], strides = [1, 1, 1]} : vector<4x4x128xf32> to vector<4x1x128xf32>
    %710 = vector.extract_strided_slice %691 {offsets = [3, 0, 0], sizes = [1, 4, 128], strides = [1, 1, 1]} : vector<4x4x128xf32> to vector<1x4x128xf32>
    %711 = vector.broadcast %709 : vector<4x1x128xf32> to vector<4x4x128xf32>
    %712 = vector.broadcast %710 : vector<1x4x128xf32> to vector<4x4x128xf32>
    %713 = arith.mulf %711, %712 : vector<4x4x128xf32>
    %714 = arith.addf %708, %713 : vector<4x4x128xf32>
    %cst_29 = arith.constant 1.000000e-30 : f32
    %715 = vector.broadcast %cst_29 : f32 to vector<4x4x128xf32>
    %716 = arith.maximumf %714, %715 : vector<4x4x128xf32>
    %717 = math.log %716 : vector<4x4x128xf32>
    %718 = vector.shape_cast %367 : vector<4x128xf32> to vector<1x4x128xf32>
    %719 = vector.broadcast %718 : vector<1x4x128xf32> to vector<4x4x128xf32>
    %720 = arith.addf %717, %719 : vector<4x4x128xf32>
    %cst_30 = arith.constant dense<0xFF800000> : vector<4x128xf32>
    %721 = vector.multi_reduction <maximumf>, %720, %cst_30 [1] : vector<4x4x128xf32> to vector<4x128xf32>
    %722 = vector.shape_cast %721 : vector<4x128xf32> to vector<4x1x128xf32>
    %723 = vector.shape_cast %722 : vector<4x1x128xf32> to vector<4x128xf32>
    %724 = vector.broadcast %722 : vector<4x1x128xf32> to vector<4x4x128xf32>
    %725 = arith.subf %720, %724 : vector<4x4x128xf32>
    %726 = math.exp %725 : vector<4x4x128xf32>
    %cst_31 = arith.constant dense<0.000000e+00> : vector<4x128xf32>
    %727 = vector.multi_reduction <add>, %726, %cst_31 [1] : vector<4x4x128xf32> to vector<4x128xf32>
    %728 = math.log %727 : vector<4x128xf32>
    %729 = arith.addf %723, %728 : vector<4x128xf32>
    %730 = arith.addf %365, %729 : vector<4x128xf32>
    %c0_32 = arith.constant 0 : index
    %c0_33 = arith.constant 0 : index
    %731 = vector.load %arg8[%c0_32, %c0_33] : memref<4x128xf32, #tpu.memory_space<vmem>>, vector<4x128xf32>
    tpu.vector_store %arg8[%c0_32, %c0_33], %730 {strides = array<i32>} : memref<4x128xf32, #tpu.memory_space<vmem>>, vector<4x128xf32>,
    %c0_34 = arith.constant 0 : index
    %c0_35 = arith.constant 0 : index
    %732 = vector.load %arg7[%c0_34, %c0_35] : memref<4x128xf32, #tpu.memory_space<vmem>>, vector<4x128xf32>
    %733 = arith.addf %730, %732 : vector<4x128xf32>
    %cst_36 = arith.constant dense<0xFF800000> : vector<128xf32>
    %734 = vector.multi_reduction <maximumf>, %733, %cst_36 [0] : vector<4x128xf32> to vector<128xf32>
    %735 = vector.shape_cast %734 : vector<128xf32> to vector<1x128xf32>
    %736 = vector.broadcast %735 : vector<1x128xf32> to vector<4x128xf32>
    %737 = arith.subf %733, %736 : vector<4x128xf32>
    %738 = math.exp %737 : vector<4x128xf32>
    %cst_37 = arith.constant dense<0.000000e+00> : vector<128xf32>
    %739 = vector.multi_reduction <add>, %738, %cst_37 [0] : vector<4x128xf32> to vector<128xf32>
    %740 = vector.shape_cast %739 : vector<128xf32> to vector<1x128xf32>
    %741 = math.log %740 : vector<1x128xf32>
    %742 = arith.addf %735, %741 : vector<1x128xf32>
    %c0_38 = arith.constant 0 : index
    %c0_39 = arith.constant 0 : index
    %743 = vector.load %arg9[%c0_38, %c0_39] : memref<1x128xf32, #tpu.memory_space<vmem>>, vector<1x128xf32>
    tpu.vector_store %arg9[%c0_38, %c0_39], %742 {strides = array<i32>} : memref<1x128xf32, #tpu.memory_space<vmem>>, vector<1x128xf32>,
    return
  }
  func.func @transform_0(%arg0: i32) -> (i32, i32, i32) {
    %c0_i32 = arith.constant 0 : i32
    %c0_i32_0 = arith.constant 0 : i32
    %c0_i32_1 = arith.constant 0 : i32
    %c0_i32_2 = arith.constant 0 : i32
    return %c0_i32, %c0_i32_0, %c0_i32_1 : i32, i32, i32
  }
  func.func @transform_1(%arg0: i32) -> (i32, i32, i32) {
    %c0_i32 = arith.constant 0 : i32
    %c0_i32_0 = arith.constant 0 : i32
    %c0_i32_1 = arith.constant 0 : i32
    return %c0_i32, %c0_i32_0, %arg0 : i32, i32, i32
  }
  func.func @transform_2(%arg0: i32) -> (i32, i32) {
    %c0_i32 = arith.constant 0 : i32
    %c0_i32_0 = arith.constant 0 : i32
    return %c0_i32, %arg0 : i32, i32
  }
  func.func @transform_3(%arg0: i32) -> (i32, i32) {
    %c0_i32 = arith.constant 0 : i32
    %c0_i32_0 = arith.constant 0 : i32
    return %c0_i32, %arg0 : i32, i32
  }
  func.func @transform_4(%arg0: i32) -> (i32, i32) {
    %c0_i32 = arith.constant 0 : i32
    %c0_i32_0 = arith.constant 0 : i32
    return %c0_i32, %arg0 : i32, i32
  }
  func.func @transform_5(%arg0: i32) -> (i32, i32) {
    %c0_i32 = arith.constant 0 : i32
    %c0_i32_0 = arith.constant 0 : i32
    return %c0_i32, %arg0 : i32, i32
  }
  func.func @transform_6(%arg0: i32) -> (i32, i32) {
    %c0_i32 = arith.constant 0 : i32
    %c0_i32_0 = arith.constant 0 : i32
    return %c0_i32, %arg0 : i32, i32
  }
  func.func @transform_7(%arg0: i32) -> (i32, i32) {
    %c0_i32 = arith.constant 0 : i32
    %c0_i32_0 = arith.constant 0 : i32
    return %c0_i32, %arg0 : i32, i32
  }
  func.func @transform_8(%arg0: i32) -> (i32, i32) {
    %c0_i32 = arith.constant 0 : i32
    %c0_i32_0 = arith.constant 0 : i32
    return %c0_i32, %arg0 : i32, i32
  }
}

</mosaic_0001>

<bundles_post_ra>
// kernel: tpu_custom_call.1
= control target key start
LH: loop header
LB: loop body
LE: loop exit
PB: predicated region body
PF: predicated region fallthrough
CT: control target
= control target key end

     0   :  { %s3601_s0 = inlined_call_operand.vmem [shape: f32[4,4,1], index: 0, kind: input, shape index: {}]   ;;  %s3602_s1 = inlined_call_operand.hbm [shape: f32[4,4,256], index: 1, kind: input, shape index: {}]   ;;  %s3603_s2 = inlined_call_operand.hbm [shape: f32[1,256], index: 2, kind: input, shape index: {}]   ;;  %s3604_s3 = inlined_call_operand.hbm [shape: f32[1,256], index: 3, kind: input, shape index: {}]   ;;  %s3605_s4 = inlined_call_operand.vmem [shape: f32[4,256], index: 4, kind: input, shape index: {}]   ;;  %s3606_s5 = inlined_call_operand.vmem [shape: f32[4,256], index: 5, kind: input, shape index: {}]   ;;  %s3607_s6 = inlined_call_operand.vmem [shape: f32[4,256], index: 6, kind: input, shape index: {}]   ;;  %s3608_s7 = inlined_call_operand.hbm [shape: f32[4,256], index: 7, kind: output, shape index: {0}]   ;;  %s3609_s8 = inlined_call_operand.hbm [shape: f32[1,256], index: 8, kind: output, shape index: {1}]  }
   0x1   :  { %3619 = sst [smem:[#allocation22_spill]] %s3602_s1 }
   0x2   :  { %3620 = sst [smem:[#allocation23_spill]] %s3603_s2 }
   0x3   :  { %3621 = sst [smem:[#allocation24_spill]] %s3609_s8 }
   0x4   :  { %14 = vsyncpa [#allocation3], 0 }
   0x5   :  { %16 = vsyncpa [#allocation3 + $0x1], 0 }
   0x6   :  { %17 = vsyncpa [#allocation6], 0 }
   0x7   :  { %19 = vsyncpa [#allocation6 + $0x1], 0 }
   0x8   :  { %20 = vsyncpa [#allocation4], 0 }
   0x9   :  { %22 = vsyncpa [#allocation4 + $0x1], 0 }
   0xa   :  { %23 = vsyncpa [#allocation10], 0 }
   0xb   :  { %25 = vsyncpa [#allocation10 + $0x1], 0  ;;  %s2687_s27 = smov 0   ;;  %s2689_s28 = smov 0  }
   0xc   :  { %s2691_s29 = smov 0   ;;  %s2693_s30 = smov 0  }
   0xd LB: > { %3622 = sst [smem:[#allocation15_spill]] %s2624_s27  ;;  %s2708_s9 = sadd.s32 4294967295, %s2636_s30   ;;  %s2636_s30 = sphi %s2693_s30, %s3641_s30   ;;  %s2632_s29 = sphi %s2691_s29, %s3643_s29   ;;  %s2628_s28 = sphi %s2689_s28, %s3645_s28   ;;  %s2624_s27 = sphi %s2687_s27, %s3644_s27  }
   0xe   : > { %3623 = sst [smem:[#allocation16_spill]] %s2632_s29  ;;  %s2304_s10 = sadd.s32 4294967294, %s2636_s30  }
   0xf   : > { %s2712_s11 = sadd.s32 1, %s2636_s30   ;;  %s59_s12 = sadd.s32 1, %s2632_s29 }
  0x10   : > { %3624 = sst [smem:[#allocation17_spill]] %s2712_s11  ;;  %s56_s13 = ssub.s32 %s2636_s30, %s2712_s11 }
  0x11   : > { %p66_p0 = scmp.ne.s32.totalorder %s2632_s29, %s2628_s28  ;;  %p57_p1 = scmp.eq.s32.totalorder %s56_s13, 0 }
  0x12   : > { %p67_p2 = scmp.eq.s32.totalorder %s2636_s30, 0  ;;  %p72_p3 = scmp.ne.s32.totalorder %s2628_s28, %s2624_s27 }
  0x13   : > { %p73_p4 = scmp.eq.s32.totalorder %s2708_s9, 0  ;;  %p226_p7 = scmp.eq.s32.totalorder %s2708_s9, 1 }
  0x14   : > { %s2724_s14 = scalar_select %p57_p1, %s2632_s29, %s59_s12  }
  0x15   : > { %p68_p5 = por %p67_p2, %p66_p0  ;;  %p2726_p6 = por %p73_p4, %p72_p3 }
  0x16   : > { %3625 = sst [smem:[#allocation18_spill]] %s2724_s14  ;;  %p232_p8 = scmp.eq.s32.totalorder %s2304_s10, 1 }
  0x17   : > { %p2306_p9 = scmp.ge.s32.totalorder %s2636_s30, 2  ;;  %p2346_p10 = scmp.lt.s32.totalorder %s2636_s30, 2 }
  0x18   : > { %p2733_p11 = por %p226_p7, %p66_p0  ;;  %p2737_p12 = por %p232_p8, %p72_p3 }
  0x19   : > { %s2742_s18 = sand.u32 1, %s2632_s29   ;;  %p2744_p13 = pnand %p2346_p10, %p68_p5 }
  0x1a   : > { %s3628_s17 = scalar_select %p2737_p12, 1, 0 }
  0x1b   : > { %s2307_s20 = sshll.u32 %s2742_s18, 4  ;;  %s302_s21 = sand.u32 1, %s2636_s30  }
  0x1c   : > { %3629 = sst [smem:[#allocation19_spill]] %s3628_s17  ;;  %s305_s26 = scalar_lea.vmem [#allocation5], %s2742_s18 }
  0x1d   : > { %s3631_s2 = sld [smem:[#allocation23_spill]]  ;;  %s312_s10 = sshll.u32 %s305_s26, 4  ;;  %s313_s10 = int_to_ptr.vmem [resolvable:$true] %s312_s10 }
  0x1e   : > { %s2755_s12 = scalar_lea.sflag [#allocation6], %s302_s21  ;;  %p2448_p1 = pneg %p2744_p13 }
  0x23   : > { %s308_s24 = scalar_lea.hbm %s3631_s2, %s2636_s30  ;;  %s2451_s23 = scalar_lea.hbm %s3631_s2, 2 }
  0x24   : > { %s310_s25 = sshll.u32 %s308_s24, 4  ;;  %s311_s25 = int_to_ptr.hbm [resolvable:$true] %s310_s25 }
  0x25   : > { %s2444_s13 = sshra.s32 %s311_s25, 4  ;;  %s2445_s13 = int_to_ptr.hbm [resolvable:$true] %s2444_s13 }
  0x26   : > { %s2446_s14 = scalar_lea.hbm %s2445_s13, 1  ;;  %p2452_p4 = scmp.lt.s32.totalorder %s2445_s13, %s3631_s2 }
  0x27   : > { %p2447_p0 = scmp.ne.s32.totalorder %s2445_s13, %s2446_s14  ;;  %p2453_p5 = scmp.lt.s32.totalorder %s2451_s23, %s2446_s14 }
  0x29   : > { %p2449_p2 = pnand %p2448_p1, %p2447_p0  ;;  %p2454_p7 = por %p2453_p5, %p2452_p4 }
  0x2b   : > { %p2450_p3 = pneg %p2449_p2 }
  0x2d   : > { %p2455_p8 = pnand %p2454_p7, %p2450_p3 }
  0x2f   : > { %2458 = shalt.err (!%p2455_p8)
}
  0x30   : > { %2335 = dma.hbm_to_vmem [thread:$0]  (!%p2744_p13), %s311_s25, 16, %s313_s10, %s2755_s12  }
  0x31   : > { %p2309_p10 = scmp.ge.s32.totalorder %s2636_s30, 1  ;;  %p355_p0 = scmp.lt.s32.totalorder %s2636_s30, 3 }
  0x32   : > { %s2308_s21 = sshll.u32 %s2636_s30, 2  ;;  %s3633_s1 = sld [smem:[#allocation22_spill]] }
  0x33   : > { %p2773_p2 = pnand %p2309_p10, %p355_p0  ;;  %s285_s23 = scalar_lea.vmem [#allocation2], %s2307_s20 }
  0x34   : > { %s292_s24 = sshll.u32 %s285_s23, 4  ;;  %s282_s2 = scalar_lea.sflag [#allocation3], %s2742_s18  ;;  %s293_s24 = int_to_ptr.vmem [resolvable:$true] %s292_s24 }
  0x38   : > { %s289_s22 = scalar_lea.hbm %s3633_s1, %s2308_s21  ;;  %s2481_s27 = scalar_lea.hbm %s3633_s1, 32 }
  0x39   : > { %s290_s26 = sshll.u32 %s289_s22, 4  ;;  %s291_s26 = int_to_ptr.hbm [resolvable:$true] %s290_s26 }
  0x3a   : > { %s2474_s11 = sshra.s32 %s291_s26, 4  ;;  %s2475_s11 = int_to_ptr.hbm [resolvable:$true] %s2474_s11 }
  0x3b   : > { %s2476_s25 = scalar_lea.hbm %s2475_s11, 16  ;;  %p2482_p7 = scmp.lt.s32.totalorder %s2475_s11, %s3633_s1 }
  0x3c   : > { %p2477_p3 = scmp.ne.s32.totalorder %s2475_s11, %s2476_s25  ;;  %p2483_p8 = scmp.lt.s32.totalorder %s2481_s27, %s2476_s25 }
  0x3e   : > { %p2479_p4 = pnand %p2477_p3, %p2448_p1  ;;  %p2484_p10 = por %p2483_p8, %p2482_p7 }
  0x40   : > { %p2480_p5 = pneg %p2479_p4 }
  0x42   : > { %p2485_p0 = pnand %p2484_p10, %p2480_p5 }
  0x44   : > { %2488 = shalt.err (!%p2485_p0)
}
  0x45   : > { %s2638_s20 = smov 128   ;;  %s2639_s13 = smov 64  }
  0x46   : > { %s2640_s22 = smov 4   ;;  %s325_s10 = scalar_lea.hbm %s3604_s3, %s2636_s30 }
  0x47   : > { %2332 = dma.hbm_to_vmem [thread:$0]  (!%p2744_p13), %s291_s26, 256, %s293_s24, %s282_s2, %s2638_s20, %s2639_s13, %s2640_s22  }
  0x48   : > { %s327_s8 = sshll.u32 %s325_s10, 4  ;;  %s322_s14 = scalar_lea.vmem [#allocation7], %s2742_s18  ;;  %s328_s8 = int_to_ptr.hbm [resolvable:$true] %s327_s8 }
  0x49   : > { %s329_s11 = sshll.u32 %s322_s14, 4  ;;  %s2504_s27 = sshra.s32 %s328_s8, 4  ;;  %s330_s11 = int_to_ptr.vmem [resolvable:$true] %s329_s11  ;;  %s2505_s27 = int_to_ptr.hbm [resolvable:$true] %s2504_s27 }
  0x4a   : > { %s2506_s25 = scalar_lea.hbm %s2505_s27, 1  ;;  %s2511_s2 = scalar_lea.hbm %s3604_s3, 2 }
  0x4b   : > { %p2507_p3 = scmp.ne.s32.totalorder %s2505_s27, %s2506_s25  ;;  %p2512_p7 = scmp.lt.s32.totalorder %s2505_s27, %s3604_s3 }
  0x4c   : > { %p2513_p8 = scmp.lt.s32.totalorder %s2511_s2, %s2506_s25 }
  0x4d   : > { %p2509_p4 = pnand %p2507_p3, %p2448_p1 }
  0x4e   : > { %p2514_p10 = por %p2513_p8, %p2512_p7 }
  0x4f   : > { %p2510_p5 = pneg %p2509_p4 }
  0x51   : > { %p2515_p0 = pnand %p2514_p10, %p2510_p5 }
  0x53   : > { %2518 = shalt.err (!%p2515_p0)
}
  0x54   : > { %2338 = dma.hbm_to_vmem [thread:$0]  (!%p2744_p13), %s328_s8, 16, %s330_s11, %s2755_s12  }
  0x55   : > { %359 = sbr.rel (%p2773_p2) target bundleno = 604 (0x25c), region = 48 }
  0x5a   : > { %s2813_s18 = sand.u32 1, %s2628_s28  }
  0x5b   : > { %s2310_s1 = sshll.u32 %s2813_s18, 4  ;;  %s362_s20 = scalar_lea.sflag [#allocation3], %s2813_s18 }
  0x5c   : > { %s2817_s13 = scalar_lea.vmem [#allocation2], %s2310_s1 }
  0x5d   : > { %2607 = dma.done.wait (%p2726_p6), %s362_s20, 256  }
  0x5e   : > { %2609 = vsyncadd (%p2726_p6), %s362_s20, 4294967040  ;;  %s371_s8 = sand.u32 1, %s2708_s9   ;;  %s374_s12 = scalar_lea.vmem [#allocation5], %s2813_s18 }
  0x5f   : > { %s372_s19 = scalar_lea.sflag [#allocation6], %s371_s8 }
  0x60   : > { %2611 = dma.done.wait (%p2726_p6), %s372_s19, 32  }
  0x61   : > { %2613 = vsyncadd (%p2726_p6), %s372_s19, 4294967264  ;;  %v2641_v0 = vmov 0   ;;  %v455_v1 = vld [vmem:[%s3601_s0 + $0x8] sm:$0xf]  ;;  %v453_v2 = vld [vmem:[%s3601_s0] sm:$0xf] }
  0x62   : > { %2385 = vset.pattern.permute.xlu1 %v2641_v0  ;;  %2384 = vset.pattern.permute.xlu0 %v2641_v0  ;;  %v456_v3 = vld [vmem:[%s3601_s0 + $0xc] sm:$0xf]  ;;  %v454_v4 = vld [vmem:[%s3601_s0 + $0x4] sm:$0xf]  ;;  %v461_v5 = vld [vmem:[%s374_s12] sm:$0x1] }
  0x63   : > { %483 = vperm.xlu1 %2385, %v455_v1   ;;  %473 = vperm.xlu0 %2384, %v453_v2   ;;  %v463_v6 = vmul.f32 0.00390625, %v461_v5  ;;  %v2842_v8 = vld [vmem:[%s2817_s13] sm:$0xf]  ;;  %v2845_v9 = vld [vmem:[%s2817_s13 + $0x8] sm:$0xf]  ;;  %s383_s27 = scalar_lea.vmem [#allocation7], %s2813_s18 }
  0x64   : > { %v2854_v12 = vld [vmem:[%s2817_s13 + $0x4] sm:$0xf]  ;;  %v2868_v22 = vld [vmem:[%s2817_s13 + $0xc] sm:$0xf]  ;;  %p441_p6 = scmp.lt.s32.totalorder %s2708_s9, 1  ;;  %vm1175_vm0 = vcmask 1043456  }
  0x65   : > { %v465_v7 = vperm.slane %v463_v6, 0  ;;  %s2316_s29 = sshll.u32 %s2708_s9, 2  ;;  %s2311_s22 = sshll.u32 %s2813_s18, 2  ;;  %vm2038_vm1 = vcmask 1041409   ;;  %vm2040_vm2 = vcmask 1042434   ;;  %vm2042_vm3 = vcmask 1043459  }
  0x66   : > { %s442_s25 = scalar_select %p441_p6, %s2708_s9, 1  ;;  %vm2059_vm4 = vcmask 1040384  }
  0x67   : > { %v2848_v10 = vmul.f32 %v465_v7, %v2842_v8  ;;  %v2851_v11 = vmul.f32 %v465_v7, %v2845_v9  ;;  %v2857_v13 = vmul.f32 %v465_v7, %v2854_v12  ;;  %v2873_v25 = vmul.f32 %v465_v7, %v2868_v22  ;;  %s2117_s10 = scalar_lea.hbm %s3608_s7, %s2316_s29  ;;  %s434_s14 = scalar_lea.vmem [#allocation8], %s2311_s22 }
  0x68   : > { %s3411_s21 = sshll.u32 %s442_s25, 2  ;;  %s2119_s15 = sshll.u32 %s434_s14, 4  ;;  %s2120_s15 = int_to_ptr.vmem [resolvable:$true] %s2119_s15 }
  0x69   : > { %v495_v14 = vperm.slane %v2848_v10, 0  ;;  %v497_v15 = vperm.slane %v2851_v11, 0  ;;  %v503_v16 = vperm.slane %v2848_v10, 1  ;;  %v505_v17 = vperm.slane %v2851_v11, 1  ;;  %s444_s26 = scalar_lea.vmem %s3605_s4, %s3411_s21  ;;  %s448_s13 = scalar_lea.vmem %s3606_s5, %s3411_s21 }
  0x6a   : > { %v515_v21 = vperm.slane %v2848_v10, 2  ;;  %v517_v24 = vperm.slane %v2851_v11, 2  ;;  %v527_v28 = vperm.slane %v2848_v10, 3  ;;  %v529_v31 = vperm.slane %v2851_v11, 3  ;;  %s452_s12 = scalar_lea.vmem %s3607_s6, %s3411_s21  ;;  %s2121_s11 = sshll.u32 %s2117_s10, 4  ;;  %s2122_s11 = int_to_ptr.hbm [resolvable:$true] %s2121_s11 }
  0x6b   : > { %488 = vperm.xlu1 %2385, %v456_v3   ;;  %478 = vperm.xlu0 %2384, %v454_v4   ;;  %v499_v18 = vmul.f32 %v495_v14, %v2848_v10  ;;  %v501_v19 = vmul.f32 %v497_v15, %v2848_v10  ;;  %v507_v20 = vmul.f32 %v503_v16, %v2857_v13  ;;  %v496_v36 = vperm.slane %v2857_v13, 0  ;;  %s2548_s25 = sshra.s32 %s2122_s11, 4  ;;  %s2549_s25 = int_to_ptr.hbm [resolvable:$true] %s2548_s25 }
  0x6c   : > { %v509_v23 = vmul.f32 %v505_v17, %v2857_v13  ;;  %v519_v27 = vmul.f32 %v515_v21, %v2851_v11  ;;  %v521_v30 = vmul.f32 %v517_v24, %v2851_v11  ;;  %v531_v33 = vmul.f32 %v527_v28, %v2873_v25  ;;  %s2550_s21 = scalar_lea.hbm %s2549_s25, 4  ;;  %p2555_p3 = scmp.lt.s32.totalorder %s2549_s25, %s3608_s7 }
  0x6d   : > { %v511_v26 = vadd.f32 %v507_v20, %v499_v18  ;;  %v533_v35 = vmul.f32 %v529_v31, %v2873_v25  ;;  %v498_v37 = vperm.slane %v2873_v25, 0  ;;  %v504_v38 = vperm.slane %v2857_v13, 1  ;;  %p2551_p13 = scmp.ne.s32.totalorder %s2549_s25, %s2550_s21 }
  0x6e   : > { %v513_v29 = vadd.f32 %v509_v23, %v501_v19  ;;  %v506_v39 = vperm.slane %v2873_v25, 1  ;;  %v500_v42 = vmul.f32 %v496_v36, %v2848_v10  ;;  %v516_v46 = vperm.slane %v2857_v13, 2 }
  0x6f   : > { %v523_v32 = vadd.f32 %v519_v27, %v511_v26  ;;  %v502_v43 = vmul.f32 %v498_v37, %v2848_v10  ;;  %v508_v44 = vmul.f32 %v504_v38, %v2857_v13  ;;  %v518_v47 = vperm.slane %v2873_v25, 2  ;;  %p2552_p1 = pnand %p2551_p13, %p2733_p11 }
  0x70   : > { %v525_v34 = vadd.f32 %v521_v30, %v513_v29  ;;  %v510_v45 = vmul.f32 %v506_v39, %v2857_v13  ;;  %v528_v52 = vperm.slane %v2857_v13, 3  ;;  %v530_v53 = vperm.slane %v2873_v25, 3 }
  0x71   : > { %v535_v40 = vadd.f32 %v531_v33, %v523_v32  ;;  %v512_v50 = vadd.f32 %v508_v44, %v500_v42  ;;  %v520_v54 = vmul.f32 %v516_v46, %v2851_v11  ;;  %v522_v55 = vmul.f32 %v518_v47, %v2851_v11  ;;  %p2553_p2 = pneg %p2552_p1 }
  0x72   : > { %v537_v41 = vadd.f32 %v533_v35, %v525_v34  ;;  %v514_v51 = vadd.f32 %v510_v45, %v502_v43  ;;  %v532_v58 = vmul.f32 %v528_v52, %v2873_v25  ;;  %v534_v59 = vmul.f32 %v530_v53, %v2873_v25 }
  0x73   : > { %v2891_v48 = vmul.f32 0.5, %v535_v40  ;;  %v524_v62 = vadd.f32 %v520_v54, %v512_v50 }
  0x74   : > { %v2893_v49 = vmul.f32 0.5, %v537_v41  ;;  %v526_v63 = vadd.f32 %v522_v55, %v514_v51 }
  0x75   : > { %v547_v56 = vperm.slane %v2891_v48, 0  ;;  %v555_v60 = vperm.slane %v2891_v48, 1  ;;  %v567_v4 = vperm.slane %v2891_v48, 2  ;;  %v536_v6 = vadd.f32 %v532_v58, %v524_v62 }
  0x76   : > { %v549_v57 = vperm.slane %v2893_v49, 0  ;;  %v557_v61 = vperm.slane %v2893_v49, 1  ;;  %v569_v5 = vperm.slane %v2893_v49, 2  ;;  %v538_v7 = vadd.f32 %v534_v59, %v526_v63 }
  0x77   : > { %v551_v0 = vmul.f32 %v547_v56, %v2848_v10  ;;  %v559_v2 = vmul.f32 %v555_v60, %v2857_v13  ;;  %v579_v14 = vperm.slane %v2891_v48, 3  ;;  %v581_v15 = vperm.slane %v2893_v49, 3 }
  0x78   : > { %v553_v1 = vmul.f32 %v549_v57, %v2848_v10  ;;  %v561_v3 = vmul.f32 %v557_v61, %v2857_v13  ;;  %v571_v18 = vmul.f32 %v567_v4, %v2851_v11  ;;  %v573_v19 = vmul.f32 %v569_v5, %v2851_v11 }
  0x79   : > { %v563_v16 = vadd.f32 %v559_v2, %v551_v0  ;;  %v2915_v20 = vmul.f32 0.5, %v536_v6  ;;  %v2917_v21 = vmul.f32 0.5, %v538_v7  ;;  %v583_v23 = vmul.f32 %v579_v14, %v2873_v25 }
  0x7a   : > { %v565_v17 = vadd.f32 %v561_v3, %v553_v1  ;;  %v585_v24 = vmul.f32 %v581_v15, %v2873_v25 }
  0x7b   : > { %v575_v26 = vadd.f32 %v571_v18, %v563_v16  ;;  %v548_v28 = vperm.slane %v2915_v20, 0  ;;  %v550_v29 = vperm.slane %v2917_v21, 0  ;;  %v556_v30 = vperm.slane %v2915_v20, 1 }
  0x7c   : > { %v577_v27 = vadd.f32 %v573_v19, %v565_v17  ;;  %v558_v31 = vperm.slane %v2917_v21, 1  ;;  %v568_v32 = vperm.slane %v2915_v20, 2  ;;  %v570_v33 = vperm.slane %v2917_v21, 2 }
  0x7d   : > { %v587_v34 = vadd.f32 %v583_v23, %v575_v26  ;;  %v552_v36 = vmul.f32 %v548_v28, %v2848_v10  ;;  %v554_v37 = vmul.f32 %v550_v29, %v2848_v10  ;;  %v560_v38 = vmul.f32 %v556_v30, %v2857_v13 }
  0x7e   : > { %v589_v35 = vadd.f32 %v585_v24, %v577_v27  ;;  %v562_v39 = vmul.f32 %v558_v31, %v2857_v13  ;;  %v572_v40 = vmul.f32 %v568_v32, %v2851_v11  ;;  %v574_v41 = vmul.f32 %v570_v33, %v2851_v11  ;;  %v1256_v32 = vld [vmem:[%s383_s27] sm:$0x1]  ;;  %s2103_s27 = scalar_lea.sflag [#allocation4], %s2813_s18 }
  0x7f   : > { %v580_v42 = vperm.slane %v2915_v20, 3  ;;  %v582_v43 = vperm.slane %v2917_v21, 3  ;;  %v564_v44 = vadd.f32 %v560_v38, %v552_v36  ;;  %v2935_v46 = vmul.f32 0.33333334, %v587_v34 }
  0x80   : > { %v566_v45 = vadd.f32 %v562_v39, %v554_v37  ;;  %v2937_v47 = vmul.f32 0.33333334, %v589_v35 }
  0x81   : > { %v584_v50 = vmul.f32 %v580_v42, %v2873_v25  ;;  %v586_v51 = vmul.f32 %v582_v43, %v2873_v25  ;;  %v576_v52 = vadd.f32 %v572_v40, %v564_v44  ;;  %v599_v54 = vperm.slane %v2935_v46, 0 }
  0x82   : > { %v578_v53 = vadd.f32 %v574_v41, %v566_v45  ;;  %v601_v55 = vperm.slane %v2937_v47, 0  ;;  %v607_v56 = vperm.slane %v2935_v46, 1  ;;  %v609_v57 = vperm.slane %v2937_v47, 1 }
  0x83   : > { %v619_v58 = vperm.slane %v2935_v46, 2  ;;  %v621_v59 = vperm.slane %v2937_v47, 2  ;;  %v588_v60 = vadd.f32 %v584_v50, %v576_v52  ;;  %v603_v62 = vmul.f32 %v599_v54, %v2848_v10 }
  0x84   : > { %v590_v61 = vadd.f32 %v586_v51, %v578_v53  ;;  %v605_v63 = vmul.f32 %v601_v55, %v2848_v10  ;;  %v611_v0 = vmul.f32 %v607_v56, %v2857_v13  ;;  %v613_v1 = vmul.f32 %v609_v57, %v2857_v13 }
  0x85   : > { %v623_v2 = vmul.f32 %v619_v58, %v2851_v11  ;;  %v625_v3 = vmul.f32 %v621_v59, %v2851_v11  ;;  %v2953_v4 = vmul.f32 0.33333334, %v588_v60  ;;  %v631_v14 = vperm.slane %v2935_v46, 3 }
  0x86   : > { %v2955_v5 = vmul.f32 0.33333334, %v590_v61  ;;  %v615_v6 = vadd.f32 %v611_v0, %v603_v62  ;;  %v617_v7 = vadd.f32 %v613_v1, %v605_v63  ;;  %v633_v15 = vperm.slane %v2937_v47, 3 }
  0x87   : > { %v600_v16 = vperm.slane %v2953_v4, 0  ;;  %v608_v18 = vperm.slane %v2953_v4, 1  ;;  %v620_v23 = vperm.slane %v2953_v4, 2  ;;  %v632_v35 = vperm.slane %v2953_v4, 3 }
  0x88   : > { %v602_v17 = vperm.slane %v2955_v5, 0  ;;  %v610_v19 = vperm.slane %v2955_v5, 1  ;;  %v622_v24 = vperm.slane %v2955_v5, 2  ;;  %v627_v26 = vadd.f32 %v623_v2, %v615_v6 }
  0x89   : > { %v629_v27 = vadd.f32 %v625_v3, %v617_v7  ;;  %v604_v28 = vmul.f32 %v600_v16, %v2848_v10  ;;  %v612_v30 = vmul.f32 %v608_v18, %v2857_v13  ;;  %v624_v33 = vmul.f32 %v620_v23, %v2851_v11 }
  0x8a   : > { %v606_v29 = vmul.f32 %v602_v17, %v2848_v10  ;;  %v614_v31 = vmul.f32 %v610_v19, %v2857_v13  ;;  %v626_v34 = vmul.f32 %v622_v24, %v2851_v11  ;;  %v634_v36 = vperm.slane %v2955_v5, 3 }
  0x8b   : > { %v616_v37 = vadd.f32 %v612_v30, %v604_v28  ;;  %v635_v39 = vmul.f32 %v631_v14, %v2873_v25  ;;  %v637_v40 = vmul.f32 %v633_v15, %v2873_v25  ;;  %v636_v41 = vmul.f32 %v632_v35, %v2873_v25 }
  0x8c   : > { %v618_v38 = vadd.f32 %v614_v31, %v606_v29  ;;  %v638_v42 = vmul.f32 %v634_v36, %v2873_v25  ;;  %v1258_v43 = vmul.f32 0.00390625, %v1256_v32 }
  0x8d   : > { %v628_v44 = vadd.f32 %v624_v33, %v616_v37  ;;  %v639_v50 = vadd.f32 %v635_v39, %v627_v26  ;;  %v641_v51 = vadd.f32 %v637_v40, %v629_v27 }
  0x8e   : > { %v630_v45 = vadd.f32 %v626_v34, %v618_v38  ;;  %v2982_v56 = vperm.slane %v1258_v43, 0 }
  0x8f   : > { %v640_v52 = vadd.f32 %v636_v41, %v628_v44  ;;  %v2978_v54 = vmul.f32 0.25, %v639_v50  ;;  %v2980_v55 = vmul.f32 0.25, %v641_v51 }
  0x90   : > { %v642_v53 = vadd.f32 %v638_v42, %v630_v45  ;;  %v3022_v51 = vmul.f32 %v2982_v56, %v2842_v8 }
  0x91   : > { %v2984_v57 = vmul.f32 0.25, %v640_v52  ;;  %v651_v59 = vperm.slane %v2978_v54, 0  ;;  %v653_v60 = vperm.slane %v2980_v55, 0  ;;  %v659_v61 = vperm.slane %v2978_v54, 1 }
  0x92   : > { %v2986_v58 = vmul.f32 0.25, %v642_v53  ;;  %v661_v62 = vperm.slane %v2980_v55, 1  ;;  %v671_v63 = vperm.slane %v2978_v54, 2  ;;  %v673_v0 = vperm.slane %v2980_v55, 2 }
  0x93   : > { %v652_v1 = vperm.slane %v2984_v57, 0  ;;  %v655_v3 = vmul.f32 %v651_v59, %v2848_v10  ;;  %v657_v6 = vmul.f32 %v653_v60, %v2848_v10  ;;  %v660_v7 = vperm.slane %v2984_v57, 1 }
  0x94   : > { %v654_v2 = vperm.slane %v2986_v58, 0  ;;  %v662_v14 = vperm.slane %v2986_v58, 1  ;;  %v663_v15 = vmul.f32 %v659_v61, %v2857_v13  ;;  %v665_v16 = vmul.f32 %v661_v62, %v2857_v13 }
  0x95   : > { %v656_v17 = vmul.f32 %v652_v1, %v2848_v10  ;;  %v672_v19 = vperm.slane %v2984_v57, 2  ;;  %v674_v23 = vperm.slane %v2986_v58, 2  ;;  %v664_v24 = vmul.f32 %v660_v7, %v2857_v13 }
  0x96   : > { %v658_v18 = vmul.f32 %v654_v2, %v2848_v10  ;;  %v666_v26 = vmul.f32 %v662_v14, %v2857_v13  ;;  %v667_v27 = vadd.f32 %v663_v15, %v655_v3  ;;  %v669_v28 = vadd.f32 %v665_v16, %v657_v6 }
  0x97   : > { %v675_v29 = vmul.f32 %v671_v63, %v2851_v11  ;;  %v676_v30 = vmul.f32 %v672_v19, %v2851_v11  ;;  %v677_v31 = vmul.f32 %v673_v0, %v2851_v11  ;;  %v678_v32 = vmul.f32 %v674_v23, %v2851_v11 }
  0x98   : > { %v668_v33 = vadd.f32 %v664_v24, %v656_v17  ;;  %v670_v34 = vadd.f32 %v666_v26, %v658_v18  ;;  %v683_v35 = vperm.slane %v2978_v54, 3  ;;  %v684_v36 = vperm.slane %v2984_v57, 3 }
  0x99   : > { %v679_v37 = vadd.f32 %v675_v29, %v667_v27  ;;  %v681_v38 = vadd.f32 %v677_v31, %v669_v28  ;;  %v685_v39 = vperm.slane %v2980_v55, 3  ;;  %v686_v40 = vperm.slane %v2986_v58, 3 }
  0x9a   : > { %v680_v41 = vadd.f32 %v676_v30, %v668_v33  ;;  %v682_v42 = vadd.f32 %v678_v32, %v670_v34  ;;  %v687_v43 = vmul.f32 %v683_v35, %v2873_v25  ;;  %v688_v44 = vmul.f32 %v684_v36, %v2873_v25 }
  0x9b   : > { %v689_v45 = vmul.f32 %v685_v39, %v2873_v25  ;;  %v690_v50 = vmul.f32 %v686_v40, %v2873_v25  ;;  %v3026_v61 = vmul.f32 %v2982_v56, %v2854_v12  ;;  %v3034_v0 = vmul.f32 %v2982_v56, %v2845_v9 }
  0x9c   : > { %v691_v52 = vadd.f32 %v687_v43, %v679_v37  ;;  %v692_v53 = vadd.f32 %v688_v44, %v680_v41  ;;  %v1270_v2 = vperm.slane %v3022_v51, 0 }
  0x9d   : > { %v693_v59 = vadd.f32 %v689_v45, %v681_v38  ;;  %v694_v60 = vadd.f32 %v690_v50, %v682_v42  ;;  %3634 = vst [vmem:[#allocation20_spill] sm:$0xff] %v3034_v0  ;;  %v1271_v3 = vperm.slane %v3026_v61, 0 }
  0x9e   : > { %v3028_v62 = vmul.f32 0.2, %v691_v52  ;;  %v3030_v63 = vmul.f32 0.2, %v692_v53 }
  0x9f   : > { %v3036_v1 = vmul.f32 0.2, %v693_v59  ;;  %v3038_v8 = vmul.f32 0.2, %v694_v60 }
  0xa0   : > { %v703_v6 = vperm.slane %v3028_v62, 0  ;;  %v704_v12 = vperm.slane %v3030_v63, 0  ;;  %v711_v7 = vperm.slane %v3028_v62, 1  ;;  %v712_v14 = vperm.slane %v3030_v63, 1 }
  0xa1   : > { %v705_v15 = vperm.slane %v3036_v1, 0  ;;  %v706_v9 = vperm.slane %v3038_v8, 0  ;;  %v713_v16 = vperm.slane %v3036_v1, 1  ;;  %v714_v17 = vperm.slane %v3038_v8, 1 }
  0xa2   : > { %v707_v18 = vmul.f32 %v703_v6, %v2848_v10  ;;  %v708_v19 = vmul.f32 %v704_v12, %v2848_v10  ;;  %v715_v23 = vmul.f32 %v711_v7, %v2857_v13  ;;  %v716_v24 = vmul.f32 %v712_v14, %v2857_v13 }
  0xa3   : > { %v709_v26 = vmul.f32 %v705_v15, %v2848_v10  ;;  %v710_v27 = vmul.f32 %v706_v9, %v2848_v10  ;;  %v717_v28 = vmul.f32 %v713_v16, %v2857_v13  ;;  %v718_v29 = vmul.f32 %v714_v17, %v2857_v13 }
  0xa4   : > { %v719_v30 = vadd.f32 %v715_v23, %v707_v18  ;;  %v720_v31 = vadd.f32 %v716_v24, %v708_v19  ;;  %v723_v32 = vperm.slane %v3028_v62, 2  ;;  %v724_v33 = vperm.slane %v3030_v63, 2 }
  0xa5   : > { %v721_v34 = vadd.f32 %v717_v28, %v709_v26  ;;  %v722_v35 = vadd.f32 %v718_v29, %v710_v27  ;;  %v725_v36 = vperm.slane %v3036_v1, 2  ;;  %v726_v37 = vperm.slane %v3038_v8, 2 }
  0xa6   : > { %v727_v38 = vmul.f32 %v723_v32, %v2851_v11  ;;  %v728_v39 = vmul.f32 %v724_v33, %v2851_v11  ;;  %v735_v40 = vperm.slane %v3028_v62, 3  ;;  %v736_v41 = vperm.slane %v3030_v63, 3 }
  0xa7   : > { %v729_v42 = vmul.f32 %v725_v36, %v2851_v11  ;;  %v730_v43 = vmul.f32 %v726_v37, %v2851_v11  ;;  %v737_v44 = vperm.slane %v3036_v1, 3  ;;  %v738_v45 = vperm.slane %v3038_v8, 3 }
  0xa8   : > { %v731_v50 = vadd.f32 %v727_v38, %v719_v30  ;;  %v732_v52 = vadd.f32 %v728_v39, %v720_v31  ;;  %v739_v53 = vmul.f32 %v735_v40, %v2873_v25  ;;  %v740_v59 = vmul.f32 %v736_v41, %v2873_v25 }
  0xa9   : > { %v733_v60 = vadd.f32 %v729_v42, %v721_v34  ;;  %v734_v6 = vadd.f32 %v730_v43, %v722_v35  ;;  %v741_v12 = vmul.f32 %v737_v44, %v2873_v25  ;;  %v742_v7 = vmul.f32 %v738_v45, %v2873_v25 }
  0xaa   : > { %v743_v14 = vadd.f32 %v739_v53, %v731_v50  ;;  %v744_v15 = vadd.f32 %v740_v59, %v732_v52  ;;  %v3076_v9 = vmul.f32 %v2982_v56, %v2868_v22  ;;  %v1272_v23 = vperm.slane %v3034_v0, 0 }
  0xab   : > { %v745_v16 = vadd.f32 %v741_v12, %v733_v60  ;;  %v746_v17 = vadd.f32 %v742_v7, %v734_v6  ;;  %v1274_v28 = vmul.f32 %v1270_v2, %v3022_v51  ;;  %v1275_v29 = vmul.f32 %v1271_v3, %v3022_v51 }
  0xac   : > { %v3078_v18 = vmul.f32 0.16666667, %v743_v14  ;;  %v3080_v19 = vmul.f32 0.16666667, %v744_v15  ;;  %v1273_v24 = vperm.slane %v3076_v9, 0  ;;  %v1278_v22 = vperm.slane %v3022_v51, 1 }
  0xad   : > { %v3084_v26 = vmul.f32 0.16666667, %v745_v16  ;;  %v3086_v27 = vmul.f32 0.16666667, %v746_v17  ;;  %v1279_v56 = vperm.slane %v3026_v61, 1  ;;  %v1280_v30 = vperm.slane %v3034_v0, 1 }
  0xae   : > { %v1281_v31 = vperm.slane %v3076_v9, 1  ;;  %v755_v2 = vperm.slane %v3078_v18, 0  ;;  %v756_v3 = vperm.slane %v3080_v19, 0  ;;  %v763_v36 = vperm.slane %v3078_v18, 1 }
  0xaf   : > { %3635 = vst [vmem:[#allocation21_spill] sm:$0xff] %v3086_v27  ;;  %v757_v32 = vperm.slane %v3084_v26, 0  ;;  %v758_v33 = vperm.slane %v3086_v27, 0  ;;  %v765_v34 = vperm.slane %v3084_v26, 1  ;;  %v766_v35 = vperm.slane %v3086_v27, 1 }
  0xb0   : > { %v764_v37 = vperm.slane %v3080_v19, 1  ;;  %v1276_v42 = vmul.f32 %v1272_v23, %v3022_v51  ;;  %v1277_v43 = vmul.f32 %v1273_v24, %v3022_v51  ;;  %v1282_v44 = vmul.f32 %v1278_v22, %v3026_v61 }
  0xb1   : > { %v761_v38 = vmul.f32 %v757_v32, %v2848_v10  ;;  %v762_v39 = vmul.f32 %v758_v33, %v2848_v10  ;;  %v769_v40 = vmul.f32 %v765_v34, %v2857_v13  ;;  %v770_v41 = vmul.f32 %v766_v35, %v2857_v13 }
  0xb2   : > { %v1283_v45 = vmul.f32 %v1279_v56, %v3026_v61  ;;  %v1284_v53 = vmul.f32 %v1280_v30, %v3026_v61  ;;  %v1285_v59 = vmul.f32 %v1281_v31, %v3026_v61  ;;  %v759_v60 = vmul.f32 %v755_v2, %v2848_v10 }
  0xb3   : > { %v773_v50 = vadd.f32 %v769_v40, %v761_v38  ;;  %v774_v52 = vadd.f32 %v770_v41, %v762_v39  ;;  %v760_v6 = vmul.f32 %v756_v3, %v2848_v10  ;;  %v1290_v12 = vperm.slane %v3022_v51, 2 }
  0xb4   : > { %v1291_v7 = vperm.slane %v3026_v61, 2  ;;  %v767_v14 = vmul.f32 %v763_v36, %v2857_v13  ;;  %v768_v15 = vmul.f32 %v764_v37, %v2857_v13  ;;  %v775_v16 = vperm.slane %v3078_v18, 2 }
  0xb5   : > { %v776_v17 = vperm.slane %v3080_v19, 2  ;;  %v777_v23 = vperm.slane %v3084_v26, 2  ;;  %v778_v24 = vperm.slane %v3086_v27, 2  ;;  %v1286_v22 = vadd.f32 %v1282_v44, %v1274_v28 }
  0xb6   : > { %v1287_v56 = vadd.f32 %v1283_v45, %v1275_v29  ;;  %v1292_v30 = vperm.slane %v3034_v0, 2  ;;  %v1293_v31 = vperm.slane %v3076_v9, 2  ;;  %v1288_v32 = vadd.f32 %v1284_v53, %v1276_v42 }
  0xb7   : > { %v1289_v33 = vadd.f32 %v1285_v59, %v1277_v43  ;;  %v1294_v34 = vmul.f32 %v1290_v12, %v3034_v0  ;;  %v1295_v35 = vmul.f32 %v1291_v7, %v3034_v0  ;;  %v771_v2 = vadd.f32 %v767_v14, %v759_v60 }
  0xb8   : > { %v772_v3 = vadd.f32 %v768_v15, %v760_v6  ;;  %v779_v36 = vmul.f32 %v775_v16, %v2851_v11  ;;  %v780_v37 = vmul.f32 %v776_v17, %v2851_v11  ;;  %v781_v38 = vmul.f32 %v777_v23, %v2851_v11 }
  0xb9   : > { %v782_v28 = vmul.f32 %v778_v24, %v2851_v11  ;;  %v787_v29 = vperm.slane %v3078_v18, 3  ;;  %v788_v39 = vperm.slane %v3080_v19, 3  ;;  %v1296_v40 = vmul.f32 %v1292_v30, %v3034_v0 }
  0xba   : > { %v1297_v41 = vmul.f32 %v1293_v31, %v3034_v0  ;;  %v1302_v42 = vperm.slane %v3022_v51, 3  ;;  %v1303_v43 = vperm.slane %v3026_v61, 3  ;;  %v789_v44 = vperm.slane %v3084_v26, 3 }
  0xbb   : > { %v790_v45 = vperm.slane %v3086_v27, 3  ;;  %v1304_v53 = vperm.slane %v3034_v0, 3  ;;  %v1305_v59 = vperm.slane %v3076_v9, 3  ;;  %v1298_v60 = vadd.f32 %v1294_v34, %v1286_v22 }
  0xbc   : > { %v1299_v6 = vadd.f32 %v1295_v35, %v1287_v56  ;;  %v1306_v12 = vmul.f32 %v1302_v42, %v3076_v9  ;;  %v1307_v7 = vmul.f32 %v1303_v43, %v3076_v9  ;;  %v783_v14 = vadd.f32 %v779_v36, %v771_v2 }
  0xbd   : > { %v784_v15 = vadd.f32 %v780_v37, %v772_v3  ;;  %v791_v16 = vmul.f32 %v787_v29, %v2873_v25  ;;  %v792_v17 = vmul.f32 %v788_v39, %v2873_v25  ;;  %v1300_v23 = vadd.f32 %v1296_v40, %v1288_v32 }
  0xbe   : > { %v1301_v24 = vadd.f32 %v1297_v41, %v1289_v33  ;;  %v1308_v30 = vmul.f32 %v1304_v53, %v3076_v9  ;;  %v1309_v31 = vmul.f32 %v1305_v59, %v3076_v9  ;;  %v785_v0 = vadd.f32 %v781_v38, %v773_v50 }
  0xbf   : > { %v786_v27 = vadd.f32 %v782_v28, %v774_v52  ;;  %v793_v22 = vmul.f32 %v789_v44, %v2873_v25  ;;  %v794_v56 = vmul.f32 %v790_v45, %v2873_v25  ;;  %v1310_v2 = vadd.f32 %v1306_v12, %v1298_v60 }
  0xc0   : > { %v1311_v3 = vadd.f32 %v1307_v7, %v1299_v6  ;;  %v795_v36 = vadd.f32 %v791_v16, %v783_v14  ;;  %v796_v37 = vadd.f32 %v792_v17, %v784_v15  ;;  %v1312_v50 = vadd.f32 %v1308_v30, %v1300_v23 }
  0xc1   : > { %v1313_v52 = vadd.f32 %v1309_v31, %v1301_v24  ;;  %v797_v29 = vadd.f32 %v793_v22, %v785_v0  ;;  %v798_v39 = vadd.f32 %v794_v56, %v786_v27  ;;  %v3158_v40 = vmul.f32 0.5, %v1310_v2 }
  0xc2   : > { %v3160_v41 = vmul.f32 0.5, %v1311_v3  ;;  %v799_v43 = vmul.f32 0.14285715, %v795_v36  ;;  %v3164_v44 = vmul.f32 0.5, %v1312_v50 }
  0xc3   : > { %v3166_v45 = vmul.f32 0.5, %v1313_v52  ;;  %v801_v0 = vmul.f32 0.14285715, %v797_v29  ;;  %v802_v27 = vmul.f32 0.14285715, %v798_v39  ;;  %v1330_v60 = vperm.slane %v3158_v40, 1 }
  0xc4   : > { %v1331_v6 = vperm.slane %v3160_v41, 1  ;;  %v1324_v14 = vperm.slane %v3164_v44, 0  ;;  %v1332_v16 = vperm.slane %v3164_v44, 1  ;;  %v1342_v36 = vperm.slane %v3158_v40, 2 }
  0xc5   : > { %v1325_v15 = vperm.slane %v3166_v45, 0  ;;  %v1333_v17 = vperm.slane %v3166_v45, 1  ;;  %v1334_v30 = vmul.f32 %v1330_v60, %v3026_v61  ;;  %v1344_v50 = vperm.slane %v3164_v44, 2 }
  0xc6   : > { %v1335_v31 = vmul.f32 %v1331_v6, %v3026_v61  ;;  %v1345_v52 = vperm.slane %v3166_v45, 2 }
  0xc7   : > { %v1337_v3 = vmul.f32 %v1333_v17, %v3026_v61 }
  0xd5   : > { %v3148_v34 = vpop.permute.xlu1 %483  ;;  %v3150_v35 = vpop.permute.xlu0 %473 }
  0xd6   : > { %v491_v32 = vadd.f32 %v3150_v35, %v2848_v10  ;;  %v493_v33 = vadd.f32 %v3148_v34, %v2851_v11  ;;  %v800_v11 = vmul.f32 0.14285715, %v796_v37 }
  0xd8   : > { %v543_v38 = vadd.f32 %v2891_v48, %v491_v32  ;;  %v545_v28 = vadd.f32 %v2893_v49, %v493_v33 }
  0xda   : > { %v595_v42 = vadd.f32 %v2935_v46, %v543_v38  ;;  %v597_v10 = vadd.f32 %v2937_v47, %v545_v28  ;;  %v1322_v46 = vperm.slane %v3158_v40, 0  ;;  %v1323_v47 = vperm.slane %v3160_v41, 0 }
  0xdc   : > { %v647_v48 = vadd.f32 %v2978_v54, %v595_v42  ;;  %v649_v49 = vadd.f32 %v2980_v55, %v597_v10 }
  0xdd   : > { %v3170_v53 = vpop.permute.xlu1 %488  ;;  %v3172_v59 = vpop.permute.xlu0 %478 }
  0xde   : > { %v492_v12 = vadd.f32 %v3172_v59, %v2857_v13  ;;  %v494_v54 = vadd.f32 %v3170_v53, %v2873_v25  ;;  %v699_v55 = vadd.f32 %v3028_v62, %v647_v48  ;;  %v701_v7 = vadd.f32 %v3036_v1, %v649_v49  ;;  %v3636_v48 = vld [vmem:[#allocation21_spill] sm:$0xff] }
  0xdf   : > { %v1326_v62 = vmul.f32 %v1322_v46, %v3022_v51  ;;  %v1327_v1 = vmul.f32 %v1323_v47, %v3022_v51 }
  0xe0   : > { %v544_v23 = vadd.f32 %v2915_v20, %v492_v12  ;;  %v546_v24 = vadd.f32 %v2917_v21, %v494_v54  ;;  %v751_v13 = vadd.f32 %v3078_v18, %v699_v55  ;;  %v753_v25 = vadd.f32 %v3084_v26, %v701_v7 }
  0xe1   : > { %v1328_v21 = vmul.f32 %v1324_v14, %v3022_v51  ;;  %v1329_v18 = vmul.f32 %v1325_v15, %v3022_v51  ;;  %v1336_v26 = vmul.f32 %v1332_v16, %v3026_v61  ;;  %v1338_v37 = vadd.f32 %v1334_v30, %v1326_v62 }
  0xe2   : > { %v596_v22 = vadd.f32 %v2953_v4, %v544_v23  ;;  %v598_v56 = vadd.f32 %v2955_v5, %v546_v24  ;;  %v803_v2 = vadd.f32 %v799_v43, %v751_v13  ;;  %v805_v20 = vadd.f32 %v801_v0, %v753_v25  ;;  %v3637_v0 = vld [vmem:[#allocation20_spill] sm:$0xff] }
  0xe3   : > { %v1343_v4 = vperm.slane %v3160_v41, 2  ;;  %v1339_v5 = vadd.f32 %v1335_v31, %v1327_v1  ;;  %v1340_v10 = vadd.f32 %v1336_v26, %v1328_v21  ;;  %v1346_v46 = vmul.f32 %v1342_v36, %v3637_v0 }
  0xe4   : > { %v648_v32 = vadd.f32 %v2984_v57, %v596_v22  ;;  %v650_v33 = vadd.f32 %v2986_v58, %v598_v56  ;;  %v807_v29 = vperm.slane %v803_v2, 0  ;;  %v809_v39 = vperm.slane %v805_v20, 0 }
  0xe5   : > { %v827_v42 = vperm.slane %v803_v2, 2  ;;  %v829_v57 = vperm.slane %v805_v20, 2  ;;  %v1341_v58 = vadd.f32 %v1337_v3, %v1329_v18  ;;  %v1347_v47 = vmul.f32 %v1343_v4, %v3637_v0 }
  0xe6   : > { %v700_v38 = vadd.f32 %v3030_v63, %v648_v32  ;;  %v702_v28 = vadd.f32 %v3038_v8, %v650_v33  ;;  %v815_v60 = vperm.slane %v803_v2, 1  ;;  %v817_v6 = vperm.slane %v805_v20, 1 }
  0xe7   : > { %v1348_v63 = vmul.f32 %v1344_v50, %v3637_v0  ;;  %v1349_v8 = vmul.f32 %v1345_v52, %v3637_v0  ;;  %v811_v55 = vmul.f32 %v807_v29, %v803_v2  ;;  %v813_v7 = vmul.f32 %v809_v39, %v803_v2 }
  0xe8   : > { %v752_v43 = vadd.f32 %v3080_v19, %v700_v38  ;;  %v754_v49 = vadd.f32 %v3636_v48, %v702_v28  ;;  %v831_v14 = vmul.f32 %v827_v42, %v805_v20  ;;  %v833_v15 = vmul.f32 %v829_v57, %v805_v20 }
  0xe9   : > { %v839_v16 = vperm.slane %v803_v2, 3  ;;  %v841_v19 = vperm.slane %v805_v20, 3  ;;  %v3218_v48 = vadd.f32 %v1347_v47, %v1339_v5 }
  0xea   : > { %v804_v12 = vadd.f32 %v800_v11, %v752_v43  ;;  %v806_v54 = vadd.f32 %v802_v27, %v754_v49  ;;  %v3216_v43 = vadd.f32 %v1346_v46, %v1338_v37 }
  0xec   : > { %v808_v17 = vperm.slane %v804_v12, 0  ;;  %v810_v23 = vperm.slane %v806_v54, 0  ;;  %v816_v24 = vperm.slane %v804_v12, 1  ;;  %v818_v13 = vperm.slane %v806_v54, 1 }
  0xed   : > { %v819_v25 = vmul.f32 %v815_v60, %v804_v12  ;;  %v821_v62 = vmul.f32 %v817_v6, %v804_v12  ;;  %v828_v1 = vperm.slane %v804_v12, 2  ;;  %v830_v30 = vperm.slane %v806_v54, 2 }
  0xee   : > { %v812_v31 = vmul.f32 %v808_v17, %v803_v2  ;;  %v814_v22 = vmul.f32 %v810_v23, %v803_v2  ;;  %v820_v56 = vmul.f32 %v816_v24, %v804_v12  ;;  %v822_v21 = vmul.f32 %v818_v13, %v804_v12 }
  0xef   : > { %v823_v11 = vadd.f32 %v819_v25, %v811_v55  ;;  %v825_v27 = vadd.f32 %v821_v62, %v813_v7  ;;  %v832_v18 = vmul.f32 %v828_v1, %v805_v20  ;;  %v834_v26 = vmul.f32 %v830_v30, %v805_v20 }
  0xf0   : > { %v824_v3 = vadd.f32 %v820_v56, %v812_v31  ;;  %v826_v32 = vadd.f32 %v822_v21, %v814_v22  ;;  %v840_v33 = vperm.slane %v804_v12, 3  ;;  %v842_v36 = vperm.slane %v806_v54, 3 }
  0xf1   : > { %v835_v4 = vadd.f32 %v831_v14, %v823_v11  ;;  %v837_v50 = vadd.f32 %v833_v15, %v825_v27  ;;  %v843_v52 = vmul.f32 %v839_v16, %v806_v54  ;;  %v845_v38 = vmul.f32 %v841_v19, %v806_v54 }
  0xf2   : > { %v836_v28 = vadd.f32 %v832_v18, %v824_v3  ;;  %v838_v29 = vadd.f32 %v834_v26, %v826_v32  ;;  %v844_v39 = vmul.f32 %v840_v33, %v806_v54  ;;  %v846_v42 = vmul.f32 %v842_v36, %v806_v54 }
  0xf3   : > { %v847_v57 = vadd.f32 %v843_v52, %v835_v4  ;;  %v849_v2 = vadd.f32 %v845_v38, %v837_v50  ;;  %v3220_v60 = vadd.f32 %v1348_v63, %v1340_v10  ;;  %v3222_v6 = vadd.f32 %v1349_v8, %v1341_v58 }
  0xf4   : > { %v848_v49 = vadd.f32 %v844_v39, %v836_v28  ;;  %v850_v20 = vadd.f32 %v846_v42, %v838_v29  ;;  %v1354_v39 = vperm.slane %v3158_v40, 3  ;;  %v1355_v42 = vperm.slane %v3160_v41, 3 }
  0xf5   : > { %v851_v12 = vperm.slane %v847_v57, 0  ;;  %v853_v55 = vperm.slane %v849_v2, 0  ;;  %v859_v7 = vperm.slane %v847_v57, 1  ;;  %v861_v14 = vperm.slane %v849_v2, 1 }
  0xf6   : > { %v852_v15 = vperm.slane %v848_v49, 0  ;;  %v854_v16 = vperm.slane %v850_v20, 0  ;;  %v860_v19 = vperm.slane %v848_v49, 1  ;;  %v862_v54 = vperm.slane %v850_v20, 1 }
  0xf7   : > { %v855_v17 = vmul.f32 %v851_v12, %v847_v57  ;;  %v857_v23 = vmul.f32 %v853_v55, %v847_v57  ;;  %v863_v37 = vmul.f32 %v859_v7, %v848_v49  ;;  %v865_v46 = vmul.f32 %v861_v14, %v848_v49 }
  0xf8   : > { %v856_v5 = vmul.f32 %v852_v15, %v847_v57  ;;  %v858_v47 = vmul.f32 %v854_v16, %v847_v57  ;;  %v864_v24 = vmul.f32 %v860_v19, %v848_v49  ;;  %v866_v13 = vmul.f32 %v862_v54, %v848_v49 }
  0xf9   : > { %v867_v10 = vadd.f32 %v863_v37, %v855_v17  ;;  %v869_v63 = vadd.f32 %v865_v46, %v857_v23  ;;  %v871_v58 = vperm.slane %v847_v57, 2  ;;  %v872_v8 = vperm.slane %v848_v49, 2 }
  0xfa   : > { %v868_v25 = vadd.f32 %v864_v24, %v856_v5  ;;  %v870_v62 = vadd.f32 %v866_v13, %v858_v47  ;;  %v873_v1 = vperm.slane %v849_v2, 2  ;;  %v874_v30 = vperm.slane %v850_v20, 2 }
  0xfb   : > { %v875_v31 = vmul.f32 %v871_v58, %v849_v2  ;;  %v876_v22 = vmul.f32 %v872_v8, %v849_v2  ;;  %v883_v56 = vperm.slane %v847_v57, 3  ;;  %v884_v21 = vperm.slane %v848_v49, 3 }
  0xfc   : > { %v877_v11 = vmul.f32 %v873_v1, %v849_v2  ;;  %v878_v27 = vmul.f32 %v874_v30, %v849_v2  ;;  %v885_v18 = vperm.slane %v849_v2, 3  ;;  %v886_v26 = vperm.slane %v850_v20, 3 }
  0xfd   : > { %v879_v3 = vadd.f32 %v875_v31, %v867_v10  ;;  %v880_v32 = vadd.f32 %v876_v22, %v868_v25  ;;  %v887_v33 = vmul.f32 %v883_v56, %v850_v20  ;;  %v888_v36 = vmul.f32 %v884_v21, %v850_v20 }
  0xfe   : > { %v881_v4 = vadd.f32 %v877_v11, %v869_v63  ;;  %v882_v50 = vadd.f32 %v878_v27, %v870_v62  ;;  %v889_v52 = vmul.f32 %v885_v18, %v850_v20  ;;  %v890_v38 = vmul.f32 %v886_v26, %v850_v20 }
  0xff   : > { %v891_v28 = vadd.f32 %v887_v33, %v879_v3  ;;  %v892_v29 = vadd.f32 %v888_v36, %v880_v32  ;;  %v1356_v12 = vperm.slane %v3164_v44, 3  ;;  %v1357_v2 = vperm.slane %v3166_v45, 3 }
 0x100   : > { %v893_v57 = vadd.f32 %v889_v52, %v881_v4  ;;  %v894_v49 = vadd.f32 %v890_v38, %v882_v50 }
 0x101   : > { %v895_v55 = vperm.slane %v891_v28, 0  ;;  %v896_v7 = vperm.slane %v892_v29, 0  ;;  %v903_v14 = vperm.slane %v891_v28, 1  ;;  %v904_v15 = vperm.slane %v892_v29, 1 }
 0x102   : > { %v897_v16 = vperm.slane %v893_v57, 0  ;;  %v898_v19 = vperm.slane %v894_v49, 0  ;;  %v905_v54 = vperm.slane %v893_v57, 1  ;;  %v906_v20 = vperm.slane %v894_v49, 1 }
 0x103   : > { %v899_v17 = vmul.f32 %v895_v55, %v891_v28  ;;  %v900_v23 = vmul.f32 %v896_v7, %v891_v28  ;;  %v907_v37 = vmul.f32 %v903_v14, %v892_v29  ;;  %v908_v46 = vmul.f32 %v904_v15, %v892_v29 }
 0x104   : > { %v901_v5 = vmul.f32 %v897_v16, %v891_v28  ;;  %v902_v47 = vmul.f32 %v898_v19, %v891_v28  ;;  %v909_v24 = vmul.f32 %v905_v54, %v892_v29  ;;  %v910_v13 = vmul.f32 %v906_v20, %v892_v29 }
 0x105   : > { %v911_v10 = vadd.f32 %v907_v37, %v899_v17  ;;  %v912_v63 = vadd.f32 %v908_v46, %v900_v23  ;;  %v915_v58 = vperm.slane %v891_v28, 2  ;;  %v916_v8 = vperm.slane %v892_v29, 2 }
 0x106   : > { %v913_v25 = vadd.f32 %v909_v24, %v901_v5  ;;  %v914_v62 = vadd.f32 %v910_v13, %v902_v47  ;;  %v917_v1 = vperm.slane %v893_v57, 2  ;;  %v918_v30 = vperm.slane %v894_v49, 2 }
 0x107   : > { %v919_v31 = vmul.f32 %v915_v58, %v893_v57  ;;  %v920_v22 = vmul.f32 %v916_v8, %v893_v57  ;;  %v927_v56 = vperm.slane %v891_v28, 3  ;;  %v928_v21 = vperm.slane %v892_v29, 3 }
 0x108   : > { %v921_v11 = vmul.f32 %v917_v1, %v893_v57  ;;  %v922_v27 = vmul.f32 %v918_v30, %v893_v57  ;;  %v929_v18 = vperm.slane %v893_v57, 3  ;;  %v930_v26 = vperm.slane %v894_v49, 3 }
 0x109   : > { %v923_v3 = vadd.f32 %v919_v31, %v911_v10  ;;  %v924_v32 = vadd.f32 %v920_v22, %v912_v63  ;;  %v931_v33 = vmul.f32 %v927_v56, %v894_v49  ;;  %v932_v36 = vmul.f32 %v928_v21, %v894_v49 }
 0x10a   : > { %v925_v4 = vadd.f32 %v921_v11, %v913_v25  ;;  %v926_v50 = vadd.f32 %v922_v27, %v914_v62  ;;  %v933_v52 = vmul.f32 %v929_v18, %v894_v49  ;;  %v934_v38 = vmul.f32 %v930_v26, %v894_v49 }
 0x10b   : > { %v935_v55 = vadd.f32 %v931_v33, %v923_v3  ;;  %v936_v7 = vadd.f32 %v932_v36, %v924_v32  ;;  %v1358_v14 = vmul.f32 %v1354_v39, %v3076_v9  ;;  %v1359_v15 = vmul.f32 %v1355_v42, %v3076_v9 }
 0x10c   : > { %v937_v28 = vadd.f32 %v933_v52, %v925_v4  ;;  %v938_v29 = vadd.f32 %v934_v38, %v926_v50  ;;  %v1360_v16 = vmul.f32 %v1356_v12, %v3076_v9  ;;  %v1361_v57 = vmul.f32 %v1357_v2, %v3076_v9 }
 0x10d   : > { %v939_v19 = vperm.slane %v935_v55, 0  ;;  %v940_v54 = vperm.slane %v936_v7, 0  ;;  %v947_v20 = vperm.slane %v935_v55, 1  ;;  %v948_v17 = vperm.slane %v936_v7, 1 }
 0x10e   : > { %v941_v23 = vperm.slane %v937_v28, 0  ;;  %v942_v37 = vperm.slane %v938_v29, 0  ;;  %v949_v46 = vperm.slane %v937_v28, 1  ;;  %v950_v49 = vperm.slane %v938_v29, 1 }
 0x10f   : > { %v943_v5 = vmul.f32 %v939_v19, %v935_v55  ;;  %v944_v47 = vmul.f32 %v940_v54, %v935_v55  ;;  %v951_v24 = vmul.f32 %v947_v20, %v936_v7  ;;  %v952_v39 = vmul.f32 %v948_v17, %v936_v7 }
 0x110   : > { %v945_v13 = vmul.f32 %v941_v23, %v935_v55  ;;  %v946_v42 = vmul.f32 %v942_v37, %v935_v55  ;;  %v953_v10 = vmul.f32 %v949_v46, %v936_v7  ;;  %v954_v63 = vmul.f32 %v950_v49, %v936_v7 }
 0x111   : > { %v955_v58 = vadd.f32 %v951_v24, %v943_v5  ;;  %v956_v12 = vadd.f32 %v952_v39, %v944_v47  ;;  %v959_v8 = vperm.slane %v935_v55, 2  ;;  %v960_v2 = vperm.slane %v936_v7, 2 }
 0x112   : > { %v957_v25 = vadd.f32 %v953_v10, %v945_v13  ;;  %v958_v62 = vadd.f32 %v954_v63, %v946_v42  ;;  %v961_v1 = vperm.slane %v937_v28, 2  ;;  %v962_v30 = vperm.slane %v938_v29, 2 }
 0x113   : > { %v963_v31 = vmul.f32 %v959_v8, %v937_v28  ;;  %v964_v22 = vmul.f32 %v960_v2, %v937_v28  ;;  %v971_v56 = vperm.slane %v935_v55, 3  ;;  %v972_v21 = vperm.slane %v936_v7, 3 }
 0x114   : > { %v965_v11 = vmul.f32 %v961_v1, %v937_v28  ;;  %v966_v27 = vmul.f32 %v962_v30, %v937_v28  ;;  %v973_v18 = vperm.slane %v937_v28, 3  ;;  %v974_v26 = vperm.slane %v938_v29, 3 }
 0x115   : > { %v967_v3 = vadd.f32 %v963_v31, %v955_v58  ;;  %v968_v32 = vadd.f32 %v964_v22, %v956_v12  ;;  %v975_v33 = vmul.f32 %v971_v56, %v938_v29  ;;  %v976_v36 = vmul.f32 %v972_v21, %v938_v29 }
 0x116   : > { %v969_v4 = vadd.f32 %v965_v11, %v957_v25  ;;  %v970_v50 = vadd.f32 %v966_v27, %v958_v62  ;;  %v977_v52 = vmul.f32 %v973_v18, %v938_v29  ;;  %v978_v38 = vmul.f32 %v974_v26, %v938_v29 }
 0x117   : > { %v979_v19 = vadd.f32 %v975_v33, %v967_v3  ;;  %v980_v54 = vadd.f32 %v976_v36, %v968_v32  ;;  %v1362_v20 = vadd.f32 %v1358_v14, %v3216_v43  ;;  %v1363_v17 = vadd.f32 %v1359_v15, %v3218_v48 }
 0x118   : > { %v981_v55 = vadd.f32 %v977_v52, %v969_v4  ;;  %v982_v7 = vadd.f32 %v978_v38, %v970_v50  ;;  %v1364_v23 = vadd.f32 %v1360_v16, %v3220_v60  ;;  %v1365_v28 = vadd.f32 %v1361_v57, %v3222_v6 }
 0x119   : > { %v983_v37 = vperm.slane %v979_v19, 0  ;;  %v984_v46 = vperm.slane %v980_v54, 0  ;;  %v991_v49 = vperm.slane %v979_v19, 1  ;;  %v992_v5 = vperm.slane %v980_v54, 1 }
 0x11a   : > { %v985_v47 = vperm.slane %v981_v55, 0  ;;  %v986_v24 = vperm.slane %v982_v7, 0  ;;  %v993_v39 = vperm.slane %v981_v55, 1  ;;  %v994_v29 = vperm.slane %v982_v7, 1 }
 0x11b   : > { %v987_v13 = vmul.f32 %v983_v37, %v979_v19  ;;  %v988_v42 = vmul.f32 %v984_v46, %v979_v19  ;;  %v995_v10 = vmul.f32 %v991_v49, %v980_v54  ;;  %v996_v43 = vmul.f32 %v992_v5, %v980_v54 }
 0x11c   : > { %v989_v14 = vmul.f32 %v985_v47, %v979_v19  ;;  %v990_v48 = vmul.f32 %v986_v24, %v979_v19  ;;  %v997_v15 = vmul.f32 %v993_v39, %v980_v54  ;;  %v998_v63 = vmul.f32 %v994_v29, %v980_v54 }
 0x11d   : > { %v999_v58 = vadd.f32 %v995_v10, %v987_v13  ;;  %v1000_v60 = vadd.f32 %v996_v43, %v988_v42  ;;  %v1003_v16 = vperm.slane %v979_v19, 2  ;;  %v1004_v6 = vperm.slane %v980_v54, 2 }
 0x11e   : > { %v1001_v57 = vadd.f32 %v997_v15, %v989_v14  ;;  %v1002_v12 = vadd.f32 %v998_v63, %v990_v48  ;;  %v1005_v8 = vperm.slane %v981_v55, 2  ;;  %v1006_v2 = vperm.slane %v982_v7, 2 }
 0x11f   : > { %v1007_v25 = vmul.f32 %v1003_v16, %v981_v55  ;;  %v1008_v62 = vmul.f32 %v1004_v6, %v981_v55  ;;  %v1015_v1 = vperm.slane %v979_v19, 3  ;;  %v1016_v30 = vperm.slane %v980_v54, 3 }
 0x120   : > { %v1009_v31 = vmul.f32 %v1005_v8, %v981_v55  ;;  %v1010_v22 = vmul.f32 %v1006_v2, %v981_v55  ;;  %v1017_v56 = vperm.slane %v981_v55, 3  ;;  %v1018_v21 = vperm.slane %v982_v7, 3 }
 0x121   : > { %v1011_v11 = vadd.f32 %v1007_v25, %v999_v58  ;;  %v1012_v27 = vadd.f32 %v1008_v62, %v1000_v60  ;;  %v1019_v18 = vmul.f32 %v1015_v1, %v982_v7  ;;  %v1020_v26 = vmul.f32 %v1016_v30, %v982_v7 }
 0x122   : > { %v1013_v3 = vadd.f32 %v1009_v31, %v1001_v57  ;;  %v1014_v32 = vadd.f32 %v1010_v22, %v1002_v12  ;;  %v1021_v33 = vmul.f32 %v1017_v56, %v982_v7  ;;  %v1022_v36 = vmul.f32 %v1018_v21, %v982_v7 }
 0x123   : > { %v1023_v4 = vadd.f32 %v1019_v18, %v1011_v11  ;;  %v1024_v50 = vadd.f32 %v1020_v26, %v1012_v27  ;;  %v3236_v52 = vmul.f32 0.33333334, %v1362_v20  ;;  %v3238_v38 = vmul.f32 0.33333334, %v1363_v17 }
 0x124   : > { %v1025_v19 = vadd.f32 %v1021_v33, %v1013_v3  ;;  %v1026_v54 = vadd.f32 %v1022_v36, %v1014_v32  ;;  %v3240_v37 = vmul.f32 0.33333334, %v1364_v23  ;;  %v3242_v55 = vmul.f32 0.33333334, %v1365_v28 }
 0x125   : > { %v1027_v46 = vperm.slane %v1023_v4, 0  ;;  %v1028_v49 = vperm.slane %v1024_v50, 0  ;;  %v1035_v5 = vperm.slane %v1023_v4, 1  ;;  %v1036_v47 = vperm.slane %v1024_v50, 1 }
 0x126   : > { %v1029_v24 = vperm.slane %v1025_v19, 0  ;;  %v1030_v39 = vperm.slane %v1026_v54, 0  ;;  %v1037_v29 = vperm.slane %v1025_v19, 1  ;;  %v1038_v7 = vperm.slane %v1026_v54, 1 }
 0x127   : > { %v1031_v13 = vmul.f32 %v1027_v46, %v1023_v4  ;;  %v1032_v42 = vmul.f32 %v1028_v49, %v1023_v4  ;;  %v1039_v20 = vmul.f32 %v1035_v5, %v1024_v50  ;;  %v1040_v10 = vmul.f32 %v1036_v47, %v1024_v50 }
 0x128   : > { %v1033_v17 = vmul.f32 %v1029_v24, %v1023_v4  ;;  %v1034_v43 = vmul.f32 %v1030_v39, %v1023_v4  ;;  %v1041_v14 = vmul.f32 %v1037_v29, %v1024_v50  ;;  %v1042_v48 = vmul.f32 %v1038_v7, %v1024_v50 }
 0x129   : > { %v1043_v23 = vadd.f32 %v1039_v20, %v1031_v13  ;;  %v1044_v15 = vadd.f32 %v1040_v10, %v1032_v42  ;;  %v1047_v28 = vperm.slane %v1023_v4, 2  ;;  %v1048_v63 = vperm.slane %v1024_v50, 2 }
 0x12a   : > { %v1045_v58 = vadd.f32 %v1041_v14, %v1033_v17  ;;  %v1046_v60 = vadd.f32 %v1042_v48, %v1034_v43  ;;  %v1049_v16 = vperm.slane %v1025_v19, 2  ;;  %v1050_v6 = vperm.slane %v1026_v54, 2 }
 0x12b   : > { %v1051_v57 = vmul.f32 %v1047_v28, %v1025_v19  ;;  %v1052_v12 = vmul.f32 %v1048_v63, %v1025_v19  ;;  %v1059_v8 = vperm.slane %v1023_v4, 3  ;;  %v1060_v2 = vperm.slane %v1024_v50, 3 }
 0x12c   : > { %v1053_v25 = vmul.f32 %v1049_v16, %v1025_v19  ;;  %v1054_v62 = vmul.f32 %v1050_v6, %v1025_v19  ;;  %v1061_v1 = vperm.slane %v1025_v19, 3  ;;  %v1062_v30 = vperm.slane %v1026_v54, 3 }
 0x12d   : > { %v1055_v31 = vadd.f32 %v1051_v57, %v1043_v23  ;;  %v1056_v22 = vadd.f32 %v1052_v12, %v1044_v15  ;;  %v1063_v56 = vmul.f32 %v1059_v8, %v1026_v54  ;;  %v1064_v21 = vmul.f32 %v1060_v2, %v1026_v54 }
 0x12e   : > { %v1057_v11 = vadd.f32 %v1053_v25, %v1045_v58  ;;  %v1058_v27 = vadd.f32 %v1054_v62, %v1046_v60  ;;  %v1065_v18 = vmul.f32 %v1061_v1, %v1026_v54  ;;  %v1066_v26 = vmul.f32 %v1062_v30, %v1026_v54 }
 0x12f   : > { %v1067_v3 = vadd.f32 %v1063_v56, %v1055_v31  ;;  %v1068_v32 = vadd.f32 %v1064_v21, %v1056_v22  ;;  %v1374_v33 = vperm.slane %v3236_v52, 0  ;;  %v1375_v36 = vperm.slane %v3238_v38, 0 }
 0x130   : > { %v1069_v4 = vadd.f32 %v1065_v18, %v1057_v11  ;;  %v1070_v50 = vadd.f32 %v1066_v26, %v1058_v27  ;;  %v1376_v46 = vperm.slane %v3240_v37, 0  ;;  %v1377_v19 = vperm.slane %v3242_v55, 0 }
 0x131   : > { %v1071_v49 = vperm.slane %v1067_v3, 0  ;;  %v1072_v5 = vperm.slane %v1068_v32, 0  ;;  %v1079_v47 = vperm.slane %v1067_v3, 1  ;;  %v1080_v24 = vperm.slane %v1068_v32, 1 }
 0x132   : > { %v1073_v39 = vperm.slane %v1069_v4, 0  ;;  %v1074_v29 = vperm.slane %v1070_v50, 0  ;;  %v1081_v7 = vperm.slane %v1069_v4, 1  ;;  %v1082_v54 = vperm.slane %v1070_v50, 1 }
 0x133   : > { %v1075_v13 = vmul.f32 %v1071_v49, %v1067_v3  ;;  %v1076_v42 = vmul.f32 %v1072_v5, %v1067_v3  ;;  %v1083_v20 = vmul.f32 %v1079_v47, %v1068_v32  ;;  %v1084_v10 = vmul.f32 %v1080_v24, %v1068_v32 }
 0x134   : > { %v1077_v17 = vmul.f32 %v1073_v39, %v1067_v3  ;;  %v1078_v43 = vmul.f32 %v1074_v29, %v1067_v3  ;;  %v1085_v14 = vmul.f32 %v1081_v7, %v1068_v32  ;;  %v1086_v48 = vmul.f32 %v1082_v54, %v1068_v32 }
 0x135   : > { %v1087_v23 = vadd.f32 %v1083_v20, %v1075_v13  ;;  %v1088_v15 = vadd.f32 %v1084_v10, %v1076_v42  ;;  %v1091_v28 = vperm.slane %v1067_v3, 2  ;;  %v1092_v63 = vperm.slane %v1068_v32, 2 }
 0x136   : > { %v1089_v58 = vadd.f32 %v1085_v14, %v1077_v17  ;;  %v1090_v60 = vadd.f32 %v1086_v48, %v1078_v43  ;;  %v1093_v16 = vperm.slane %v1069_v4, 2  ;;  %v1094_v6 = vperm.slane %v1070_v50, 2 }
 0x137   : > { %v1095_v57 = vmul.f32 %v1091_v28, %v1069_v4  ;;  %v1096_v12 = vmul.f32 %v1092_v63, %v1069_v4  ;;  %v1103_v8 = vperm.slane %v1067_v3, 3  ;;  %v1104_v2 = vperm.slane %v1068_v32, 3 }
 0x138   : > { %v1097_v25 = vmul.f32 %v1093_v16, %v1069_v4  ;;  %v1098_v62 = vmul.f32 %v1094_v6, %v1069_v4  ;;  %v1105_v1 = vperm.slane %v1069_v4, 3  ;;  %v1106_v30 = vperm.slane %v1070_v50, 3 }
 0x139   : > { %v1099_v31 = vadd.f32 %v1095_v57, %v1087_v23  ;;  %v1100_v22 = vadd.f32 %v1096_v12, %v1088_v15  ;;  %v1107_v56 = vmul.f32 %v1103_v8, %v1070_v50  ;;  %v1108_v21 = vmul.f32 %v1104_v2, %v1070_v50 }
 0x13a   : > { %v1101_v11 = vadd.f32 %v1097_v25, %v1089_v58  ;;  %v1102_v27 = vadd.f32 %v1098_v62, %v1090_v60  ;;  %v1109_v18 = vmul.f32 %v1105_v1, %v1070_v50  ;;  %v1110_v26 = vmul.f32 %v1106_v30, %v1070_v50 }
 0x13b   : > { %v1111_v49 = vadd.f32 %v1107_v56, %v1099_v31  ;;  %v1112_v5 = vadd.f32 %v1108_v21, %v1100_v22  ;;  %v1378_v47 = vmul.f32 %v1374_v33, %v3022_v51  ;;  %v1382_v24 = vperm.slane %v3236_v52, 1 }
 0x13c   : > { %v1113_v3 = vadd.f32 %v1109_v18, %v1101_v11  ;;  %v1114_v32 = vadd.f32 %v1110_v26, %v1102_v27  ;;  %v1383_v39 = vperm.slane %v3238_v38, 1  ;;  %v1384_v4 = vperm.slane %v3240_v37, 1 }
 0x13d   : > { %v1115_v29 = vperm.slane %v1111_v49, 0  ;;  %v1116_v7 = vperm.slane %v1112_v5, 0  ;;  %v1123_v54 = vperm.slane %v1111_v49, 1  ;;  %v1124_v13 = vperm.slane %v1112_v5, 1 }
 0x13e   : > { %v1117_v42 = vperm.slane %v1113_v3, 0  ;;  %v1118_v20 = vperm.slane %v1114_v32, 0  ;;  %v1125_v10 = vperm.slane %v1113_v3, 1  ;;  %v1126_v50 = vperm.slane %v1114_v32, 1 }
 0x13f   : > { %v1119_v17 = vmul.f32 %v1115_v29, %v1111_v49  ;;  %v1120_v43 = vmul.f32 %v1116_v7, %v1111_v49  ;;  %v1127_v14 = vmul.f32 %v1123_v54, %v1112_v5  ;;  %v1128_v33 = vmul.f32 %v1124_v13, %v1112_v5 }
 0x140   : > { %v1121_v48 = vmul.f32 %v1117_v42, %v1111_v49  ;;  %v1122_v23 = vmul.f32 %v1118_v20, %v1111_v49  ;;  %v1129_v15 = vmul.f32 %v1125_v10, %v1112_v5  ;;  %v1130_v28 = vmul.f32 %v1126_v50, %v1112_v5 }
 0x141   : > { %v1131_v63 = vadd.f32 %v1127_v14, %v1119_v17  ;;  %v1132_v58 = vadd.f32 %v1128_v33, %v1120_v43  ;;  %v1135_v60 = vperm.slane %v1111_v49, 2  ;;  %v1136_v16 = vperm.slane %v1112_v5, 2 }
 0x142   : > { %v1133_v6 = vadd.f32 %v1129_v15, %v1121_v48  ;;  %v1134_v57 = vadd.f32 %v1130_v28, %v1122_v23  ;;  %v1137_v12 = vperm.slane %v1113_v3, 2  ;;  %v1138_v8 = vperm.slane %v1114_v32, 2 }
 0x143   : > { %v1139_v2 = vmul.f32 %v1135_v60, %v1113_v3  ;;  %v1140_v25 = vmul.f32 %v1136_v16, %v1113_v3  ;;  %v1147_v62 = vperm.slane %v1111_v49, 3  ;;  %v1148_v1 = vperm.slane %v1112_v5, 3 }
 0x144   : > { %v1141_v30 = vmul.f32 %v1137_v12, %v1113_v3  ;;  %v1142_v31 = vmul.f32 %v1138_v8, %v1113_v3  ;;  %v1149_v22 = vperm.slane %v1113_v3, 3  ;;  %v1150_v56 = vperm.slane %v1114_v32, 3 }
 0x145   : > { %v1143_v21 = vadd.f32 %v1139_v2, %v1131_v63  ;;  %v1144_v11 = vadd.f32 %v1140_v25, %v1132_v58  ;;  %v1151_v27 = vmul.f32 %v1147_v62, %v1114_v32  ;;  %v1152_v18 = vmul.f32 %v1148_v1, %v1114_v32 }
 0x146   : > { %v1145_v26 = vadd.f32 %v1141_v30, %v1133_v6  ;;  %v1146_v29 = vadd.f32 %v1142_v31, %v1134_v57  ;;  %v1153_v7 = vmul.f32 %v1149_v22, %v1114_v32  ;;  %v1154_v54 = vmul.f32 %v1150_v56, %v1114_v32 }
 0x147   : > { %v3252_v13 = vadd.f32 %v1151_v27, %v1143_v21  ;;  %v3254_v42 = vadd.f32 %v1152_v18, %v1144_v11  ;;  %v1385_v20 = vperm.slane %v3242_v55, 1  ;;  %v1386_v49 = vmul.f32 %v1382_v24, %v3026_v61 }
 0x148   : > { %v3258_v5 = vadd.f32 %v1153_v7, %v1145_v26  ;;  %v3260_v3 = vadd.f32 %v1154_v54, %v1146_v29  ;;  %v1379_v10 = vmul.f32 %v1375_v36, %v3022_v51  ;;  %v1387_v50 = vmul.f32 %v1383_v39, %v3026_v61 }
 0x149   : > { %v1380_v32 = vmul.f32 %v1376_v46, %v3022_v51  ;;  %v1388_v17 = vmul.f32 %v1384_v4, %v3026_v61  ;;  %v1381_v24 = vmul.f32 %v1377_v19, %v3022_v51  ;;  %v1389_v43 = vmul.f32 %v1385_v20, %v3026_v61 }
 0x14a   : > { %v1390_v14 = vadd.f32 %v1386_v49, %v1378_v47  ;;  %v1394_v33 = vperm.slane %v3236_v52, 2  ;;  %v1395_v48 = vperm.slane %v3238_v38, 2  ;;  %v1391_v36 = vadd.f32 %v1387_v50, %v1379_v10 }
 0x14b   : > { %v1396_v39 = vperm.slane %v3240_v37, 2  ;;  %v1397_v23 = vperm.slane %v3242_v55, 2  ;;  %v1406_v46 = vperm.slane %v3236_v52, 3  ;;  %v1392_v15 = vadd.f32 %v1388_v17, %v1380_v32 }
 0x14c   : > { %v1398_v4 = vmul.f32 %v1394_v33, %v3637_v0  ;;  %v1399_v28 = vmul.f32 %v1395_v48, %v3637_v0  ;;  %v1407_v19 = vperm.slane %v3238_v38, 3  ;;  %v1393_v63 = vadd.f32 %v1389_v43, %v1381_v24 }
 0x14d   : > { %v1400_v47 = vmul.f32 %v1396_v39, %v3637_v0  ;;  %v1401_v58 = vmul.f32 %v1397_v23, %v3637_v0  ;;  %v1408_v60 = vperm.slane %v3240_v37, 3  ;;  %v1409_v16 = vperm.slane %v3242_v55, 3 }
 0x14e   : > { %v1402_v6 = vadd.f32 %v1398_v4, %v1390_v14  ;;  %v1403_v57 = vadd.f32 %v1399_v28, %v1391_v36  ;;  %v1410_v12 = vmul.f32 %v1406_v46, %v3076_v9  ;;  %v1411_v8 = vmul.f32 %v1407_v19, %v3076_v9 }
 0x14f   : > { %v1404_v2 = vadd.f32 %v1400_v47, %v1392_v15  ;;  %v1412_v25 = vmul.f32 %v1408_v60, %v3076_v9  ;;  %v1405_v62 = vadd.f32 %v1401_v58, %v1393_v63  ;;  %v1413_v1 = vmul.f32 %v1409_v16, %v3076_v9 }
 0x150   : > { %v1414_v30 = vadd.f32 %v1410_v12, %v1402_v6  ;;  %v1415_v31 = vadd.f32 %v1411_v8, %v1403_v57 }
 0x151   : > { %v1416_v22 = vadd.f32 %v1412_v25, %v1404_v2  ;;  %v1417_v56 = vadd.f32 %v1413_v1, %v1405_v62 }
 0x152   : > { %v3290_v21 = vmul.f32 0.25, %v1414_v30  ;;  %v3292_v11 = vmul.f32 0.25, %v1415_v31 }
 0x153   : > { %v3294_v27 = vmul.f32 0.25, %v1416_v22  ;;  %v3296_v18 = vmul.f32 0.25, %v1417_v56 }
 0x154   : > { %v1426_v26 = vperm.slane %v3290_v21, 0  ;;  %v1427_v29 = vperm.slane %v3292_v11, 0  ;;  %v1434_v7 = vperm.slane %v3290_v21, 1  ;;  %v1435_v20 = vperm.slane %v3292_v11, 1 }
 0x155   : > { %v1428_v54 = vperm.slane %v3294_v27, 0  ;;  %v1436_v49 = vperm.slane %v3294_v27, 1  ;;  %v1429_v10 = vperm.slane %v3296_v18, 0  ;;  %v1437_v50 = vperm.slane %v3296_v18, 1 }
 0x156   : > { %v1430_v32 = vmul.f32 %v1426_v26, %v3022_v51  ;;  %v1431_v17 = vmul.f32 %v1427_v29, %v3022_v51  ;;  %v1438_v24 = vmul.f32 %v1434_v7, %v3026_v61  ;;  %v1439_v43 = vmul.f32 %v1435_v20, %v3026_v61 }
 0x157   : > { %v1432_v14 = vmul.f32 %v1428_v54, %v3022_v51  ;;  %v1440_v33 = vmul.f32 %v1436_v49, %v3026_v61  ;;  %v1433_v48 = vmul.f32 %v1429_v10, %v3022_v51  ;;  %v1441_v36 = vmul.f32 %v1437_v50, %v3026_v61 }
 0x158   : > { %v1446_v39 = vperm.slane %v3290_v21, 2  ;;  %v1447_v23 = vperm.slane %v3292_v11, 2  ;;  %v1448_v46 = vperm.slane %v3294_v27, 2  ;;  %v1442_v15 = vadd.f32 %v1438_v24, %v1430_v32 }
 0x159   : > { %v1443_v4 = vadd.f32 %v1439_v43, %v1431_v17  ;;  %v1449_v28 = vperm.slane %v3296_v18, 2  ;;  %v1444_v63 = vadd.f32 %v1440_v33, %v1432_v14  ;;  %v1445_v60 = vadd.f32 %v1441_v36, %v1433_v48 }
 0x15a   : > { %v1450_v19 = vmul.f32 %v1446_v39, %v3637_v0  ;;  %v1451_v47 = vmul.f32 %v1447_v23, %v3637_v0  ;;  %v1452_v58 = vmul.f32 %v1448_v46, %v3637_v0  ;;  %v1458_v12 = vperm.slane %v3290_v21, 3 }
 0x15b   : > { %v1453_v16 = vmul.f32 %v1449_v28, %v3637_v0  ;;  %v1459_v2 = vperm.slane %v3292_v11, 3  ;;  %v1460_v25 = vperm.slane %v3294_v27, 3  ;;  %v1461_v62 = vperm.slane %v3296_v18, 3 }
 0x15c   : > { %v1454_v6 = vadd.f32 %v1450_v19, %v1442_v15  ;;  %v1455_v57 = vadd.f32 %v1451_v47, %v1443_v4  ;;  %v1456_v8 = vadd.f32 %v1452_v58, %v1444_v63  ;;  %v1462_v30 = vmul.f32 %v1458_v12, %v3076_v9 }
 0x15d   : > { %v1457_v1 = vadd.f32 %v1453_v16, %v1445_v60  ;;  %v1463_v31 = vmul.f32 %v1459_v2, %v3076_v9  ;;  %v1464_v22 = vmul.f32 %v1460_v25, %v3076_v9  ;;  %v1465_v56 = vmul.f32 %v1461_v62, %v3076_v9 }
 0x15e   : > { %v1466_v26 = vadd.f32 %v1462_v30, %v1454_v6  ;;  %v1266_v50 = vadd.f32 %v3022_v51, %v3150_v35  ;;  %v1268_v32 = vadd.f32 %v3637_v0, %v3148_v34  ;;  %v1267_v24 = vadd.f32 %v3026_v61, %v3172_v59 }
 0x15f   : > { %v1467_v29 = vadd.f32 %v1463_v31, %v1455_v57  ;;  %v1468_v7 = vadd.f32 %v1464_v22, %v1456_v8  ;;  %v1469_v54 = vadd.f32 %v1465_v56, %v1457_v1  ;;  %v1269_v43 = vadd.f32 %v3076_v9, %v3170_v53 }
 0x160   : > { %v3330_v20 = vmul.f32 0.2, %v1466_v26  ;;  %v1318_v36 = vadd.f32 %v3158_v40, %v1266_v50  ;;  %v1320_v35 = vadd.f32 %v3164_v44, %v1268_v32  ;;  %v1319_v39 = vadd.f32 %v3160_v41, %v1267_v24 }
 0x161   : > { %v3332_v49 = vmul.f32 0.2, %v1467_v29  ;;  %v3334_v10 = vmul.f32 0.2, %v1468_v7  ;;  %v3340_v17 = vmul.f32 0.2, %v1469_v54  ;;  %v1321_v23 = vadd.f32 %v3166_v45, %v1269_v43 }
 0x162   : > { %v1478_v14 = vperm.slane %v3330_v20, 0  ;;  %v1486_v59 = vperm.slane %v3330_v20, 1  ;;  %v1370_v45 = vadd.f32 %v3236_v52, %v1318_v36  ;;  %v1159_v58 = vmax.f32 %v3252_v13, 1e-30 }
 0x163   : > { %v1479_v33 = vperm.slane %v3332_v49, 0  ;;  %v1480_v48 = vperm.slane %v3334_v10, 0  ;;  %v1481_v34 = vperm.slane %v3340_v17, 0  ;;  %v1487_v53 = vperm.slane %v3332_v49, 1 }
 0x164   : > { %v1482_v46 = vmul.f32 %v1478_v14, %v3022_v51  ;;  %v1488_v4 = vperm.slane %v3334_v10, 1  ;;  %v1489_v40 = vperm.slane %v3340_v17, 1  ;;  %v1490_v28 = vmul.f32 %v1486_v59, %v3026_v61 }
 0x165   : > { %v1483_v15 = vmul.f32 %v1479_v33, %v3022_v51  ;;  %v1484_v44 = vmul.f32 %v1480_v48, %v3022_v51  ;;  %v1491_v41 = vmul.f32 %v1487_v53, %v3026_v61  ;;  %v1485_v19 = vmul.f32 %v1481_v34, %v3022_v51 }
 0x166   : > { %v1492_v63 = vmul.f32 %v1488_v4, %v3026_v61  ;;  %v1493_v47 = vmul.f32 %v1489_v40, %v3026_v61  ;;  %v1371_v60 = vadd.f32 %v3238_v38, %v1319_v39  ;;  %v1372_v16 = vadd.f32 %v3240_v37, %v1320_v35 }
 0x167   : > { %v1373_v6 = vadd.f32 %v3242_v55, %v1321_v23  ;;  %v1160_v57 = vmax.f32 %v3254_v42, 1e-30  ;;  %v1161_v12 = vmax.f32 %v3258_v5, 1e-30  ;;  %v1494_v8 = vadd.f32 %v1490_v28, %v1482_v46 }
 0x168   : > { %v1495_v52 = vadd.f32 %v1491_v41, %v1483_v15  ;;  %v1496_v2 = vadd.f32 %v1492_v63, %v1484_v44  ;;  %v1498_v25 = vperm.slane %v3330_v20, 2  ;;  %v1499_v62 = vperm.slane %v3332_v49, 2 }
 0x169   : > { %v1500_v1 = vperm.slane %v3334_v10, 2  ;;  %v1497_v13 = vadd.f32 %v1493_v47, %v1485_v19  ;;  %v1501_v38 = vperm.slane %v3340_v17, 2  ;;  %v1510_v37 = vperm.slane %v3330_v20, 3 }
 0x16a   : > { %v1511_v55 = vperm.slane %v3332_v49, 3  ;;  %v1502_v42 = vmul.f32 %v1498_v25, %v3637_v0  ;;  %v1503_v5 = vmul.f32 %v1499_v62, %v3637_v0  ;;  %v1512_v31 = vperm.slane %v3334_v10, 3 }
 0x16b   : > { %v1504_v30 = vmul.f32 %v1500_v1, %v3637_v0  ;;  %v1505_v22 = vmul.f32 %v1501_v38, %v3637_v0  ;;  %v1513_v56 = vperm.slane %v3340_v17, 3  ;;  %v1514_v26 = vmul.f32 %v1510_v37, %v3076_v9 }
 0x16c   : > { %v1515_v29 = vmul.f32 %v1511_v55, %v3076_v9  ;;  %v1506_v7 = vadd.f32 %v1502_v42, %v1494_v8  ;;  %v1507_v54 = vadd.f32 %v1503_v5, %v1495_v52  ;;  %v1516_v32 = vmul.f32 %v1512_v31, %v3076_v9 }
 0x16d   : > { %v1508_v50 = vadd.f32 %v1504_v30, %v1496_v2  ;;  %v1162_v24 = vmax.f32 %v3260_v3, 1e-30  ;;  %v1422_v43 = vadd.f32 %v3290_v21, %v1370_v45  ;;  %v1509_v14 = vadd.f32 %v1505_v22, %v1497_v13 }
 0x16e   : > { %v1517_v33 = vmul.f32 %v1513_v56, %v3076_v9  ;;  %v1423_v48 = vadd.f32 %v3292_v11, %v1371_v60  ;;  %v1518_v36 = vadd.f32 %v1514_v26, %v1506_v7  ;;  %v1519_v35 = vadd.f32 %v1515_v29, %v1507_v54 }
 0x16f   : > { %v1520_v34 = vadd.f32 %v1516_v32, %v1508_v50  ;;  %2386 = vlog2.f32 %v1159_v58  ;;  %v1424_v39 = vadd.f32 %v3294_v27, %v1372_v16  ;;  %v1425_v23 = vadd.f32 %v3296_v18, %v1373_v6 }
 0x170   : > { %v1521_v59 = vadd.f32 %v1517_v33, %v1509_v14  ;;  %2388 = vlog2.f32 %v1160_v57  ;;  %v1522_v53 = vmul.f32 0.16666667, %v1518_v36  ;;  %v1523_v46 = vmul.f32 0.16666667, %v1519_v35  ;;  %v462_v35 = vld [vmem:[%s444_s26] sm:$0xf] }
 0x171   : > { %2390 = vlog2.f32 %v1161_v12  ;;  %v1524_v3 = vmul.f32 0.16666667, %v1520_v34  ;;  %v1474_v11 = vadd.f32 %v3330_v20, %v1422_v43  ;;  %v1475_v15 = vadd.f32 %v3332_v49, %v1423_v48  ;;  %s2554_s26 = scalar_lea.hbm %s3608_s7, 8 }
 0x172   : > { %v1525_v21 = vmul.f32 0.16666667, %v1521_v59  ;;  %2392 = vlog2.f32 %v1162_v24  ;;  %v1530_v4 = vperm.slane %v1522_v53, 0  ;;  %v1476_v27 = vadd.f32 %v3334_v10, %v1424_v39  ;;  %p2556_p4 = scmp.lt.s32.totalorder %s2554_s26, %s2550_s21 }
 0x173   : > { %v1477_v18 = vadd.f32 %v3340_v17, %v1425_v23  ;;  %v1531_v40 = vperm.slane %v1523_v46, 0  ;;  %v1532_v44 = vperm.slane %v1524_v3, 0  ;;  %v1538_v45 = vperm.slane %v1522_v53, 1 }
 0x174   : > { %v1533_v28 = vperm.slane %v1525_v21, 0  ;;  %v1534_v41 = vmul.f32 %v1530_v4, %v3022_v51  ;;  %v1539_v19 = vperm.slane %v1523_v46, 1  ;;  %v1540_v49 = vperm.slane %v1524_v3, 1  ;;  %p2557_p5 = por %p2556_p4, %p2555_p3 }
 0x175   : > { %v2387_v63 = vpop.eup %2386  ;;  %v1535_v47 = vmul.f32 %v1531_v40, %v3022_v51  ;;  %v1536_v20 = vmul.f32 %v1532_v44, %v3022_v51  ;;  %v1541_v58 = vperm.slane %v1525_v21, 1  ;;  %v1542_v17 = vmul.f32 %v1538_v45, %v3026_v61 }
 0x176   : > { %v2389_v60 = vpop.eup %2388  ;;  %v1537_v10 = vmul.f32 %v1533_v28, %v3022_v51  ;;  %v1543_v16 = vmul.f32 %v1539_v19, %v3026_v61  ;;  %v1550_v6 = vperm.slane %v1522_v53, 2  ;;  %v1544_v12 = vmul.f32 %v1540_v49, %v3026_v61  ;;  %p2558_p7 = pnand %p2557_p5, %p2553_p2 }
 0x177   : > { %v2391_v57 = vpop.eup %2390  ;;  %v1545_v8 = vmul.f32 %v1541_v58, %v3026_v61  ;;  %v1551_v52 = vperm.slane %v1523_v46, 2  ;;  %v1552_v2 = vperm.slane %v1524_v3, 2  ;;  %v1546_v62 = vadd.f32 %v1542_v17, %v1534_v41 }
 0x178   : > { %v2393_v25 = vpop.eup %2392  ;;  %v1547_v1 = vadd.f32 %v1543_v16, %v1535_v47  ;;  %v1553_v13 = vperm.slane %v1525_v21, 2  ;;  %v1554_v38 = vmul.f32 %v1550_v6, %v3637_v0  ;;  %v1548_v51 = vadd.f32 %v1544_v12, %v1536_v20 }
 0x179   : > { %v1549_v37 = vadd.f32 %v1545_v8, %v1537_v10  ;;  %v1555_v55 = vmul.f32 %v1551_v52, %v3637_v0  ;;  %v1556_v42 = vmul.f32 %v1552_v2, %v3637_v0  ;;  %v1562_v30 = vperm.slane %v1522_v53, 3 }
 0x17a   : > { %v1557_v5 = vmul.f32 %v1553_v13, %v3637_v0  ;;  %v1558_v61 = vadd.f32 %v1554_v38, %v1546_v62  ;;  %v1563_v31 = vperm.slane %v1523_v46, 3  ;;  %v1564_v26 = vperm.slane %v1524_v3, 3 }
 0x17b   : > { %v1559_v22 = vadd.f32 %v1555_v55, %v1547_v1  ;;  %v1560_v56 = vadd.f32 %v1556_v42, %v1548_v51  ;;  %v1565_v29 = vperm.slane %v1525_v21, 3  ;;  %v1566_v54 = vmul.f32 %v1562_v30, %v3076_v9 }
 0x17c   : > { %v1561_v7 = vadd.f32 %v1557_v5, %v1549_v37  ;;  %v1567_v50 = vmul.f32 %v1563_v31, %v3076_v9  ;;  %v1164_v32 = vmul.f32 0.6931472, %v2387_v63  ;;  %v1166_v24 = vmul.f32 0.6931472, %v2389_v60 }
 0x17d   : > { %v1568_v0 = vmul.f32 %v1564_v26, %v3076_v9  ;;  %v1569_v43 = vmul.f32 %v1565_v29, %v3076_v9  ;;  %v1526_v14 = vadd.f32 %v1522_v53, %v1474_v11  ;;  %v1527_v33 = vadd.f32 %v1523_v46, %v1475_v15 }
 0x17e   : > { %v1570_v48 = vadd.f32 %v1566_v54, %v1558_v61  ;;  %v1571_v36 = vadd.f32 %v1567_v50, %v1559_v22  ;;  %v1528_v34 = vadd.f32 %v1524_v3, %v1476_v27  ;;  %v1529_v39 = vadd.f32 %v1525_v21, %v1477_v18 }
 0x17f   : > { %v1572_v23 = vadd.f32 %v1568_v0, %v1560_v56  ;;  %v1573_v59 = vadd.f32 %v1569_v43, %v1561_v7  ;;  %v1168_v41 = vmul.f32 0.6931472, %v2391_v57  ;;  %v3424_v45 = vadd.f32 %v1164_v32, %v462_v35 }
 0x180   : > { %v1574_v4 = vmul.f32 0.14285715, %v1570_v48  ;;  %v1575_v40 = vmul.f32 0.14285715, %v1571_v36  ;;  %v1170_v47 = vmul.f32 0.6931472, %v2393_v25  ;;  %v3426_v9 = vadd.f32 %v1166_v24, %v462_v35 }
 0x181   : > { %v1576_v44 = vmul.f32 0.14285715, %v1572_v23  ;;  %v1577_v28 = vmul.f32 0.14285715, %v1573_v59  ;;  %v3428_v24 = vadd.f32 %v1168_v41, %v462_v35  ;;  %v3432_v0 = vsel %vm1175_vm0, %v3424_v45, -inf }
 0x182   : > { %v1578_v19 = vadd.f32 %v1574_v4, %v1526_v14  ;;  %v1579_v63 = vadd.f32 %v1575_v40, %v1527_v33  ;;  %v3434_v33 = vadd.f32 %v1170_v47, %v462_v35  ;;  %v3438_v48 = vsel %vm1175_vm0, %v3426_v9, -inf }
 0x183   : > { %v1580_v53 = vadd.f32 %v1576_v44, %v1528_v34  ;;  %v1581_v46 = vadd.f32 %v1577_v28, %v1529_v39 }
 0x184   : > { %v1582_v11 = vperm.slane %v1578_v19, 0  ;;  %v1583_v3 = vperm.slane %v1579_v63, 0  ;;  %v1590_v21 = vperm.slane %v1578_v19, 1  ;;  %v1591_v15 = vperm.slane %v1579_v63, 1 }
 0x185   : > { %v1584_v27 = vperm.slane %v1580_v53, 0  ;;  %v1585_v18 = vperm.slane %v1581_v46, 0  ;;  %v1592_v20 = vperm.slane %v1580_v53, 1  ;;  %v1593_v49 = vperm.slane %v1581_v46, 1 }
 0x186   : > { %v1586_v58 = vmul.f32 %v1582_v11, %v1578_v19  ;;  %v1587_v60 = vmul.f32 %v1583_v3, %v1578_v19  ;;  %v1594_v10 = vmul.f32 %v1590_v21, %v1579_v63  ;;  %v1595_v17 = vmul.f32 %v1591_v15, %v1579_v63 }
 0x187   : > { %v1588_v16 = vmul.f32 %v1584_v27, %v1578_v19  ;;  %v1589_v6 = vmul.f32 %v1585_v18, %v1578_v19  ;;  %v1596_v57 = vmul.f32 %v1592_v20, %v1579_v63  ;;  %v1597_v12 = vmul.f32 %v1593_v49, %v1579_v63 }
 0x188   : > { %v1598_v8 = vadd.f32 %v1594_v10, %v1586_v58  ;;  %v1599_v52 = vadd.f32 %v1595_v17, %v1587_v60  ;;  %v1602_v2 = vperm.slane %v1578_v19, 2  ;;  %v1603_v25 = vperm.slane %v1579_v63, 2 }
 0x189   : > { %v1600_v62 = vadd.f32 %v1596_v57, %v1588_v16  ;;  %v1601_v1 = vadd.f32 %v1597_v12, %v1589_v6  ;;  %v1604_v13 = vperm.slane %v1580_v53, 2  ;;  %v1605_v38 = vperm.slane %v1581_v46, 2 }
 0x18a   : > { %v1606_v51 = vmul.f32 %v1602_v2, %v1580_v53  ;;  %v1607_v37 = vmul.f32 %v1603_v25, %v1580_v53  ;;  %v1614_v55 = vperm.slane %v1578_v19, 3  ;;  %v1615_v42 = vperm.slane %v1579_v63, 3 }
 0x18b   : > { %v1608_v5 = vmul.f32 %v1604_v13, %v1580_v53  ;;  %v1609_v61 = vmul.f32 %v1605_v38, %v1580_v53  ;;  %v1616_v30 = vperm.slane %v1580_v53, 3  ;;  %v1617_v31 = vperm.slane %v1581_v46, 3 }
 0x18c   : > { %v1610_v22 = vadd.f32 %v1606_v51, %v1598_v8  ;;  %v1611_v56 = vadd.f32 %v1607_v37, %v1599_v52  ;;  %v1618_v26 = vmul.f32 %v1614_v55, %v1581_v46  ;;  %v1619_v29 = vmul.f32 %v1615_v42, %v1581_v46 }
 0x18d   : > { %v1612_v7 = vadd.f32 %v1608_v5, %v1600_v62  ;;  %v1613_v54 = vadd.f32 %v1609_v61, %v1601_v1  ;;  %v1620_v50 = vmul.f32 %v1616_v30, %v1581_v46  ;;  %v1621_v32 = vmul.f32 %v1617_v31, %v1581_v46 }
 0x18e   : > { %v1622_v43 = vadd.f32 %v1618_v26, %v1610_v22  ;;  %v1623_v14 = vadd.f32 %v1619_v29, %v1611_v56  ;;  %v1177_v55 = vrot.slane %v3432_v0, 4  ;;  %v1184_v42 = vrot.slane %v3438_v48, 4 }
 0x18f   : > { %v1624_v36 = vadd.f32 %v1620_v50, %v1612_v7  ;;  %v1625_v34 = vadd.f32 %v1621_v32, %v1613_v54  ;;  %v3444_v30 = vsel %vm1175_vm0, %v3428_v24, -inf  ;;  %v3448_v31 = vsel %vm1175_vm0, %v3434_v33, -inf }
 0x190   : > { %v1626_v39 = vperm.slane %v1622_v43, 0  ;;  %v1627_v23 = vperm.slane %v1623_v14, 0  ;;  %v1634_v59 = vperm.slane %v1622_v43, 1  ;;  %v1635_v4 = vperm.slane %v1623_v14, 1 }
 0x191   : > { %v1628_v40 = vperm.slane %v1624_v36, 0  ;;  %v1629_v44 = vperm.slane %v1625_v34, 0  ;;  %v1636_v28 = vperm.slane %v1624_v36, 1  ;;  %v1637_v41 = vperm.slane %v1625_v34, 1 }
 0x192   : > { %v1630_v19 = vmul.f32 %v1626_v39, %v1622_v43  ;;  %v1631_v63 = vmul.f32 %v1627_v23, %v1622_v43  ;;  %v1638_v53 = vmul.f32 %v1634_v59, %v1623_v14  ;;  %v1639_v46 = vmul.f32 %v1635_v4, %v1623_v14 }
 0x193   : > { %v1632_v35 = vmul.f32 %v1628_v40, %v1622_v43  ;;  %v1633_v47 = vmul.f32 %v1629_v44, %v1622_v43  ;;  %v1640_v11 = vmul.f32 %v1636_v28, %v1623_v14  ;;  %v1641_v3 = vmul.f32 %v1637_v41, %v1623_v14 }
 0x194   : > { %v1642_v21 = vadd.f32 %v1638_v53, %v1630_v19  ;;  %v1643_v15 = vadd.f32 %v1639_v46, %v1631_v63  ;;  %v1646_v27 = vperm.slane %v1622_v43, 2  ;;  %v1647_v18 = vperm.slane %v1623_v14, 2 }
 0x195   : > { %v1644_v20 = vadd.f32 %v1640_v11, %v1632_v35  ;;  %v1645_v49 = vadd.f32 %v1641_v3, %v1633_v47  ;;  %v1648_v58 = vperm.slane %v1624_v36, 2  ;;  %v1649_v60 = vperm.slane %v1625_v34, 2 }
 0x196   : > { %v1650_v10 = vmul.f32 %v1646_v27, %v1624_v36  ;;  %v1651_v17 = vmul.f32 %v1647_v18, %v1624_v36  ;;  %v1658_v16 = vperm.slane %v1622_v43, 3  ;;  %v1659_v6 = vperm.slane %v1623_v14, 3 }
 0x197   : > { %v1652_v57 = vmul.f32 %v1648_v58, %v1624_v36  ;;  %v1653_v12 = vmul.f32 %v1649_v60, %v1624_v36  ;;  %v1660_v8 = vperm.slane %v1624_v36, 3  ;;  %v1661_v52 = vperm.slane %v1625_v34, 3 }
 0x198   : > { %v1654_v2 = vadd.f32 %v1650_v10, %v1642_v21  ;;  %v1655_v25 = vadd.f32 %v1651_v17, %v1643_v15  ;;  %v1662_v62 = vmul.f32 %v1658_v16, %v1625_v34  ;;  %v1663_v1 = vmul.f32 %v1659_v6, %v1625_v34 }
 0x199   : > { %v1656_v13 = vadd.f32 %v1652_v57, %v1644_v20  ;;  %v1657_v38 = vadd.f32 %v1653_v12, %v1645_v49  ;;  %v1664_v51 = vmul.f32 %v1660_v8, %v1625_v34  ;;  %v1665_v37 = vmul.f32 %v1661_v52, %v1625_v34 }
 0x19a   : > { %v1666_v5 = vadd.f32 %v1662_v62, %v1654_v2  ;;  %v1667_v61 = vadd.f32 %v1663_v1, %v1655_v25  ;;  %v3451_v8 = vmax.f32 %v3432_v0, %v1177_v55  ;;  %v1191_v52 = vrot.slane %v3444_v30, 4 }
 0x19b   : > { %v1668_v22 = vadd.f32 %v1664_v51, %v1656_v13  ;;  %v1669_v56 = vadd.f32 %v1665_v37, %v1657_v38  ;;  %v3455_v62 = vmax.f32 %v3438_v48, %v1184_v42  ;;  %v1198_v1 = vrot.slane %v3448_v31, 4 }
 0x19c   : > { %v1670_v26 = vperm.slane %v1666_v5, 0  ;;  %v1671_v29 = vperm.slane %v1667_v61, 0  ;;  %v1678_v7 = vperm.slane %v1666_v5, 1  ;;  %v1679_v54 = vperm.slane %v1667_v61, 1 }
 0x19d   : > { %v1672_v50 = vperm.slane %v1668_v22, 0  ;;  %v1673_v32 = vperm.slane %v1669_v56, 0  ;;  %v1680_v43 = vperm.slane %v1668_v22, 1  ;;  %v1681_v14 = vperm.slane %v1669_v56, 1 }
 0x19e   : > { %v1674_v36 = vmul.f32 %v1670_v26, %v1666_v5  ;;  %v1675_v34 = vmul.f32 %v1671_v29, %v1666_v5  ;;  %v1682_v39 = vmul.f32 %v1678_v7, %v1667_v61  ;;  %v1683_v23 = vmul.f32 %v1679_v54, %v1667_v61 }
 0x19f   : > { %v1676_v59 = vmul.f32 %v1672_v50, %v1666_v5  ;;  %v1677_v4 = vmul.f32 %v1673_v32, %v1666_v5  ;;  %v1684_v40 = vmul.f32 %v1680_v43, %v1667_v61  ;;  %v1685_v44 = vmul.f32 %v1681_v14, %v1667_v61 }
 0x1a0   : > { %v1686_v28 = vadd.f32 %v1682_v39, %v1674_v36  ;;  %v1687_v41 = vadd.f32 %v1683_v23, %v1675_v34  ;;  %v1690_v19 = vperm.slane %v1666_v5, 2  ;;  %v1691_v63 = vperm.slane %v1667_v61, 2 }
 0x1a1   : > { %v1688_v53 = vadd.f32 %v1684_v40, %v1676_v59  ;;  %v1689_v46 = vadd.f32 %v1685_v44, %v1677_v4  ;;  %v1692_v35 = vperm.slane %v1668_v22, 2  ;;  %v1693_v47 = vperm.slane %v1669_v56, 2 }
 0x1a2   : > { %v1694_v11 = vmul.f32 %v1690_v19, %v1668_v22  ;;  %v1695_v3 = vmul.f32 %v1691_v63, %v1668_v22  ;;  %v1702_v21 = vperm.slane %v1666_v5, 3  ;;  %v1703_v15 = vperm.slane %v1667_v61, 3 }
 0x1a3   : > { %v1696_v27 = vmul.f32 %v1692_v35, %v1668_v22  ;;  %v1697_v18 = vmul.f32 %v1693_v47, %v1668_v22  ;;  %v1704_v20 = vperm.slane %v1668_v22, 3  ;;  %v1705_v49 = vperm.slane %v1669_v56, 3 }
 0x1a4   : > { %v1698_v58 = vadd.f32 %v1694_v11, %v1686_v28  ;;  %v1699_v60 = vadd.f32 %v1695_v3, %v1687_v41  ;;  %v1706_v10 = vmul.f32 %v1702_v21, %v1669_v56  ;;  %v1707_v17 = vmul.f32 %v1703_v15, %v1669_v56 }
 0x1a5   : > { %v1700_v16 = vadd.f32 %v1696_v27, %v1688_v53  ;;  %v1701_v6 = vadd.f32 %v1697_v18, %v1689_v46  ;;  %v1708_v57 = vmul.f32 %v1704_v20, %v1669_v56  ;;  %v1709_v12 = vmul.f32 %v1705_v49, %v1669_v56 }
 0x1a6   : > { %v1710_v2 = vadd.f32 %v1706_v10, %v1698_v58  ;;  %v1711_v25 = vadd.f32 %v1707_v17, %v1699_v60  ;;  %v1179_v20 = vrot.slane %v3451_v8, 2  ;;  %v3460_v49 = vmax.f32 %v3444_v30, %v1191_v52 }
 0x1a7   : > { %v1712_v13 = vadd.f32 %v1708_v57, %v1700_v16  ;;  %v1713_v38 = vadd.f32 %v1709_v12, %v1701_v6  ;;  %v1186_v10 = vrot.slane %v3455_v62, 2  ;;  %v3464_v17 = vmax.f32 %v3448_v31, %v1198_v1 }
 0x1a8   : > { %v1714_v51 = vperm.slane %v1710_v2, 0  ;;  %v1715_v37 = vperm.slane %v1711_v25, 0  ;;  %v1722_v5 = vperm.slane %v1710_v2, 1  ;;  %v1723_v61 = vperm.slane %v1711_v25, 1 }
 0x1a9   : > { %v1716_v22 = vperm.slane %v1712_v13, 0  ;;  %v1717_v56 = vperm.slane %v1713_v38, 0  ;;  %v1724_v26 = vperm.slane %v1712_v13, 1  ;;  %v1725_v0 = vperm.slane %v1713_v38, 1 }
 0x1aa   : > { %v1718_v55 = vmul.f32 %v1714_v51, %v1710_v2  ;;  %v1719_v29 = vmul.f32 %v1715_v37, %v1710_v2  ;;  %v1726_v7 = vmul.f32 %v1722_v5, %v1711_v25  ;;  %v1727_v54 = vmul.f32 %v1723_v61, %v1711_v25 }
 0x1ab   : > { %v1720_v50 = vmul.f32 %v1716_v22, %v1710_v2  ;;  %v1721_v32 = vmul.f32 %v1717_v56, %v1710_v2  ;;  %v1728_v48 = vmul.f32 %v1724_v26, %v1711_v25  ;;  %v1729_v42 = vmul.f32 %v1725_v0, %v1711_v25 }
 0x1ac   : > { %v1730_v43 = vadd.f32 %v1726_v7, %v1718_v55  ;;  %v1731_v14 = vadd.f32 %v1727_v54, %v1719_v29  ;;  %v1734_v36 = vperm.slane %v1710_v2, 2  ;;  %v1735_v34 = vperm.slane %v1711_v25, 2 }
 0x1ad   : > { %v1732_v39 = vadd.f32 %v1728_v48, %v1720_v50  ;;  %v1733_v23 = vadd.f32 %v1729_v42, %v1721_v32  ;;  %v1736_v59 = vperm.slane %v1712_v13, 2  ;;  %v1737_v4 = vperm.slane %v1713_v38, 2 }
 0x1ae   : > { %v1738_v40 = vmul.f32 %v1734_v36, %v1712_v13  ;;  %v1739_v44 = vmul.f32 %v1735_v34, %v1712_v13  ;;  %v1746_v28 = vperm.slane %v1710_v2, 3  ;;  %v1747_v41 = vperm.slane %v1711_v25, 3 }
 0x1af   : > { %v1740_v19 = vmul.f32 %v1736_v59, %v1712_v13  ;;  %v1741_v63 = vmul.f32 %v1737_v4, %v1712_v13  ;;  %v1748_v53 = vperm.slane %v1712_v13, 3  ;;  %v1749_v46 = vperm.slane %v1713_v38, 3 }
 0x1b0   : > { %v1742_v35 = vadd.f32 %v1738_v40, %v1730_v43  ;;  %v1743_v47 = vadd.f32 %v1739_v44, %v1731_v14  ;;  %v1750_v11 = vmul.f32 %v1746_v28, %v1713_v38  ;;  %v1751_v3 = vmul.f32 %v1747_v41, %v1713_v38 }
 0x1b1   : > { %v1744_v21 = vadd.f32 %v1740_v19, %v1732_v39  ;;  %v1745_v15 = vadd.f32 %v1741_v63, %v1733_v23  ;;  %v1752_v27 = vmul.f32 %v1748_v53, %v1713_v38  ;;  %v1753_v18 = vmul.f32 %v1749_v46, %v1713_v38 }
 0x1b2   : > { %v1754_v58 = vadd.f32 %v1750_v11, %v1742_v35  ;;  %v1755_v60 = vadd.f32 %v1751_v3, %v1743_v47  ;;  %v3467_v53 = vmax.f32 %v3451_v8, %v1179_v20  ;;  %v1193_v46 = vrot.slane %v3460_v49, 2 }
 0x1b3   : > { %v1756_v16 = vadd.f32 %v1752_v27, %v1744_v21  ;;  %v1757_v6 = vadd.f32 %v1753_v18, %v1745_v15  ;;  %v3471_v11 = vmax.f32 %v3455_v62, %v1186_v10  ;;  %v1200_v3 = vrot.slane %v3464_v17, 2 }
 0x1b4   : > { %v1758_v57 = vperm.slane %v1754_v58, 0  ;;  %v1759_v12 = vperm.slane %v1755_v60, 0  ;;  %v1766_v2 = vperm.slane %v1754_v58, 1  ;;  %v1767_v25 = vperm.slane %v1755_v60, 1 }
 0x1b5   : > { %v1760_v13 = vperm.slane %v1756_v16, 0  ;;  %v1761_v38 = vperm.slane %v1757_v6, 0  ;;  %v1768_v51 = vperm.slane %v1756_v16, 1  ;;  %v1769_v37 = vperm.slane %v1757_v6, 1 }
 0x1b6   : > { %v1762_v5 = vmul.f32 %v1758_v57, %v1754_v58  ;;  %v1763_v30 = vmul.f32 %v1759_v12, %v1754_v58  ;;  %v1770_v52 = vmul.f32 %v1766_v2, %v1755_v60  ;;  %v1771_v61 = vmul.f32 %v1767_v25, %v1755_v60 }
 0x1b7   : > { %v1764_v22 = vmul.f32 %v1760_v13, %v1754_v58  ;;  %v1765_v56 = vmul.f32 %v1761_v38, %v1754_v58  ;;  %v1772_v26 = vmul.f32 %v1768_v51, %v1755_v60  ;;  %v1773_v0 = vmul.f32 %v1769_v37, %v1755_v60 }
 0x1b8   : > { %v1774_v31 = vadd.f32 %v1770_v52, %v1762_v5  ;;  %v1775_v1 = vadd.f32 %v1771_v61, %v1763_v30  ;;  %v1778_v55 = vperm.slane %v1754_v58, 2  ;;  %v1779_v29 = vperm.slane %v1755_v60, 2 }
 0x1b9   : > { %v1776_v7 = vadd.f32 %v1772_v26, %v1764_v22  ;;  %v1777_v54 = vadd.f32 %v1773_v0, %v1765_v56  ;;  %v1780_v50 = vperm.slane %v1756_v16, 2  ;;  %v1781_v32 = vperm.slane %v1757_v6, 2 }
 0x1ba   : > { %v1782_v48 = vmul.f32 %v1778_v55, %v1756_v16  ;;  %v1783_v42 = vmul.f32 %v1779_v29, %v1756_v16  ;;  %v1790_v43 = vperm.slane %v1754_v58, 3  ;;  %v1791_v14 = vperm.slane %v1755_v60, 3 }
 0x1bb   : > { %v1784_v36 = vmul.f32 %v1780_v50, %v1756_v16  ;;  %v1785_v34 = vmul.f32 %v1781_v32, %v1756_v16  ;;  %v1792_v39 = vperm.slane %v1756_v16, 3  ;;  %v1793_v23 = vperm.slane %v1757_v6, 3 }
 0x1bc   : > { %v1786_v59 = vadd.f32 %v1782_v48, %v1774_v31  ;;  %v1787_v4 = vadd.f32 %v1783_v42, %v1775_v1  ;;  %v1794_v40 = vmul.f32 %v1790_v43, %v1757_v6  ;;  %v1795_v44 = vmul.f32 %v1791_v14, %v1757_v6 }
 0x1bd   : > { %v1788_v28 = vadd.f32 %v1784_v36, %v1776_v7  ;;  %v1789_v41 = vadd.f32 %v1785_v34, %v1777_v54  ;;  %v1796_v19 = vmul.f32 %v1792_v39, %v1757_v6  ;;  %v1797_v63 = vmul.f32 %v1793_v23, %v1757_v6 }
 0x1be   : > { %v1798_v35 = vadd.f32 %v1794_v40, %v1786_v59  ;;  %v1799_v47 = vadd.f32 %v1795_v44, %v1787_v4  ;;  %v1181_v39 = vrot.slane %v3467_v53, 1  ;;  %v3476_v23 = vmax.f32 %v3460_v49, %v1193_v46 }
 0x1bf   : > { %v1800_v21 = vadd.f32 %v1796_v19, %v1788_v28  ;;  %v1801_v15 = vadd.f32 %v1797_v63, %v1789_v41  ;;  %v1188_v40 = vrot.slane %v3471_v11, 1  ;;  %v3480_v44 = vmax.f32 %v3464_v17, %v1200_v3 }
 0x1c0   : > { %v1802_v27 = vperm.slane %v1798_v35, 0  ;;  %v1803_v18 = vperm.slane %v1799_v47, 0  ;;  %v1810_v58 = vperm.slane %v1798_v35, 1  ;;  %v1811_v60 = vperm.slane %v1799_v47, 1 }
 0x1c1   : > { %v1804_v16 = vperm.slane %v1800_v21, 0  ;;  %v1805_v6 = vperm.slane %v1801_v15, 0  ;;  %v1812_v57 = vperm.slane %v1800_v21, 1  ;;  %v1813_v8 = vperm.slane %v1801_v15, 1 }
 0x1c2   : > { %v1806_v20 = vmul.f32 %v1802_v27, %v1798_v35  ;;  %v1807_v12 = vmul.f32 %v1803_v18, %v1798_v35  ;;  %v1814_v2 = vmul.f32 %v1810_v58, %v1799_v47  ;;  %v1815_v25 = vmul.f32 %v1811_v60, %v1799_v47 }
 0x1c3   : > { %v1808_v13 = vmul.f32 %v1804_v16, %v1798_v35  ;;  %v1809_v38 = vmul.f32 %v1805_v6, %v1798_v35  ;;  %v1816_v62 = vmul.f32 %v1812_v57, %v1799_v47  ;;  %v1817_v10 = vmul.f32 %v1813_v8, %v1799_v47 }
 0x1c4   : > { %v1818_v51 = vadd.f32 %v1814_v2, %v1806_v20  ;;  %v1819_v37 = vadd.f32 %v1815_v25, %v1807_v12  ;;  %v1822_v5 = vperm.slane %v1798_v35, 2  ;;  %v1823_v30 = vperm.slane %v1799_v47, 2 }
 0x1c5   : > { %v1820_v52 = vadd.f32 %v1816_v62, %v1808_v13  ;;  %v1821_v61 = vadd.f32 %v1817_v10, %v1809_v38  ;;  %v1824_v22 = vperm.slane %v1800_v21, 2  ;;  %v1825_v56 = vperm.slane %v1801_v15, 2 }
 0x1c6   : > { %v1826_v26 = vmul.f32 %v1822_v5, %v1800_v21  ;;  %v1827_v0 = vmul.f32 %v1823_v30, %v1800_v21  ;;  %v1834_v31 = vperm.slane %v1798_v35, 3  ;;  %v1835_v1 = vperm.slane %v1799_v47, 3 }
 0x1c7   : > { %v1828_v55 = vmul.f32 %v1824_v22, %v1800_v21  ;;  %v1829_v29 = vmul.f32 %v1825_v56, %v1800_v21  ;;  %v1836_v7 = vperm.slane %v1800_v21, 3  ;;  %v1837_v54 = vperm.slane %v1801_v15, 3 }
 0x1c8   : > { %v1830_v50 = vadd.f32 %v1826_v26, %v1818_v51  ;;  %v1831_v32 = vadd.f32 %v1827_v0, %v1819_v37  ;;  %v1838_v48 = vmul.f32 %v1834_v31, %v1801_v15  ;;  %v1839_v42 = vmul.f32 %v1835_v1, %v1801_v15 }
 0x1c9   : > { %v1832_v43 = vadd.f32 %v1828_v55, %v1820_v52  ;;  %v1833_v14 = vadd.f32 %v1829_v29, %v1821_v61  ;;  %v1840_v36 = vmul.f32 %v1836_v7, %v1801_v15  ;;  %v1841_v34 = vmul.f32 %v1837_v54, %v1801_v15 }
 0x1ca   : > { %v1842_v59 = vadd.f32 %v1838_v48, %v1830_v50  ;;  %v1843_v4 = vadd.f32 %v1839_v42, %v1831_v32  ;;  %v3483_v7 = vmax.f32 %v3467_v53, %v1181_v39  ;;  %v1195_v54 = vrot.slane %v3476_v23, 1 }
 0x1cb   : > { %v1844_v28 = vadd.f32 %v1840_v36, %v1832_v43  ;;  %v1845_v41 = vadd.f32 %v1841_v34, %v1833_v14  ;;  %v3487_v48 = vmax.f32 %v3471_v11, %v1188_v40  ;;  %v1202_v42 = vrot.slane %v3480_v44, 1 }
 0x1cc   : > { %v1846_v19 = vperm.slane %v1842_v59, 0  ;;  %v1847_v63 = vperm.slane %v1843_v4, 0  ;;  %v1854_v35 = vperm.slane %v1842_v59, 1  ;;  %v1855_v47 = vperm.slane %v1843_v4, 1 }
 0x1cd   : > { %v1848_v21 = vperm.slane %v1844_v28, 0  ;;  %v1849_v15 = vperm.slane %v1845_v41, 0  ;;  %v1856_v27 = vperm.slane %v1844_v28, 1  ;;  %v1857_v18 = vperm.slane %v1845_v41, 1 }
 0x1ce   : > { %v1850_v58 = vmul.f32 %v1846_v19, %v1842_v59  ;;  %v1851_v49 = vmul.f32 %v1847_v63, %v1842_v59  ;;  %v1858_v46 = vmul.f32 %v1854_v35, %v1843_v4  ;;  %v1859_v60 = vmul.f32 %v1855_v47, %v1843_v4 }
 0x1cf   : > { %v1852_v16 = vmul.f32 %v1848_v21, %v1842_v59  ;;  %v1853_v6 = vmul.f32 %v1849_v15, %v1842_v59  ;;  %v1860_v57 = vmul.f32 %v1856_v27, %v1843_v4  ;;  %v1861_v8 = vmul.f32 %v1857_v18, %v1843_v4 }
 0x1d0   : > { %v1862_v17 = vadd.f32 %v1858_v46, %v1850_v58  ;;  %v1863_v3 = vadd.f32 %v1859_v60, %v1851_v49  ;;  %v1866_v20 = vperm.slane %v1842_v59, 2  ;;  %v1867_v12 = vperm.slane %v1843_v4, 2 }
 0x1d1   : > { %v1864_v2 = vadd.f32 %v1860_v57, %v1852_v16  ;;  %v1865_v25 = vadd.f32 %v1861_v8, %v1853_v6  ;;  %v1868_v13 = vperm.slane %v1844_v28, 2  ;;  %v1869_v38 = vperm.slane %v1845_v41, 2 }
 0x1d2   : > { %v1870_v62 = vmul.f32 %v1866_v20, %v1844_v28  ;;  %v1871_v10 = vmul.f32 %v1867_v12, %v1844_v28  ;;  %v1878_v51 = vperm.slane %v1842_v59, 3  ;;  %v1879_v37 = vperm.slane %v1843_v4, 3 }
 0x1d3   : > { %v1872_v5 = vmul.f32 %v1868_v13, %v1844_v28  ;;  %v1873_v30 = vmul.f32 %v1869_v38, %v1844_v28  ;;  %v1880_v52 = vperm.slane %v1844_v28, 3  ;;  %v1881_v61 = vperm.slane %v1845_v41, 3 }
 0x1d4   : > { %v1874_v22 = vadd.f32 %v1870_v62, %v1862_v17  ;;  %v1875_v56 = vadd.f32 %v1871_v10, %v1863_v3  ;;  %v1882_v26 = vmul.f32 %v1878_v51, %v1845_v41  ;;  %v1883_v0 = vmul.f32 %v1879_v37, %v1845_v41 }
 0x1d5   : > { %v1876_v31 = vadd.f32 %v1872_v5, %v1864_v2  ;;  %v1877_v1 = vadd.f32 %v1873_v30, %v1865_v25  ;;  %v1884_v55 = vmul.f32 %v1880_v52, %v1845_v41  ;;  %v1885_v29 = vmul.f32 %v1881_v61, %v1845_v41 }
 0x1d6   : > { %v1886_v50 = vadd.f32 %v1882_v26, %v1874_v22  ;;  %v1887_v32 = vadd.f32 %v1883_v0, %v1875_v56  ;;  %v3491_v52 = vmax.f32 %v3476_v23, %v1195_v54  ;;  %v3494_v56 = vmax.f32 %v3480_v44, %v1202_v42 }
 0x1d7   : > { %v1888_v43 = vadd.f32 %v1884_v55, %v1876_v31  ;;  %v1889_v14 = vadd.f32 %v1885_v29, %v1877_v1  ;;  %v1204_v31 = vsub.f32 %v3424_v45, %v3483_v7  ;;  %v1205_v29 = vsub.f32 %v3426_v9, %v3487_v48 }
 0x1d8   : > { %v1890_v36 = vperm.slane %v1886_v50, 0  ;;  %v1891_v34 = vperm.slane %v1887_v32, 0  ;;  %v1898_v59 = vperm.slane %v1886_v50, 1  ;;  %v1899_v4 = vperm.slane %v1887_v32, 1 }
 0x1d9   : > { %v1892_v28 = vperm.slane %v1888_v43, 0  ;;  %v1893_v41 = vperm.slane %v1889_v14, 0  ;;  %v1900_v19 = vperm.slane %v1888_v43, 1  ;;  %v1901_v53 = vperm.slane %v1889_v14, 1 }
 0x1da   : > { %v1894_v39 = vmul.f32 %v1890_v36, %v1886_v50  ;;  %v1895_v63 = vmul.f32 %v1891_v34, %v1886_v50  ;;  %v1902_v35 = vmul.f32 %v1898_v59, %v1887_v32  ;;  %v1903_v47 = vmul.f32 %v1899_v4, %v1887_v32 }
 0x1db   : > { %v1896_v21 = vmul.f32 %v1892_v28, %v1886_v50  ;;  %v1897_v15 = vmul.f32 %v1893_v41, %v1886_v50  ;;  %v1904_v11 = vmul.f32 %v1900_v19, %v1887_v32  ;;  %v1905_v40 = vmul.f32 %v1901_v53, %v1887_v32 }
 0x1dc   : > { %v1906_v27 = vadd.f32 %v1902_v35, %v1894_v39  ;;  %v1907_v18 = vadd.f32 %v1903_v47, %v1895_v63  ;;  %v1910_v58 = vperm.slane %v1886_v50, 2  ;;  %v1911_v49 = vperm.slane %v1887_v32, 2 }
 0x1dd   : > { %v1908_v46 = vadd.f32 %v1904_v11, %v1896_v21  ;;  %v1909_v60 = vadd.f32 %v1905_v40, %v1897_v15  ;;  %v1912_v16 = vperm.slane %v1888_v43, 2  ;;  %v1913_v6 = vperm.slane %v1889_v14, 2 }
 0x1de   : > { %v1914_v57 = vmul.f32 %v1910_v58, %v1888_v43  ;;  %v1915_v8 = vmul.f32 %v1911_v49, %v1888_v43  ;;  %v1922_v17 = vperm.slane %v1886_v50, 3  ;;  %v1923_v3 = vperm.slane %v1887_v32, 3 }
 0x1df   : > { %v1916_v20 = vmul.f32 %v1912_v16, %v1888_v43  ;;  %v1917_v12 = vmul.f32 %v1913_v6, %v1888_v43  ;;  %v1924_v2 = vperm.slane %v1888_v43, 3  ;;  %v1925_v25 = vperm.slane %v1889_v14, 3 }
 0x1e0   : > { %v1918_v13 = vadd.f32 %v1914_v57, %v1906_v27  ;;  %v1919_v38 = vadd.f32 %v1915_v8, %v1907_v18  ;;  %v1926_v62 = vmul.f32 %v1922_v17, %v1889_v14  ;;  %v1927_v10 = vmul.f32 %v1923_v3, %v1889_v14 }
 0x1e1   : > { %v1920_v51 = vadd.f32 %v1916_v20, %v1908_v46  ;;  %v1921_v37 = vadd.f32 %v1917_v12, %v1909_v60  ;;  %v1928_v5 = vmul.f32 %v1924_v2, %v1889_v14  ;;  %v1929_v30 = vmul.f32 %v1925_v25, %v1889_v14  ;;  %v1257_v14 = vld [vmem:[%s448_s13] sm:$0xf] }
 0x1e2   : > { %v1930_v61 = vadd.f32 %v1926_v62, %v1918_v13  ;;  %v1931_v22 = vadd.f32 %v1927_v10, %v1919_v38  ;;  %v1206_v23 = vsub.f32 %v3428_v24, %v3491_v52  ;;  %v1207_v44 = vsub.f32 %v3434_v33, %v3494_v56 }
 0x1e3   : > { %v1932_v26 = vadd.f32 %v1928_v5, %v1920_v51  ;;  %v1933_v0 = vadd.f32 %v1929_v30, %v1921_v37  ;;  %v1208_v54 = vmul.f32 1.442695, %v1204_v31  ;;  %v1210_v45 = vmul.f32 1.442695, %v1205_v29 }
 0x1e4   : > { %v1934_v1 = vmax.f32 %v1930_v61, 1e-30  ;;  %v1935_v55 = vmax.f32 %v1931_v22, 1e-30  ;;  %v1212_v42 = vmul.f32 1.442695, %v1206_v23 }
 0x1e5   : > { %v1936_v50 = vmax.f32 %v1932_v26, 1e-30  ;;  %v1937_v32 = vmax.f32 %v1933_v0, 1e-30  ;;  %v1214_v9 = vmul.f32 1.442695, %v1207_v44 }
 0x1e6   : > { %2394 = vlog2.f32 %v1934_v1 }
 0x1e7   : > { %2396 = vlog2.f32 %v1935_v55 }
 0x1e8   : > { %2398 = vlog2.f32 %v1936_v50 }
 0x1e9   : > { %2400 = vlog2.f32 %v1937_v32 }
 0x1ea   : > { %2402 = vpow2.f32 %v1208_v54 }
 0x1eb   : > { %2404 = vpow2.f32 %v1210_v45 }
 0x1ec   : > { %v2395_v43 = vpop.eup %2394  ;;  %2406 = vpow2.f32 %v1212_v42 }
 0x1ed   : > { %v2397_v36 = vpop.eup %2396  ;;  %v1939_v24 = vmul.f32 0.6931472, %v2395_v43  ;;  %2408 = vpow2.f32 %v1214_v9 }
 0x1ee   : > { %v2399_v34 = vpop.eup %2398  ;;  %v1941_v33 = vmul.f32 0.6931472, %v2397_v36 }
 0x1ef   : > { %v2401_v59 = vpop.eup %2400  ;;  %v1943_v4 = vmul.f32 0.6931472, %v2399_v34  ;;  %v1946_v28 = vadd.f32 %v1939_v24, %v1257_v14 }
 0x1f0   : > { %v1945_v41 = vmul.f32 0.6931472, %v2401_v59  ;;  %v1947_v19 = vadd.f32 %v1941_v33, %v1257_v14  ;;  %v2403_v63 = vpop.eup %2402 }
 0x1f1   : > { %v1948_v53 = vadd.f32 %v1943_v4, %v1257_v14  ;;  %v1950_v39 = vsel %vm1175_vm0, %v1946_v28, -inf  ;;  %v2405_v15 = vpop.eup %2404  ;;  %v1216_v60 = vsel %vm1175_vm0, %v2403_v63, 0.0 }
 0x1f2   : > { %v1949_v35 = vadd.f32 %v1945_v41, %v1257_v14  ;;  %v1951_v47 = vrot.slane %v1950_v39, 4  ;;  %v1957_v21 = vsel %vm1175_vm0, %v1947_v19, -inf  ;;  %v2407_v27 = vpop.eup %2406  ;;  %v1223_v57 = vsel %vm1175_vm0, %v2405_v15, 0.0 }
 0x1f3   : > { %v1958_v11 = vrot.slane %v1957_v21, 4  ;;  %v1964_v40 = vsel %vm1175_vm0, %v1948_v53, -inf  ;;  %v2409_v46 = vpop.eup %2408  ;;  %v1230_v3 = vsel %vm1175_vm0, %v2407_v27, 0.0  ;;  %v1217_v2 = vrot.slane %v1216_v60, 4 }
 0x1f4   : > { %v1952_v18 = vmax.f32 %v1950_v39, %v1951_v47  ;;  %v1965_v58 = vrot.slane %v1964_v40, 4  ;;  %v1971_v49 = vsel %vm1175_vm0, %v1949_v35, -inf  ;;  %v1237_v25 = vsel %vm1175_vm0, %v2409_v46, 0.0 }
 0x1f5   : > { %v1959_v16 = vmax.f32 %v1957_v21, %v1958_v11  ;;  %v1972_v6 = vrot.slane %v1971_v49, 4  ;;  %v1224_v62 = vrot.slane %v1223_v57, 4  ;;  %v1231_v37 = vrot.slane %v1230_v3, 4 }
 0x1f6   : > { %v1953_v8 = vrot.slane %v1952_v18, 2  ;;  %v1966_v17 = vmax.f32 %v1964_v40, %v1965_v58  ;;  %v1238_v61 = vrot.slane %v1237_v25, 4  ;;  %v1218_v0 = vadd.f32 %v1217_v2, %v1216_v60 }
 0x1f7   : > { %v1960_v20 = vrot.slane %v1959_v16, 2  ;;  %v1973_v12 = vmax.f32 %v1971_v49, %v1972_v6  ;;  %v1225_v55 = vadd.f32 %v1224_v62, %v1223_v57  ;;  %v1232_v32 = vadd.f32 %v1231_v37, %v1230_v3 }
 0x1f8   : > { %v1954_v13 = vmax.f32 %v1952_v18, %v1953_v8  ;;  %v1967_v38 = vrot.slane %v1966_v17, 2  ;;  %v1239_v54 = vadd.f32 %v1238_v61, %v1237_v25  ;;  %v1219_v9 = vrot.slane %v1218_v0, 2 }
 0x1f9   : > { %v1961_v10 = vmax.f32 %v1959_v16, %v1960_v20  ;;  %v1974_v51 = vrot.slane %v1973_v12, 2  ;;  %v1226_v36 = vrot.slane %v1225_v55, 2  ;;  %v1233_v33 = vrot.slane %v1232_v32, 2 }
 0x1fa   : > { %v1955_v5 = vrot.slane %v1954_v13, 1  ;;  %v1968_v30 = vmax.f32 %v1966_v17, %v1967_v38  ;;  %v1240_v4 = vrot.slane %v1239_v54, 2 }
 0x1fb   : > { %v1962_v22 = vrot.slane %v1961_v10, 1  ;;  %v1975_v26 = vmax.f32 %v1973_v12, %v1974_v51  ;;  %v1227_v39 = vadd.f32 %v1226_v36, %v1225_v55  ;;  %v1234_v63 = vadd.f32 %v1233_v33, %v1232_v32 }
 0x1fc   : > { %v3516_v31 = vmax.f32 %v1954_v13, %v1955_v5  ;;  %v1969_v1 = vrot.slane %v1968_v30, 1 }
 0x1fd   : > { %v3518_v29 = vmax.f32 %v1961_v10, %v1962_v22  ;;  %v1976_v50 = vrot.slane %v1975_v26, 1  ;;  %v1228_v15 = vrot.slane %v1227_v39, 1  ;;  %v1235_v40 = vrot.slane %v1234_v63, 1 }
 0x1fe   : > { %v3520_v23 = vmax.f32 %v1968_v30, %v1969_v1  ;;  %v1978_v44 = vsub.f32 %v1946_v28, %v3516_v31  ;;  %v1220_v28 = vadd.f32 %v1219_v9, %v1218_v0 }
 0x1ff   : > { %v3523_v45 = vmax.f32 %v1975_v26, %v1976_v50  ;;  %v1979_v42 = vsub.f32 %v1947_v19, %v3518_v29  ;;  %v1241_v19 = vadd.f32 %v1240_v4, %v1239_v54  ;;  %v1229_v17 = vadd.f32 %v1228_v15, %v1227_v39 }
 0x200   : > { %v1980_v43 = vsub.f32 %v1948_v53, %v3520_v23  ;;  %v1982_v14 = vmul.f32 1.442695, %v1978_v44  ;;  %v1221_v21 = vrot.slane %v1220_v28, 1  ;;  %v1236_v12 = vadd.f32 %v1235_v40, %v1234_v63 }
 0x201   : > { %v1981_v24 = vsub.f32 %v1949_v35, %v3523_v45  ;;  %v1984_v34 = vmul.f32 1.442695, %v1979_v42  ;;  %v1242_v49 = vrot.slane %v1241_v19, 1 }
 0x202   : > { %2410 = vpow2.f32 %v1982_v14  ;;  %v1986_v59 = vmul.f32 1.442695, %v1980_v43  ;;  %v1222_v16 = vadd.f32 %v1221_v21, %v1220_v28 }
 0x203   : > { %2412 = vpow2.f32 %v1984_v34  ;;  %v1988_v41 = vmul.f32 1.442695, %v1981_v24  ;;  %v1243_v13 = vadd.f32 %v1242_v49, %v1241_v19  ;;  %v2046_v19 = vld [vmem:[%s452_s12] sm:$0xf] }
 0x204   : > { %2414 = vpow2.f32 %v1986_v59  ;;  %v2048_v40 = vrot.slane %v2046_v19, 1 }
 0x205   : > { %2416 = vpow2.f32 %v1988_v41 }
 0x206   : > { %2418 = vlog2.f32 %v1222_v16 }
 0x207   : > { %2420 = vlog2.f32 %v1229_v17 }
 0x208   : > { %v2411_v47 = vpop.eup %2410  ;;  %2422 = vlog2.f32 %v1236_v12 }
 0x209   : > { %v2413_v53 = vpop.eup %2412  ;;  %v1990_v11 = vsel %vm1175_vm0, %v2411_v47, 0.0  ;;  %2424 = vlog2.f32 %v1243_v13 }
 0x20a   : > { %v2415_v35 = vpop.eup %2414  ;;  %v1991_v27 = vrot.slane %v1990_v11, 4  ;;  %v1997_v18 = vsel %vm1175_vm0, %v2413_v53, 0.0 }
 0x20b   : > { %v2417_v58 = vpop.eup %2416  ;;  %v1998_v46 = vrot.slane %v1997_v18, 4  ;;  %v2004_v60 = vsel %vm1175_vm0, %v2415_v35, 0.0 }
 0x20c   : > { %v1992_v6 = vadd.f32 %v1991_v27, %v1990_v11  ;;  %v2005_v57 = vrot.slane %v2004_v60, 4  ;;  %v2011_v8 = vsel %vm1175_vm0, %v2417_v58, 0.0  ;;  %v2419_v32 = vpop.eup %2418 }
 0x20d   : > { %v1999_v3 = vadd.f32 %v1998_v46, %v1997_v18  ;;  %v2012_v20 = vrot.slane %v2011_v8, 4  ;;  %v2421_v54 = vpop.eup %2420  ;;  %v1245_v14 = vmul.f32 0.6931472, %v2419_v32  ;;  %v2049_v18 = vrot.slane %v2046_v19, 2 }
 0x20e   : > { %v1993_v2 = vrot.slane %v1992_v6, 2  ;;  %v2006_v25 = vadd.f32 %v2005_v57, %v2004_v60  ;;  %v2423_v9 = vpop.eup %2422  ;;  %v1247_v36 = vmul.f32 0.6931472, %v2421_v54 }
 0x20f   : > { %v2000_v38 = vrot.slane %v1999_v3, 2  ;;  %v2013_v62 = vadd.f32 %v2012_v20, %v2011_v8  ;;  %v2425_v43 = vpop.eup %2424  ;;  %v1249_v24 = vmul.f32 0.6931472, %v2423_v9  ;;  %v1252_v4 = vadd.f32 %v1245_v14, %v3483_v7 }
 0x210   : > { %v1994_v10 = vadd.f32 %v1993_v2, %v1992_v6  ;;  %v2007_v51 = vrot.slane %v2006_v25, 2  ;;  %v1251_v33 = vmul.f32 0.6931472, %v2425_v43  ;;  %v1253_v39 = vadd.f32 %v1247_v36, %v3487_v48 }
 0x211   : > { %v2001_v37 = vadd.f32 %v2000_v38, %v1999_v3  ;;  %v2014_v5 = vrot.slane %v2013_v62, 2  ;;  %v1254_v21 = vadd.f32 %v1249_v24, %v3491_v52 }
 0x212   : > { %v1995_v30 = vrot.slane %v1994_v10, 1  ;;  %v2008_v61 = vadd.f32 %v2007_v51, %v2006_v25  ;;  %v1255_v11 = vadd.f32 %v1251_v33, %v3494_v56 }
 0x213   : > { %v2002_v22 = vrot.slane %v2001_v37, 1  ;;  %v2015_v26 = vadd.f32 %v2014_v5, %v2013_v62 }
 0x214   : > { %v1996_v0 = vadd.f32 %v1995_v30, %v1994_v10  ;;  %v2009_v1 = vrot.slane %v2008_v61, 1 }
 0x215   : > { %v2003_v55 = vadd.f32 %v2002_v22, %v2001_v37  ;;  %v2016_v50 = vrot.slane %v2015_v26, 1 }
 0x216   : > { %v2010_v44 = vadd.f32 %v2009_v1, %v2008_v61  ;;  %2426 = vlog2.f32 %v1996_v0 }
 0x217   : > { %v2017_v42 = vadd.f32 %v2016_v50, %v2015_v26  ;;  %2428 = vlog2.f32 %v2003_v55 }
 0x218   : > { %2430 = vlog2.f32 %v2010_v44 }
 0x219   : > { %2432 = vlog2.f32 %v2017_v42 }
 0x21c   : > { %v2427_v34 = vpop.eup %2426 }
 0x21d   : > { %v2429_v59 = vpop.eup %2428  ;;  %v2019_v41 = vmul.f32 0.6931472, %v2427_v34 }
 0x21e   : > { %v2431_v28 = vpop.eup %2430  ;;  %v2021_v63 = vmul.f32 0.6931472, %v2429_v59 }
 0x21f   : > { %v2433_v47 = vpop.eup %2432  ;;  %v2023_v53 = vmul.f32 0.6931472, %v2431_v28  ;;  %v2026_v15 = vadd.f32 %v2019_v41, %v3516_v31  ;;  %v2050_v31 = vrot.slane %v2046_v19, 3 }
 0x220   : > { %v2025_v7 = vmul.f32 0.6931472, %v2433_v47  ;;  %v2027_v35 = vadd.f32 %v2021_v63, %v3518_v29 }
 0x221   : > { %v2028_v48 = vadd.f32 %v2023_v53, %v3520_v23  ;;  %v2030_v27 = vadd.f32 %v2026_v15, %v1252_v4 }
 0x222   : > { %v2029_v52 = vadd.f32 %v2025_v7, %v3523_v45  ;;  %v2031_v58 = vadd.f32 %v2027_v35, %v1253_v39 }
 0x223   : > { %v2032_v49 = vadd.f32 %v2028_v48, %v1254_v21  ;;  %v2055_v56 = vadd.f32 %v2046_v19, %v2030_v27 }
 0x224   : > { %v2033_v29 = vadd.f32 %v2029_v52, %v1255_v11  ;;  %v2039_v46 = vsel %vm2038_vm1, %v2031_v58, %v2030_v27  ;;  %v2056_v23 = vadd.f32 %v2048_v40, %v2031_v58 }
 0x225   : > { %v2041_v60 = vsel %vm2040_vm2, %v2032_v49, %v2039_v46  ;;  %v2057_v16 = vadd.f32 %v2049_v18, %v2032_v49  ;;  %v2060_v57 = vsel %vm2059_vm4, %v2055_v56, -inf }
 0x226   : > { %v2043_v45 = vsel %vm2042_vm3, %v2033_v29, %v2041_v60  ;;  %v2058_v6 = vadd.f32 %v2050_v31, %v2033_v29  ;;  %v2061_v8 = vsel %vm2059_vm4, %v2056_v23, -inf }
 0x227   : > { %2045 = vst [vmem:[%s434_s14] sm:$0xf] %v2043_v45  ;;  %v2064_v17 = vmax.f32 %v2060_v57, %v2061_v8  ;;  %v2062_v3 = vsel %vm2059_vm4, %v2057_v16, -inf }
 0x228   : > { %v2063_v20 = vsel %vm2059_vm4, %v2058_v6, -inf }
 0x229   : > { %2561 = shalt.err (!%p2558_p7)
}
 0x22a   : > { %2325 = dma.vmem_to_hbm [thread:$0]  (%p2733_p11), %s2120_s15, 64, %s2122_s11, %s2103_s27   ;;  %v2065_v12 = vmax.f32 %v2062_v3, %v2063_v20 }
 0x22b   : > { %s3638_s19 = sld [smem:[#allocation24_spill]]  ;;  %s440_s29 = scalar_lea.vmem [#allocation9], %s2813_s18 }
 0x22c   : > { %v2066_v2 = vmax.f32 %v2064_v17, %v2065_v12  ;;  %s2132_s22 = sshll.u32 %s440_s29, 4  ;;  %s2108_s17 = scalar_lea.sflag [#allocation10], %s2813_s18  ;;  %s2133_s22 = int_to_ptr.vmem [resolvable:$true] %s2132_s22 }
 0x22e   : > { %v2067_v25 = vperm.slane %v2066_v2, 0 }
 0x230   : > { %v2068_v13 = vsub.f32 %v2055_v56, %v2067_v25  ;;  %v2069_v38 = vsub.f32 %v2056_v23, %v2067_v25  ;;  %v2070_v62 = vsub.f32 %v2057_v16, %v2067_v25  ;;  %v2071_v10 = vsub.f32 %v2058_v6, %v2067_v25 }
 0x231   : > { %s2130_s12 = scalar_lea.hbm %s3638_s19, %s2708_s9  ;;  %s2582_s9 = scalar_lea.hbm %s3638_s19, 2 }
 0x232   : > { %v2072_v51 = vmul.f32 1.442695, %v2068_v13  ;;  %v2074_v37 = vmul.f32 1.442695, %v2069_v38  ;;  %v2076_v5 = vmul.f32 1.442695, %v2070_v62 }
 0x233   : > { %v2078_v30 = vmul.f32 1.442695, %v2071_v10  ;;  %s2134_s23 = sshll.u32 %s2130_s12, 4  ;;  %s2135_s23 = int_to_ptr.hbm [resolvable:$true] %s2134_s23 }
 0x234   : > { %2434 = vpow2.f32 %v2072_v51  ;;  %s2576_s10 = sshra.s32 %s2135_s23, 4  ;;  %s2577_s10 = int_to_ptr.hbm [resolvable:$true] %s2576_s10 }
 0x235   : > { %2436 = vpow2.f32 %v2074_v37  ;;  %s2578_s14 = scalar_lea.hbm %s2577_s10, 1  ;;  %p2583_p6 = scmp.lt.s32.totalorder %s2577_s10, %s3638_s19 }
 0x236   : > { %2438 = vpow2.f32 %v2076_v5  ;;  %p2579_p8 = scmp.ne.s32.totalorder %s2577_s10, %s2578_s14  ;;  %p2584_p13 = scmp.lt.s32.totalorder %s2582_s9, %s2578_s14 }
 0x237   : > { %2440 = vpow2.f32 %v2078_v30 }
 0x238   : > { %p2580_p10 = pnand %p2579_p8, %p2733_p11  ;;  %p2585_p1 = por %p2584_p13, %p2583_p6 }
 0x23a   : > { %v2435_v61 = vpop.eup %2434  ;;  %p2581_p0 = pneg %p2580_p10 }
 0x23b   : > { %v2437_v22 = vpop.eup %2436 }
 0x23c   : > { %v2439_v26 = vpop.eup %2438  ;;  %v2084_v0 = vrot.slane %v2437_v22, 7  ;;  %p2586_p2 = pnand %p2585_p1, %p2581_p0 }
 0x23d   : > { %v2441_v1 = vpop.eup %2440  ;;  %v2086_v55 = vrot.slane %v2439_v26, 6 }
 0x23e   : > { %v2085_v50 = vsel %vm2038_vm1, %v2084_v0, %v2435_v61  ;;  %v2088_v32 = vrot.slane %v2441_v1, 5 }
 0x23f   : > { %v2087_v44 = vsel %vm2040_vm2, %v2086_v55, %v2085_v50 }
 0x240   : > { %v2089_v54 = vsel %vm2042_vm3, %v2088_v32, %v2087_v44 }
 0x241   : > { %v2091_v42 = vsel %vm1175_vm0, %v2089_v54, 0.0 }
 0x242   : > { %v2092_v9 = vrot.slane %v2091_v42, 4 }
 0x244   : > { %v2093_v43 = vadd.f32 %v2092_v9, %v2091_v42 }
 0x246   : > { %v2094_v14 = vrot.slane %v2093_v43, 2 }
 0x248   : > { %v2095_v36 = vadd.f32 %v2094_v14, %v2093_v43 }
 0x24a   : > { %v2096_v24 = vrot.slane %v2095_v36, 1 }
 0x24c   : > { %v2097_v34 = vadd.f32 %v2096_v24, %v2095_v36 }
 0x24e   : > { %2442 = vlog2.f32 %v2097_v34 }
 0x254   : > { %v2443_v33 = vpop.eup %2442 }
 0x255   : > { %v2099_v59 = vmul.f32 0.6931472, %v2443_v33 }
 0x257   : > { %v2100_v4 = vadd.f32 %v2099_v59, %v2066_v2 }
 0x259   : > { %2101 = vst [vmem:[%s440_s29] sm:$0x1] %v2100_v4 }
 0x25a   : > { %2589 = shalt.err (!%p2586_p2)
}
 0x25b   : > { %2326 = dma.vmem_to_hbm [thread:$0]  (%p2733_p11), %s2133_s22, 16, %s2135_s23, %s2108_s17  }
 0x25c PF: > { %s3639_s18 = sld [smem:[#allocation15_spill]]  ;;  %p2340_p3 = pnand %p2306_p9, %p2737_p12 }
 0x25e   : > { %p2341_p4 = pneg %p2340_p3 }
 0x262   : > { %s2146_s2 = sand.u32 1, %s3639_s18  }
 0x263   : > { %s2147_s24 = scalar_lea.sflag [#allocation4], %s2146_s2 }
 0x264   : > { %2615 = dma.done.wait (%p2341_p4), %s2147_s24, 64  }
 0x265   : > { %2617 = vsyncadd (%p2341_p4), %s2147_s24, 4294967232  ;;  %s2157_s26 = scalar_lea.sflag [#allocation10], %s2146_s2 }
 0x266   : > { %2619 = dma.done.wait (%p2341_p4), %s2157_s26, 16  }
 0x267   : > { %2621 = vsyncadd (%p2341_p4), %s2157_s26, 4294967280  ;;  %s3641_s30 = sld [smem:[#allocation17_spill]]  ;;  %s3644_s27 = smov %s2628_s28 }
 0x268   : > { %s3642_s1 = sld [smem:[#allocation16_spill]] }
 0x269   : > { %s3643_s29 = sld [smem:[#allocation18_spill]] }
 0x26d   : > { %p28_p11 = scmp.ge.s32.totalorder %s3641_s30, 4  }
 0x26e   : > { %s3645_s28 = smov %s3642_s1 }
 0x26f   :  { %30 = sbr.rel (!%p28_p11) target bundleno = 13 (0xd), region = 143 }
 0x274   :  { %2162 = vsyncpa [#allocation3], 1 }
 0x275   :  { %2164 = vsyncpa [#allocation3 + $0x1], 1 }
 0x276   :  { %2165 = vsyncpa [#allocation6], 1 }
 0x277   :  { %2167 = vsyncpa [#allocation6 + $0x1], 1 }
 0x278   :  { %2168 = vsyncpa [#allocation4], 1 }
 0x279   :  { %2170 = vsyncpa [#allocation4 + $0x1], 1 }
 0x27a   :  { %2171 = vsyncpa [#allocation10], 1 }
 0x27b   :  { %2173 = vsyncpa [#allocation10 + $0x1], 1 }

</bundles_post_ra>
